<compile_context>
chip_gen: v7x
topology: tpu7x:2x2x1
jax: 0.10.0
libtpu: 0.0.40
codegen_flags: <defaults>
</compile_context>

<pallas_src>
import jax
import jax.numpy as jnp
from jax import lax
from jax.experimental import pallas as pl
from jax.experimental.pallas import tpu as pltpu

LEAKY_SLOPE = 0.01  # nn.LeakyReLU default


def basenet_kernel(x_ref, Wsh_ref, bsh_ref, Wqkv_ref, bqkv_ref,
                   Whead_ref, bhead_ref, Wout_ref, bout_ref, o_ref):
    # Grid axis 0 = branch (0 = net_m, 1 = net_l); per-branch refs are already
    # sliced by the BlockSpec index maps (leading branch dim squeezed).
    #   x_ref:     (B, N)      bf16
    #   Wsh_ref:   (2, N, N)   bf16, shared-layer weights, (in, out) layout
    #   bsh_ref:   (2, 1, N)   f32
    #   Wqkv_ref:  (N, 3N)     bf16, [Q K V] fused for this branch, (in, out)
    #   bqkv_ref:  (1, 3N)     f32
    #   Whead_ref: (4, N, N)   bf16, this branch's 4 head layers, (in, out)
    #   bhead_ref: (4, 1, N)   f32
    #   Wout_ref:  (N, 128)    bf16, final Linear(N,1) padded lane-dense (col 0 real)
    #   bout_ref:  (1, 128)    f32, bias in col 0
    #   o_ref:     (B, 128)    f32, branch output in lane 0
    x = x_ref[...]
    B, N = x.shape
    inv_sqrt_n = 1.0 / (float(N) ** 0.5)

    def leaky(h):
        return jnp.where(h >= 0, h, LEAKY_SLOPE * h)

    def dotf(a, b):
        # bf16 MXU inputs, f32 accumulation.
        return jnp.dot(a.astype(jnp.bfloat16), b.astype(jnp.bfloat16),
                       preferred_element_type=jnp.float32)

    # ---- shared_layers: Linear -> Dropout(id) -> LeakyReLU -> Linear ----
    # (recomputed on both grid steps / cores; ~17 MFLOP, negligible)
    h = leaky(dotf(x, Wsh_ref[0]) + bsh_ref[0])
    shared = dotf(h, Wsh_ref[1]) + bsh_ref[1]                      # (B, N) f32

    # ---- fused Q/K/V projection for this branch: (B, 3N) ----
    qkv = dotf(shared, Wqkv_ref[...]) + bqkv_ref[...]
    q = qkv[:, 0 * N:1 * N]
    k = qkv[:, 1 * N:2 * N]
    v = qkv[:, 2 * N:3 * N]

    # ---- self-attention over the batch dimension ----
    # Q @ K^T without an in-kernel transpose: contract the last dims of both.
    s = lax.dot_general(q.astype(jnp.bfloat16), k.astype(jnp.bfloat16),
                        (((1,), (1,)), ((), ())),
                        preferred_element_type=jnp.float32) * inv_sqrt_n
    s = s - jnp.max(s, axis=-1, keepdims=True)
    e = jnp.exp(s)
    # Exact reciprocal (review feedback): only B values, so the exact EUP op is
    # free here and removes the accuracy hit of the approximate path.
    w = e * pl.reciprocal(jnp.sum(e, axis=-1, keepdims=True), approx=False)
    attended = dotf(w, v) + shared                                 # (B, N) f32

    # ---- this branch's head: 4 x (Linear -> LeakyReLU) ----
    h2 = attended
    for kd in range(4):
        h2 = leaky(dotf(h2, Whead_ref[kd]) + bhead_ref[kd])

    # ---- lane-dense output projection: (B, N) @ (N, 128), result in lane 0 ----
    o_ref[...] = dotf(h2, Wout_ref[...]) + bout_ref[...]


def pack_params(W, b, wout, bout):
    """Re-layout PyTorch-style (out, in) parameters for the kernel:
    pre-transpose to (in, out), fuse Q/K/V per branch, stack per-branch heads
    (no block-diagonal zero padding), pad the output projection lane-dense,
    and cast all matmul weights to bf16 (biases stay f32)."""
    n = W.shape[1]
    wdt = jnp.bfloat16

    Wsh = jnp.stack([W[0].T, W[1].T]).astype(wdt)                        # (2, N, N)
    bsh = jnp.stack([b[0], b[1]])[:, None, :].astype(jnp.float32)        # (2, 1, N)

    # Branch 0 (m) uses W[2..4] (Q,K,V); branch 1 (l) uses W[5..7].
    Wqkv = jnp.stack([
        jnp.concatenate([W[2].T, W[3].T, W[4].T], axis=1),
        jnp.concatenate([W[5].T, W[6].T, W[7].T], axis=1),
    ]).astype(wdt)                                                       # (2, N, 3N)
    bqkv = jnp.stack([
        jnp.concatenate([b[2], b[3], b[4]])[None, :],
        jnp.concatenate([b[5], b[6], b[7]])[None, :],
    ]).astype(jnp.float32)                                               # (2, 1, 3N)

    # Per-branch head stacks (review: drop the block-diagonal fusion).
    Whead = jnp.stack([
        jnp.stack([W[8 + k].T for k in range(4)]),
        jnp.stack([W[12 + k].T for k in range(4)]),
    ]).astype(wdt)                                                       # (2, 4, N, N)
    bhead = jnp.stack([
        jnp.stack([b[8 + k][None, :] for k in range(4)]),
        jnp.stack([b[12 + k][None, :] for k in range(4)]),
    ]).astype(jnp.float32)                                               # (2, 4, 1, N)

    # Lane-dense padded output projection: real output lives in lane 0.
    Wout = jnp.zeros((2, n, 128), jnp.float32)
    Wout = Wout.at[0, :, 0].set(wout[0]).at[1, :, 0].set(wout[1]).astype(wdt)
    bout_p = jnp.zeros((2, 1, 128), jnp.float32)
    bout_p = bout_p.at[0, 0, 0].set(bout[0, 0]).at[1, 0, 0].set(bout[0, 1])
    return Wsh, bsh, Wqkv, bqkv, Whead, bhead, Wout, bout_p


def _vmem_limit_bytes():
    # Review feedback: cap to the chip's actual VMEM (64 MiB/TC on v7x,
    # 128 MiB on v5e/v6e) with headroom, instead of a fixed 100 MiB request.
    cap = 64 * 1024 * 1024  # conservative fallback (v7x per-TC capacity)
    try:
        cap = int(pltpu.get_tpu_info().vmem_capacity_bytes)
    except Exception:
        pass
    # The resident working set here is ~2-3 MiB; 32 MiB gives ample slack while
    # never exceeding physical VMEM minus headroom on any generation.
    return int(min(32 * 1024 * 1024, cap - 8 * 1024 * 1024))


def basenet_forward(x, packed):
    B, N = x.shape
    Wsh, bsh, Wqkv, bqkv, Whead, bhead, Wout, bout_p = packed

    out = pl.pallas_call(
        basenet_kernel,
        out_shape=jax.ShapeDtypeStruct((2, B, 128), jnp.float32),
        grid_spec=pltpu.PrefetchScalarGridSpec(
            num_scalar_prefetch=0,
            grid=(2,),  # branch axis: 0 = net_m, 1 = net_l
            in_specs=[
                pl.BlockSpec((B, N), lambda p: (0, 0)),              # x (shared)
                pl.BlockSpec((2, N, N), lambda p: (0, 0, 0)),        # Wsh (shared)
                pl.BlockSpec((2, 1, N), lambda p: (0, 0, 0)),        # bsh (shared)
                pl.BlockSpec((None, N, 3 * N), lambda p: (p, 0, 0)),     # Wqkv[p]
                pl.BlockSpec((None, 1, 3 * N), lambda p: (p, 0, 0)),     # bqkv[p]
                pl.BlockSpec((None, 4, N, N), lambda p: (p, 0, 0, 0)),   # Whead[p]
                pl.BlockSpec((None, 4, 1, N), lambda p: (p, 0, 0, 0)),   # bhead[p]
                pl.BlockSpec((None, N, 128), lambda p: (p, 0, 0)),       # Wout[p]
                pl.BlockSpec((None, 1, 128), lambda p: (p, 0, 0)),       # bout[p]
            ],
            out_specs=pl.BlockSpec((None, B, 128), lambda p: (p, 0, 0)),
        ),
        compiler_params=pltpu.CompilerParams(
            dimension_semantics=("parallel",),   # 2 TCs on v7x; loop elsewhere
            vmem_limit_bytes=_vmem_limit_bytes(),
        ),
    )(x.astype(jnp.bfloat16), Wsh, bsh, Wqkv, bqkv, Whead, bhead, Wout, bout_p)

    # .squeeze() in the reference -> (B,) per head; real output lives in lane 0.
    return out[0, :, 0], out[1, :, 0]


def init_params(key, n):
    """Deterministic synthetic parameters in PyTorch (out, in) layout:
    16 square linears + 2 output linears."""
    ks = jax.random.split(key, 4)
    scale = 1.0 / (n ** 0.5)
    W = jax.random.normal(ks[0], (16, n, n), dtype=jnp.float32) * scale
    b = jax.random.normal(ks[1], (16, n), dtype=jnp.float32) * scale
    wout = jax.random.normal(ks[2], (2, n), dtype=jnp.float32) * scale
    bout = jax.random.normal(ks[3], (1, 2), dtype=jnp.float32) * scale
    return W, b, wout, bout


def reference_forward(x, W, b, wout, bout):
    """Pure-JAX f32 reference in the original (unfused, PyTorch-layout) form."""
    def linear(h, i):
        return h @ W[i].T + b[i]

    def leaky(h):
        return jnp.where(h >= 0, h, LEAKY_SLOPE * h)

    n = x.shape[1]
    shared = linear(leaky(linear(x, 0)), 1)

    def attn(s, qi, ki, vi):
        Q, K, V = linear(s, qi), linear(s, ki), linear(s, vi)
        w = jax.nn.softmax((Q @ K.T) / (n ** 0.5), axis=-1)
        return w @ V

    am = attn(shared, 2, 3, 4) + shared
    al = attn(shared, 5, 6, 7) + shared

    def head(h, base, oi):
        for k in range(4):
            h = leaky(linear(h, base + k))
        return (h @ wout[oi].reshape(n, 1) + bout[0, oi])[:, 0]

    return head(am, 8, 0), head(al, 12, 1)


if __name__ == "__main__":
    # Lane-aligned feature dim; batch large enough to not be pure launch
    # overhead.  Attention is over the batch dimension, so the whole batch must
    # live in one grid step (no batch tiling).
    B, N = 256, 128
    key = jax.random.PRNGKey(0)
    kx, kp = jax.random.split(key)
    x = jax.random.normal(kx, (B, N), dtype=jnp.float32)
    W, b, wout, bout = init_params(kp, N)
    packed = pack_params(W, b, wout, bout)

    out_m, out_l = basenet_forward(x, packed)
    out_m = jax.block_until_ready(out_m)
    out_l = jax.block_until_ready(out_l)

    ref_m, ref_l = reference_forward(x, W, b, wout, bout)
    assert out_m.shape == (B,) and out_l.shape == (B,)
    # Tolerance budget is the bf16 MXU inputs through ~8 chained matmuls plus a
    # batch-wide softmax (f32 accumulation everywhere, exact softmax reciprocal).
    assert jnp.allclose(out_m, ref_m, atol=3e-2, rtol=1e-2)
    assert jnp.allclose(out_l, ref_l, atol=3e-2, rtol=1e-2)

    print("KERNEL_OK")
</pallas_src>

<mosaic_0001>
module attributes {stable_mosaic.version = 11 : i64} {
  func.func @basenet_kernel(%arg0: i32, %arg1: memref<256x128xbf16, #tpu.memory_space<vmem>>, %arg2: memref<2x128x128xbf16, #tpu.memory_space<vmem>>, %arg3: memref<2x1x128xf32, #tpu.memory_space<vmem>>, %arg4: memref<1x128x384xbf16, #tpu.memory_space<vmem>>, %arg5: memref<1x1x384xf32, #tpu.memory_space<vmem>>, %arg6: memref<1x4x128x128xbf16, #tpu.memory_space<vmem>>, %arg7: memref<1x4x1x128xf32, #tpu.memory_space<vmem>>, %arg8: memref<1x128x128xbf16, #tpu.memory_space<vmem>>, %arg9: memref<1x1x128xf32, #tpu.memory_space<vmem>>, %arg10: memref<1x256x128xf32, #tpu.memory_space<vmem>>) attributes {dimension_semantics = [#tpu.dimension_semantics<parallel>], iteration_bounds = array<i64: 2>, scalar_prefetch = 0 : i64, scratch_operands = 0 : i64, tpu.core_type = #tpu.core_type<tc>, window_params = [{pipeline_mode = #tpu.pipeline_mode<synchronous>, transform_indices = @transform_0, window_bounds = array<i64: 256, 128>}, {pipeline_mode = #tpu.pipeline_mode<synchronous>, transform_indices = @transform_1, window_bounds = array<i64: 2, 128, 128>}, {pipeline_mode = #tpu.pipeline_mode<synchronous>, transform_indices = @transform_2, window_bounds = array<i64: 2, 1, 128>}, {transform_indices = @transform_3, window_bounds = array<i64: 1, 128, 384>}, {transform_indices = @transform_4, window_bounds = array<i64: 1, 1, 384>}, {transform_indices = @transform_5, window_bounds = array<i64: 1, 4, 128, 128>}, {transform_indices = @transform_6, window_bounds = array<i64: 1, 4, 1, 128>}, {transform_indices = @transform_7, window_bounds = array<i64: 1, 128, 128>}, {transform_indices = @transform_8, window_bounds = array<i64: 1, 1, 128>}, {transform_indices = @transform_9, window_bounds = array<i64: 1, 256, 128>}]} {
    %c0 = arith.constant 0 : index
    %c0_0 = arith.constant 0 : index
    %0 = vector.load %arg1[%c0, %c0_0] : memref<256x128xbf16, #tpu.memory_space<vmem>>, vector<256x128xbf16>
    %c0_1 = arith.constant 0 : index
    %c0_2 = arith.constant 0 : index
    %c0_3 = arith.constant 0 : index
    %1 = vector.load %arg2[%c0_1, %c0_2, %c0_3] : memref<2x128x128xbf16, #tpu.memory_space<vmem>>, vector<1x128x128xbf16>
    %2 = vector.shape_cast %1 : vector<1x128x128xbf16> to vector<128x128xbf16>
    %cst = arith.constant dense<0.000000e+00> : vector<256x128xf32>
    %3 = tpu.matmul %0, %2, %cst {dimension_numbers = #tpu.dot_dimension_numbers<[1], [0], [0], [1], [0, 0, 1, 1], [], []>} : vector<256x128xbf16>, vector<128x128xbf16>, vector<256x128xf32> -> vector<256x128xf32>
    %c0_4 = arith.constant 0 : index
    %c0_5 = arith.constant 0 : index
    %c0_6 = arith.constant 0 : index
    %4 = vector.load %arg3[%c0_4, %c0_5, %c0_6] : memref<2x1x128xf32, #tpu.memory_space<vmem>>, vector<1x1x128xf32>
    %5 = vector.shape_cast %4 : vector<1x1x128xf32> to vector<1x128xf32>
    %6 = vector.broadcast %5 : vector<1x128xf32> to vector<256x128xf32>
    %7 = arith.addf %3, %6 : vector<256x128xf32>
    %cst_7 = arith.constant 0.000000e+00 : f32
    %8 = vector.broadcast %cst_7 : f32 to vector<256x128xf32>
    %9 = arith.cmpf oge, %7, %8 : vector<256x128xf32>
    %cst_8 = arith.constant 0.00999999977 : f32
    %10 = vector.broadcast %cst_8 : f32 to vector<256x128xf32>
    %11 = arith.mulf %10, %7 : vector<256x128xf32>
    %12 = arith.select %9, %7, %11 : vector<256x128xi1>, vector<256x128xf32>
    %c1 = arith.constant 1 : index
    %c0_9 = arith.constant 0 : index
    %c0_10 = arith.constant 0 : index
    %13 = vector.load %arg2[%c1, %c0_9, %c0_10] : memref<2x128x128xbf16, #tpu.memory_space<vmem>>, vector<1x128x128xbf16>
    %14 = vector.shape_cast %13 : vector<1x128x128xbf16> to vector<128x128xbf16>
    %15 = arith.truncf %12 : vector<256x128xf32> to vector<256x128xbf16>
    %cst_11 = arith.constant dense<0.000000e+00> : vector<256x128xf32>
    %16 = tpu.matmul %15, %14, %cst_11 {dimension_numbers = #tpu.dot_dimension_numbers<[1], [0], [0], [1], [0, 0, 1, 1], [], []>} : vector<256x128xbf16>, vector<128x128xbf16>, vector<256x128xf32> -> vector<256x128xf32>
    %c1_12 = arith.constant 1 : index
    %c0_13 = arith.constant 0 : index
    %c0_14 = arith.constant 0 : index
    %17 = vector.load %arg3[%c1_12, %c0_13, %c0_14] : memref<2x1x128xf32, #tpu.memory_space<vmem>>, vector<1x1x128xf32>
    %18 = vector.shape_cast %17 : vector<1x1x128xf32> to vector<1x128xf32>
    %19 = vector.broadcast %18 : vector<1x128xf32> to vector<256x128xf32>
    %20 = arith.addf %16, %19 : vector<256x128xf32>
    %c0_15 = arith.constant 0 : index
    %c0_16 = arith.constant 0 : index
    %c0_17 = arith.constant 0 : index
    %21 = vector.load %arg4[%c0_15, %c0_16, %c0_17] : memref<1x128x384xbf16, #tpu.memory_space<vmem>>, vector<1x128x384xbf16>
    %22 = vector.shape_cast %21 : vector<1x128x384xbf16> to vector<128x384xbf16>
    %23 = arith.truncf %20 : vector<256x128xf32> to vector<256x128xbf16>
    %cst_18 = arith.constant dense<0.000000e+00> : vector<256x384xf32>
    %24 = tpu.matmul %23, %22, %cst_18 {dimension_numbers = #tpu.dot_dimension_numbers<[1], [0], [0], [1], [0, 0, 1, 1], [], []>} : vector<256x128xbf16>, vector<128x384xbf16>, vector<256x384xf32> -> vector<256x384xf32>
    %c0_19 = arith.constant 0 : index
    %c0_20 = arith.constant 0 : index
    %c0_21 = arith.constant 0 : index
    %25 = vector.load %arg5[%c0_19, %c0_20, %c0_21] : memref<1x1x384xf32, #tpu.memory_space<vmem>>, vector<1x1x384xf32>
    %26 = vector.shape_cast %25 : vector<1x1x384xf32> to vector<1x384xf32>
    %27 = vector.broadcast %26 : vector<1x384xf32> to vector<256x384xf32>
    %28 = arith.addf %24, %27 : vector<256x384xf32>
    %29 = vector.extract_strided_slice %28 {offsets = [0, 0], sizes = [256, 128], strides = [1, 1]} : vector<256x384xf32> to vector<256x128xf32>
    %30 = vector.extract_strided_slice %28 {offsets = [0, 128], sizes = [256, 128], strides = [1, 1]} : vector<256x384xf32> to vector<256x128xf32>
    %31 = vector.extract_strided_slice %28 {offsets = [0, 256], sizes = [256, 128], strides = [1, 1]} : vector<256x384xf32> to vector<256x128xf32>
    %32 = arith.truncf %29 : vector<256x128xf32> to vector<256x128xbf16>
    %33 = arith.truncf %30 : vector<256x128xf32> to vector<256x128xbf16>
    %cst_22 = arith.constant dense<0.000000e+00> : vector<256x256xf32>
    %34 = tpu.matmul %32, %33, %cst_22 {dimension_numbers = #tpu.dot_dimension_numbers<[1], [1], [0], [0], [0, 0, 1, 0], [], []>} : vector<256x128xbf16>, vector<256x128xbf16>, vector<256x256xf32> -> vector<256x256xf32>
    %cst_23 = arith.constant 0.0883883461 : f32
    %35 = vector.broadcast %cst_23 : f32 to vector<256x256xf32>
    %36 = arith.mulf %34, %35 : vector<256x256xf32>
    %cst_24 = arith.constant dense<0xFF800000> : vector<256xf32>
    %37 = vector.multi_reduction <maximumf>, %36, %cst_24 [1] : vector<256x256xf32> to vector<256xf32>
    %38 = vector.shape_cast %37 : vector<256xf32> to vector<256x1xf32>
    %39 = vector.broadcast %38 : vector<256x1xf32> to vector<256x256xf32>
    %40 = arith.subf %36, %39 : vector<256x256xf32>
    %41 = math.exp %40 : vector<256x256xf32>
    %cst_25 = arith.constant dense<0.000000e+00> : vector<256xf32>
    %42 = vector.multi_reduction <add>, %41, %cst_25 [1] : vector<256x256xf32> to vector<256xf32>
    %43 = vector.shape_cast %42 : vector<256xf32> to vector<256x1xf32>
    %44 = tpu.reciprocal %43 : vector<256x1xf32> -> vector<256x1xf32>
    %45 = vector.broadcast %44 : vector<256x1xf32> to vector<256x256xf32>
    %46 = arith.mulf %41, %45 : vector<256x256xf32>
    %47 = arith.truncf %46 : vector<256x256xf32> to vector<256x256xbf16>
    %48 = arith.truncf %31 : vector<256x128xf32> to vector<256x128xbf16>
    %cst_26 = arith.constant dense<0.000000e+00> : vector<256x128xf32>
    %49 = tpu.matmul %47, %48, %cst_26 {dimension_numbers = #tpu.dot_dimension_numbers<[1], [0], [0], [1], [0, 0, 1, 1], [], []>} : vector<256x256xbf16>, vector<256x128xbf16>, vector<256x128xf32> -> vector<256x128xf32>
    %50 = arith.addf %49, %20 : vector<256x128xf32>
    %c0_27 = arith.constant 0 : index
    %c0_28 = arith.constant 0 : index
    %c0_29 = arith.constant 0 : index
    %c0_30 = arith.constant 0 : index
    %51 = vector.load %arg6[%c0_27, %c0_28, %c0_29, %c0_30] : memref<1x4x128x128xbf16, #tpu.memory_space<vmem>>, vector<1x1x128x128xbf16>
    %52 = vector.shape_cast %51 : vector<1x1x128x128xbf16> to vector<128x128xbf16>
    %53 = arith.truncf %50 : vector<256x128xf32> to vector<256x128xbf16>
    %cst_31 = arith.constant dense<0.000000e+00> : vector<256x128xf32>
    %54 = tpu.matmul %53, %52, %cst_31 {dimension_numbers = #tpu.dot_dimension_numbers<[1], [0], [0], [1], [0, 0, 1, 1], [], []>} : vector<256x128xbf16>, vector<128x128xbf16>, vector<256x128xf32> -> vector<256x128xf32>
    %c0_32 = arith.constant 0 : index
    %c0_33 = arith.constant 0 : index
    %c0_34 = arith.constant 0 : index
    %c0_35 = arith.constant 0 : index
    %55 = vector.load %arg7[%c0_32, %c0_33, %c0_34, %c0_35] : memref<1x4x1x128xf32, #tpu.memory_space<vmem>>, vector<1x1x1x128xf32>
    %56 = vector.shape_cast %55 : vector<1x1x1x128xf32> to vector<1x128xf32>
    %57 = vector.broadcast %56 : vector<1x128xf32> to vector<256x128xf32>
    %58 = arith.addf %54, %57 : vector<256x128xf32>
    %cst_36 = arith.constant 0.000000e+00 : f32
    %59 = vector.broadcast %cst_36 : f32 to vector<256x128xf32>
    %60 = arith.cmpf oge, %58, %59 : vector<256x128xf32>
    %cst_37 = arith.constant 0.00999999977 : f32
    %61 = vector.broadcast %cst_37 : f32 to vector<256x128xf32>
    %62 = arith.mulf %61, %58 : vector<256x128xf32>
    %63 = arith.select %60, %58, %62 : vector<256x128xi1>, vector<256x128xf32>
    %c0_38 = arith.constant 0 : index
    %c1_39 = arith.constant 1 : index
    %c0_40 = arith.constant 0 : index
    %c0_41 = arith.constant 0 : index
    %64 = vector.load %arg6[%c0_38, %c1_39, %c0_40, %c0_41] : memref<1x4x128x128xbf16, #tpu.memory_space<vmem>>, vector<1x1x128x128xbf16>
    %65 = vector.shape_cast %64 : vector<1x1x128x128xbf16> to vector<128x128xbf16>
    %66 = arith.truncf %63 : vector<256x128xf32> to vector<256x128xbf16>
    %cst_42 = arith.constant dense<0.000000e+00> : vector<256x128xf32>
    %67 = tpu.matmul %66, %65, %cst_42 {dimension_numbers = #tpu.dot_dimension_numbers<[1], [0], [0], [1], [0, 0, 1, 1], [], []>} : vector<256x128xbf16>, vector<128x128xbf16>, vector<256x128xf32> -> vector<256x128xf32>
    %c0_43 = arith.constant 0 : index
    %c1_44 = arith.constant 1 : index
    %c0_45 = arith.constant 0 : index
    %c0_46 = arith.constant 0 : index
    %68 = vector.load %arg7[%c0_43, %c1_44, %c0_45, %c0_46] : memref<1x4x1x128xf32, #tpu.memory_space<vmem>>, vector<1x1x1x128xf32>
    %69 = vector.shape_cast %68 : vector<1x1x1x128xf32> to vector<1x128xf32>
    %70 = vector.broadcast %69 : vector<1x128xf32> to vector<256x128xf32>
    %71 = arith.addf %67, %70 : vector<256x128xf32>
    %cst_47 = arith.constant 0.000000e+00 : f32
    %72 = vector.broadcast %cst_47 : f32 to vector<256x128xf32>
    %73 = arith.cmpf oge, %71, %72 : vector<256x128xf32>
    %cst_48 = arith.constant 0.00999999977 : f32
    %74 = vector.broadcast %cst_48 : f32 to vector<256x128xf32>
    %75 = arith.mulf %74, %71 : vector<256x128xf32>
    %76 = arith.select %73, %71, %75 : vector<256x128xi1>, vector<256x128xf32>
    %c0_49 = arith.constant 0 : index
    %c2 = arith.constant 2 : index
    %c0_50 = arith.constant 0 : index
    %c0_51 = arith.constant 0 : index
    %77 = vector.load %arg6[%c0_49, %c2, %c0_50, %c0_51] : memref<1x4x128x128xbf16, #tpu.memory_space<vmem>>, vector<1x1x128x128xbf16>
    %78 = vector.shape_cast %77 : vector<1x1x128x128xbf16> to vector<128x128xbf16>
    %79 = arith.truncf %76 : vector<256x128xf32> to vector<256x128xbf16>
    %cst_52 = arith.constant dense<0.000000e+00> : vector<256x128xf32>
    %80 = tpu.matmul %79, %78, %cst_52 {dimension_numbers = #tpu.dot_dimension_numbers<[1], [0], [0], [1], [0, 0, 1, 1], [], []>} : vector<256x128xbf16>, vector<128x128xbf16>, vector<256x128xf32> -> vector<256x128xf32>
    %c0_53 = arith.constant 0 : index
    %c2_54 = arith.constant 2 : index
    %c0_55 = arith.constant 0 : index
    %c0_56 = arith.constant 0 : index
    %81 = vector.load %arg7[%c0_53, %c2_54, %c0_55, %c0_56] : memref<1x4x1x128xf32, #tpu.memory_space<vmem>>, vector<1x1x1x128xf32>
    %82 = vector.shape_cast %81 : vector<1x1x1x128xf32> to vector<1x128xf32>
    %83 = vector.broadcast %82 : vector<1x128xf32> to vector<256x128xf32>
    %84 = arith.addf %80, %83 : vector<256x128xf32>
    %cst_57 = arith.constant 0.000000e+00 : f32
    %85 = vector.broadcast %cst_57 : f32 to vector<256x128xf32>
    %86 = arith.cmpf oge, %84, %85 : vector<256x128xf32>
    %cst_58 = arith.constant 0.00999999977 : f32
    %87 = vector.broadcast %cst_58 : f32 to vector<256x128xf32>
    %88 = arith.mulf %87, %84 : vector<256x128xf32>
    %89 = arith.select %86, %84, %88 : vector<256x128xi1>, vector<256x128xf32>
    %c0_59 = arith.constant 0 : index
    %c3 = arith.constant 3 : index
    %c0_60 = arith.constant 0 : index
    %c0_61 = arith.constant 0 : index
    %90 = vector.load %arg6[%c0_59, %c3, %c0_60, %c0_61] : memref<1x4x128x128xbf16, #tpu.memory_space<vmem>>, vector<1x1x128x128xbf16>
    %91 = vector.shape_cast %90 : vector<1x1x128x128xbf16> to vector<128x128xbf16>
    %92 = arith.truncf %89 : vector<256x128xf32> to vector<256x128xbf16>
    %cst_62 = arith.constant dense<0.000000e+00> : vector<256x128xf32>
    %93 = tpu.matmul %92, %91, %cst_62 {dimension_numbers = #tpu.dot_dimension_numbers<[1], [0], [0], [1], [0, 0, 1, 1], [], []>} : vector<256x128xbf16>, vector<128x128xbf16>, vector<256x128xf32> -> vector<256x128xf32>
    %c0_63 = arith.constant 0 : index
    %c3_64 = arith.constant 3 : index
    %c0_65 = arith.constant 0 : index
    %c0_66 = arith.constant 0 : index
    %94 = vector.load %arg7[%c0_63, %c3_64, %c0_65, %c0_66] : memref<1x4x1x128xf32, #tpu.memory_space<vmem>>, vector<1x1x1x128xf32>
    %95 = vector.shape_cast %94 : vector<1x1x1x128xf32> to vector<1x128xf32>
    %96 = vector.broadcast %95 : vector<1x128xf32> to vector<256x128xf32>
    %97 = arith.addf %93, %96 : vector<256x128xf32>
    %cst_67 = arith.constant 0.000000e+00 : f32
    %98 = vector.broadcast %cst_67 : f32 to vector<256x128xf32>
    %99 = arith.cmpf oge, %97, %98 : vector<256x128xf32>
    %cst_68 = arith.constant 0.00999999977 : f32
    %100 = vector.broadcast %cst_68 : f32 to vector<256x128xf32>
    %101 = arith.mulf %100, %97 : vector<256x128xf32>
    %102 = arith.select %99, %97, %101 : vector<256x128xi1>, vector<256x128xf32>
    %c0_69 = arith.constant 0 : index
    %c0_70 = arith.constant 0 : index
    %c0_71 = arith.constant 0 : index
    %103 = vector.load %arg8[%c0_69, %c0_70, %c0_71] : memref<1x128x128xbf16, #tpu.memory_space<vmem>>, vector<1x128x128xbf16>
    %104 = vector.shape_cast %103 : vector<1x128x128xbf16> to vector<128x128xbf16>
    %105 = arith.truncf %102 : vector<256x128xf32> to vector<256x128xbf16>
    %cst_72 = arith.constant dense<0.000000e+00> : vector<256x128xf32>
    %106 = tpu.matmul %105, %104, %cst_72 {dimension_numbers = #tpu.dot_dimension_numbers<[1], [0], [0], [1], [0, 0, 1, 1], [], []>} : vector<256x128xbf16>, vector<128x128xbf16>, vector<256x128xf32> -> vector<256x128xf32>
    %c0_73 = arith.constant 0 : index
    %c0_74 = arith.constant 0 : index
    %c0_75 = arith.constant 0 : index
    %107 = vector.load %arg9[%c0_73, %c0_74, %c0_75] : memref<1x1x128xf32, #tpu.memory_space<vmem>>, vector<1x1x128xf32>
    %108 = vector.shape_cast %107 : vector<1x1x128xf32> to vector<1x128xf32>
    %109 = vector.broadcast %108 : vector<1x128xf32> to vector<256x128xf32>
    %110 = arith.addf %106, %109 : vector<256x128xf32>
    %c0_76 = arith.constant 0 : index
    %c0_77 = arith.constant 0 : index
    %c0_78 = arith.constant 0 : index
    %111 = vector.load %arg10[%c0_76, %c0_77, %c0_78] : memref<1x256x128xf32, #tpu.memory_space<vmem>>, vector<1x256x128xf32>
    %112 = vector.shape_cast %111 : vector<1x256x128xf32> to vector<256x128xf32>
    %113 = vector.shape_cast %110 : vector<256x128xf32> to vector<1x256x128xf32>
    tpu.vector_store %arg10[%c0_76, %c0_77, %c0_78], %113 {strides = array<i32>} : memref<1x256x128xf32, #tpu.memory_space<vmem>>, vector<1x256x128xf32>,
    return
  }
  func.func @transform_0(%arg0: i32) -> (i32, i32) {
    %c0_i32 = arith.constant 0 : i32
    %c0_i32_0 = arith.constant 0 : i32
    %c0_i32_1 = arith.constant 0 : i32
    return %c0_i32, %c0_i32_0 : i32, i32
  }
  func.func @transform_1(%arg0: i32) -> (i32, i32, i32) {
    %c0_i32 = arith.constant 0 : i32
    %c0_i32_0 = arith.constant 0 : i32
    %c0_i32_1 = arith.constant 0 : i32
    %c0_i32_2 = arith.constant 0 : i32
    return %c0_i32, %c0_i32_0, %c0_i32_1 : i32, i32, i32
  }
  func.func @transform_2(%arg0: i32) -> (i32, i32, i32) {
    %c0_i32 = arith.constant 0 : i32
    %c0_i32_0 = arith.constant 0 : i32
    %c0_i32_1 = arith.constant 0 : i32
    %c0_i32_2 = arith.constant 0 : i32
    return %c0_i32, %c0_i32_0, %c0_i32_1 : i32, i32, i32
  }
  func.func @transform_3(%arg0: i32) -> (i32, i32, i32) {
    %c0_i32 = arith.constant 0 : i32
    %c0_i32_0 = arith.constant 0 : i32
    %c0_i32_1 = arith.constant 0 : i32
    return %arg0, %c0_i32, %c0_i32_0 : i32, i32, i32
  }
  func.func @transform_4(%arg0: i32) -> (i32, i32, i32) {
    %c0_i32 = arith.constant 0 : i32
    %c0_i32_0 = arith.constant 0 : i32
    %c0_i32_1 = arith.constant 0 : i32
    return %arg0, %c0_i32, %c0_i32_0 : i32, i32, i32
  }
  func.func @transform_5(%arg0: i32) -> (i32, i32, i32, i32) {
    %c0_i32 = arith.constant 0 : i32
    %c0_i32_0 = arith.constant 0 : i32
    %c0_i32_1 = arith.constant 0 : i32
    %c0_i32_2 = arith.constant 0 : i32
    return %arg0, %c0_i32, %c0_i32_0, %c0_i32_1 : i32, i32, i32, i32
  }
  func.func @transform_6(%arg0: i32) -> (i32, i32, i32, i32) {
    %c0_i32 = arith.constant 0 : i32
    %c0_i32_0 = arith.constant 0 : i32
    %c0_i32_1 = arith.constant 0 : i32
    %c0_i32_2 = arith.constant 0 : i32
    return %arg0, %c0_i32, %c0_i32_0, %c0_i32_1 : i32, i32, i32, i32
  }
  func.func @transform_7(%arg0: i32) -> (i32, i32, i32) {
    %c0_i32 = arith.constant 0 : i32
    %c0_i32_0 = arith.constant 0 : i32
    %c0_i32_1 = arith.constant 0 : i32
    return %arg0, %c0_i32, %c0_i32_0 : i32, i32, i32
  }
  func.func @transform_8(%arg0: i32) -> (i32, i32, i32) {
    %c0_i32 = arith.constant 0 : i32
    %c0_i32_0 = arith.constant 0 : i32
    %c0_i32_1 = arith.constant 0 : i32
    return %arg0, %c0_i32, %c0_i32_0 : i32, i32, i32
  }
  func.func @transform_9(%arg0: i32) -> (i32, i32, i32) {
    %c0_i32 = arith.constant 0 : i32
    %c0_i32_0 = arith.constant 0 : i32
    %c0_i32_1 = arith.constant 0 : i32
    return %arg0, %c0_i32, %c0_i32_0 : i32, i32, i32
  }
}

</mosaic_0001>

<bundles_post_ra>
// kernel: tpu_custom_call.1
= control target key start
LH: loop header
LB: loop body
LE: loop exit
PB: predicated region body
PF: predicated region fallthrough
CT: control target
= control target key end

     0   :  { %s7943_s0 = inlined_call_operand.hbm [shape: bf16[256,128], index: 0, kind: input, shape index: {}]   ;;  %s7944_s1 = inlined_call_operand.hbm [shape: bf16[2,128,128], index: 1, kind: input, shape index: {}]   ;;  %s7945_s2 = inlined_call_operand.hbm [shape: f32[2,1,128], index: 2, kind: input, shape index: {}]   ;;  %s7946_s3 = inlined_call_operand.hbm [shape: bf16[2,128,384], index: 3, kind: input, shape index: {}]   ;;  %s7947_s4 = inlined_call_operand.vmem [shape: f32[2,1,384], index: 4, kind: input, shape index: {}]   ;;  %s7948_s5 = inlined_call_operand.hbm [shape: bf16[2,4,128,128], index: 5, kind: input, shape index: {}]   ;;  %s7949_s6 = inlined_call_operand.vmem [shape: f32[2,4,1,128], index: 6, kind: input, shape index: {}]   ;;  %s7950_s7 = inlined_call_operand.hbm [shape: bf16[2,128,128], index: 7, kind: input, shape index: {}]   ;;  %s7951_s8 = inlined_call_operand.vmem [shape: f32[2,1,128], index: 8, kind: input, shape index: {}]   ;;  %s7952_s9 = inlined_call_operand.hbm [shape: f32[2,256,128], index: 9, kind: output, shape index: {}]  }
   0x1   :  { %8036 = sst [smem:[#allocation71_spill]] %s7944_s1 }
   0x2   :  { %8037 = sst [smem:[#allocation72_spill]] %s7946_s3 }
   0x3   :  { %8038 = sst [smem:[#allocation73_spill]] %s7949_s6 }
   0x4   :  { %8039 = sst [smem:[#allocation74_spill]] %s7951_s8 }
   0x5   :  { %8040 = sst [smem:[#allocation75_spill]] %s7952_s9 }
   0x6   :  { %14 = vsyncpa [#allocation3], 0 }
   0x7   :  { %15 = vsyncpa [#allocation6], 0 }
   0x8   :  { %16 = vsyncpa [#allocation9], 0 }
   0x9   :  { %18 = vsyncpa [#allocation9 + $0x1], 0 }
   0xa   :  { %19 = vsyncpa [#allocation12], 0 }
   0xb   :  { %21 = vsyncpa [#allocation12 + $0x1], 0 }
   0xc   :  { %22 = vsyncpa [#allocation4], 0 }
   0xd   :  { %24 = vsyncpa [#allocation4 + $0x1], 0  ;;  %s6243_s30 = smov 0   ;;  %s6245_s10 = smov 0  }
   0xe   :  { %s6247_s11 = smov 0   ;;  %s6249_s12 = smov 0  }
   0xf LB: > { %8041 = sst [smem:[#allocation19_spill]] %s6163_s30  ;;  %s6264_s13 = sadd.s32 4294967295, %s6175_s12   ;;  %s6175_s12 = sphi %s6249_s12, %s8212_s12   ;;  %s6171_s11 = sphi %s6247_s11, %s8214_s11   ;;  %s6167_s10 = sphi %s6245_s10, %s8216_s10   ;;  %s6163_s30 = sphi %s6243_s30, %s8215_s30  }
  0x10   : > { %8042 = sst [smem:[#allocation20_spill]] %s6171_s11  ;;  %s4608_s14 = sadd.s32 4294967294, %s6175_s12  }
  0x11   : > { %s6268_s15 = sadd.s32 1, %s6175_s12   ;;  %s100_s16 = sadd.s32 1, %s6171_s11 }
  0x12   : > { %8043 = sst [smem:[#allocation21_spill]] %s6268_s15  ;;  %s97_s17 = ssub.s32 %s6175_s12, %s6268_s15 }
  0x13   : > { %p107_p0 = scmp.ne.s32.totalorder %s6171_s11, %s6167_s10  ;;  %p98_p1 = scmp.eq.s32.totalorder %s97_s17, 0 }
  0x14   : > { %p108_p2 = scmp.eq.s32.totalorder %s6175_s12, 0  ;;  %p113_p3 = scmp.ne.s32.totalorder %s6167_s10, %s6163_s30 }
  0x15   : > { %p7956_p4 = scmp.eq.s32.totalorder %s6264_s13, 0  ;;  %p267_p7 = scmp.eq.s32.totalorder %s6264_s13, 1 }
  0x16   : > { %s6280_s18 = scalar_select %p98_p1, %s6171_s11, %s100_s16  }
  0x17   : > { %p6282_p5 = por %p108_p2, %p107_p0  ;;  %p6288_p6 = por %p7956_p4, %p113_p3 }
  0x18   : > { %8044 = sst [smem:[#allocation22_spill]] %s6280_s18  ;;  %p273_p8 = scmp.eq.s32.totalorder %s4608_s14, 1 }
  0x19   : > { %s8045_s19 = scalar_select %p6282_p5, 1, 0 }
  0x1a   : > { %s8046_s20 = scalar_select %p6288_p6, 1, 0 }
  0x1b   : > { %p4609_p9 = scmp.ge.s32.totalorder %s6175_s12, 1  ;;  %p280_p10 = scmp.lt.s32.totalorder %s6175_s12, 3 }
  0x1c   : > { %p6295_p11 = por %p267_p7, %p107_p0  ;;  %p6299_p12 = por %p273_p8, %p113_p3 }
  0x1d   : > { %p6303_p13 = pnand %p4609_p9, %p280_p10  ;;  %s6177_s24 = smov [#allocation5]  }
  0x1e   : > { %s8047_s21 = scalar_select %p6295_p11, 1, 0 }
  0x1f   : > { %s8049_s22 = scalar_select %p6299_p12, 1, 0 }
  0x20   : > { %8048 = sst [smem:[#allocation23_spill]] %s8047_s21  ;;  %p5551_p1 = pneg %p6303_p13 }
  0x21   : > { %8050 = sst [smem:[#allocation24_spill]] %s8049_s22  ;;  %s305_s25 = sshll.u32 %s6177_s24, 4  ;;  %s306_s25 = int_to_ptr.vmem [resolvable:$true] %s305_s25 }
  0x22   : > { %s8051_s23 = scalar_select %p6303_p13, 1, 0 }
  0x23   : > { %p6312_p6 = pnand %p5551_p1, %p7956_p4  ;;  %s332_s27 = sand.u32 1, %s6175_s12  }
  0x24   : > { %s8053_s1 = sld [smem:[#allocation71_spill]] }
  0x25   : > { %s8052_s26 = scalar_select %p6312_p6, 1, 0 }
  0x26   : > { %p6326_p7 = pneg %p6312_p6 }
  0x28   : > { %s8054_s24 = scalar_select %p6326_p7, 1, 0 }
  0x2a   : > { %s5923_s14 = scalar_lea.hbm %s8053_s1, 2048 }
  0x2b   : > { %p5924_p3 = scmp.ne.s32.totalorder %s8053_s1, %s5923_s14  ;;  %p5930_p10 = scmp.lt.u32.totalorder %s5923_s14, %s8053_s1 }
  0x2d   : > { %p5926_p8 = pnand %p6326_p7, %p5924_p3 }
  0x2f   : > { %p5927_p9 = pneg %p5926_p8 }
  0x31   : > { %p5932_p1 = pnand %p5930_p10, %p5927_p9 }
  0x33   : > { %5935 = shalt.err (!%p5932_p1)
}
  0x34   : > { %s5936_s28 = scalar_lea.vmem %s306_s25, 2048  ;;  %p5944_p12 = scmp.lt.s32.totalorder %s306_s25, %s306_s25 }
  0x35   : > { %p5937_p2 = scmp.ne.s32.totalorder %s306_s25, %s5936_s28  ;;  %p5945_p11 = scmp.lt.s32.totalorder %s5936_s28, %s5936_s28 }
  0x37   : > { %p5939_p4 = pnand %p5937_p2, %p6326_p7  ;;  %p5946_p13 = por %p5945_p11, %p5944_p12 }
  0x39   : > { %p5940_p0 = pneg %p5939_p4 }
  0x3b   : > { %p5947_p5 = pnand %p5946_p13, %p5940_p0 }
  0x3d   : > { %5950 = shalt.err (!%p5947_p5)
}
  0x3e   : > { %s7964_s29 = smov 64   ;;  %s7970_s15 = smov 4  }
  0x3f   : > { %5557 = dma.hbm_to_vmem [thread:$0]  (!%p6312_p6), %s8053_s1, 2048, %s306_s25, [#allocation6], %s7964_s29, %s7964_s29, %s7970_s15  }
  0x40   : > { %s6346_s16 = sand.u32 1, %s6171_s11   ;;  %s5528_s17 = smul.u32 3072, %s6175_s12 }
  0x41   : > { %s5527_s28 = smul.u32 192, %s6346_s16  ;;  %p8055_p4 = scmp.ne.s32.totalorder %s8045_s19, 0 }
  0x42   : > { %p8056_p5 = scmp.lt.s32.totalorder %s6175_s12, 2  ;;  %s8058_s3 = sld [smem:[#allocation72_spill]] }
  0x43   : > { %s336_s25 = scalar_lea.vmem [#allocation8], %s5527_s28  ;;  %s6365_s19 = scalar_lea.sflag [#allocation9], %s332_s27 }
  0x44   : > { %p6354_p11 = pnand %p8056_p5, %p8055_p4  ;;  %s343_s18 = sshll.u32 %s336_s25, 4  ;;  %s6363_s18 = int_to_ptr.vmem [resolvable:$true] %s343_s18 }
  0x46   : > { %s8057_s22 = scalar_select %p6354_p11, 1, 0 }
  0x47   : > { %p6371_p13 = pneg %p6354_p11 }
  0x48   : > { %s6361_s21 = scalar_lea.hbm %s8058_s3, %s5528_s17  ;;  %s5956_s17 = scalar_lea.hbm %s8058_s3, 6144 }
  0x49   : > { %s5951_s14 = scalar_lea.hbm %s6361_s21, 3072  ;;  %p5957_p3 = scmp.lt.u32.totalorder %s6361_s21, %s8058_s3 }
  0x4a   : > { %p5952_p12 = scmp.ne.s32.totalorder %s6361_s21, %s5951_s14  ;;  %p5958_p8 = scmp.lt.u32.totalorder %s5956_s17, %s5951_s14 }
  0x4b   : > { %s8059_s29 = scalar_select %p6371_p13, 1, 0 }
  0x4c   : > { %p5954_p2 = pnand %p6371_p13, %p5952_p12  ;;  %p5959_p9 = por %p5958_p8, %p5957_p3 }
  0x4d   : > { %p5960_p10 = scmp.lt.u32.totalorder %s5951_s14, %s6361_s21 }
  0x4e   : > { %p5955_p0 = pneg %p5954_p2 }
  0x4f   : > { %p5961_p1 = por %p5960_p10, %p5959_p9 }
  0x51   : > { %p5962_p4 = pnand %p5961_p1, %p5955_p0 }
  0x53   : > { %5965 = shalt.err (!%p5962_p4)
}
  0x54   : > { %s5966_s27 = scalar_lea.vmem %s6363_s18, 3072  ;;  %s6180_s9 = smov [#allocation8]  }
  0x55   : > { %p5967_p5 = scmp.ne.s32.totalorder %s6363_s18, %s5966_s27  ;;  %s5971_s30 = sshll.u32 %s6180_s9, 4  ;;  %s5972_s30 = int_to_ptr.vmem [resolvable:$false] %s5971_s30 }
  0x56   : > { %s5973_s28 = scalar_lea.vmem %s5972_s30, 6144  ;;  %p5974_p6 = scmp.lt.s32.totalorder %s6363_s18, %s5972_s30 }
  0x57   : > { %p5969_p12 = pnand %p5967_p5, %p6371_p13  ;;  %p5975_p7 = scmp.lt.s32.totalorder %s5973_s28, %s5966_s27 }
  0x59   : > { %p5970_p2 = pneg %p5969_p12  ;;  %p5976_p3 = por %p5975_p7, %p5974_p6 }
  0x5b   : > { %p5977_p8 = pnand %p5976_p3, %p5970_p2 }
  0x5d   : > { %5980 = shalt.err (!%p5977_p8)
}
  0x5e   : > { %s6181_s14 = smov 192   ;;  %s6182_s17 = smov 12  }
  0x5f   : > { %5564 = dma.hbm_to_vmem [thread:$0]  (!%p6354_p11), %s6361_s21, 3072, %s6363_s18, %s6365_s19, %s6181_s14, %s6181_s14, %s6182_s17  }
  0x60   : > { %s6183_s25 = smov [#allocation2]   ;;  %s6184_s9 = smov [#allocation7]  }
  0x61   : > { %s292_s15 = sshll.u32 %s6183_s25, 4  ;;  %s318_s1 = sshll.u32 %s6184_s9, 4  ;;  %s293_s15 = int_to_ptr.vmem [resolvable:$true] %s292_s15  ;;  %s319_s1 = int_to_ptr.vmem [resolvable:$true] %s318_s1 }
  0x62   : > { %s5981_s27 = scalar_lea.hbm %s7943_s0, 2048  ;;  %p8060_p7 = scmp.ne.s32.totalorder %s8054_s24, 0 }
  0x63   : > { %p5982_p6 = scmp.ne.s32.totalorder %s7943_s0, %s5981_s27  ;;  %p5988_p10 = scmp.lt.u32.totalorder %s5981_s27, %s7943_s0 }
  0x65   : > { %p5984_p0 = pnand %p5982_p6, %p8060_p7 }
  0x67   : > { %p5985_p9 = pneg %p5984_p0 }
  0x69   : > { %p5990_p1 = pnand %p5988_p10, %p5985_p9 }
  0x6b   : > { %5993 = shalt.err (!%p5990_p1)
}
  0x6c   : > { %s5994_s21 = scalar_lea.vmem %s293_s15, 2048  ;;  %p6002_p2 = scmp.lt.s32.totalorder %s293_s15, %s293_s15 }
  0x6d   : > { %p5995_p4 = scmp.ne.s32.totalorder %s293_s15, %s5994_s21  ;;  %p6003_p3 = scmp.lt.s32.totalorder %s5994_s21, %s5994_s21 }
  0x6f   : > { %p5997_p5 = pnand %p5995_p4, %p8060_p7  ;;  %p6004_p8 = por %p6003_p3, %p6002_p2 }
  0x71   : > { %p5998_p12 = pneg %p5997_p5 }
  0x73   : > { %p6005_p11 = pnand %p6004_p8, %p5998_p12 }
  0x75   : > { %6008 = shalt.err (!%p6005_p11)
}
  0x76   : > { %p8061_p6 = scmp.ne.s32.totalorder %s8052_s26, 0  ;;  %s8062_s3 = smov 4  }
  0x77   : > { %s8063_s11 = smov 64   ;;  %s4615_s18 = sshll.u32 %s6346_s16, 8 }
  0x78   : > { %5554 = dma.hbm_to_vmem [thread:$0]  (!%p8061_p6), %s7943_s0, 2048, %s293_s15, [#allocation3], %s8063_s11, %s8063_s11, %s8062_s3  }
  0x79   : > { %s6009_s25 = scalar_lea.hbm %s7945_s2, 32 }
  0x7a   : > { %p6010_p11 = scmp.ne.s32.totalorder %s7945_s2, %s6009_s25  ;;  %p6016_p10 = scmp.lt.u32.totalorder %s6009_s25, %s7945_s2 }
  0x7c   : > { %p6012_p0 = pnand %p6010_p11, %p8060_p7 }
  0x7e   : > { %p6013_p9 = pneg %p6012_p0 }
  0x80   : > { %p6018_p1 = pnand %p6016_p10, %p6013_p9 }
  0x82   : > { %6021 = shalt.err (!%p6018_p1)
}
  0x83   : > { %s6022_s15 = scalar_lea.vmem %s319_s1, 32  ;;  %p6030_p2 = scmp.lt.s32.totalorder %s319_s1, %s319_s1 }
  0x84   : > { %p6023_p4 = scmp.ne.s32.totalorder %s319_s1, %s6022_s15  ;;  %p6031_p3 = scmp.lt.s32.totalorder %s6022_s15, %s6022_s15 }
  0x86   : > { %p6025_p5 = pnand %p6023_p4, %p8060_p7  ;;  %p6032_p8 = por %p6031_p3, %p6030_p2 }
  0x88   : > { %p6026_p12 = pneg %p6025_p5 }
  0x8a   : > { %p6033_p13 = pnand %p6032_p8, %p6026_p12 }
  0x8c   : > { %6036 = shalt.err (!%p6033_p13)
}
  0x8d   : > { %s6185_s21 = smov 16   ;;  %s6186_s6 = smov 1  }
  0x8e   : > { %5560 = dma.hbm_to_vmem [thread:$0]  (!%p8061_p6), %s7945_s2, 32, %s319_s1, [#allocation6], %s6185_s21, %s6185_s21, %s6186_s6  }
  0x8f   : > { %s4788_s17 = sshll.u32 %s6175_s12, 12  ;;  %s364_s30 = scalar_lea.vmem [#allocation10], %s4615_s18 }
  0x90   : > { %s6439_s9 = scalar_lea.hbm %s7948_s5, %s4788_s17  ;;  %s371_s27 = sshll.u32 %s364_s30, 4  ;;  %s6441_s27 = int_to_ptr.vmem [resolvable:$true] %s371_s27 }
  0x91   : > { %s6037_s28 = scalar_lea.hbm %s6439_s9, 4096  ;;  %p8064_p7 = scmp.ne.s32.totalorder %s8059_s29, 0 }
  0x92   : > { %p6038_p13 = scmp.ne.s32.totalorder %s6439_s9, %s6037_s28  ;;  %s6042_s15 = scalar_lea.hbm %s7948_s5, 8192 }
  0x93   : > { %p6043_p6 = scmp.lt.u32.totalorder %s6439_s9, %s7948_s5  ;;  %p6044_p9 = scmp.lt.u32.totalorder %s6042_s15, %s6037_s28 }
  0x94   : > { %p6040_p11 = pnand %p6038_p13, %p8064_p7  ;;  %p6046_p1 = scmp.lt.u32.totalorder %s6037_s28, %s6439_s9 }
  0x95   : > { %p6045_p10 = por %p6044_p9, %p6043_p6 }
  0x96   : > { %p6041_p0 = pneg %p6040_p11 }
  0x97   : > { %p6047_p4 = por %p6046_p1, %p6045_p10 }
  0x99   : > { %p6048_p5 = pnand %p6047_p4, %p6041_p0 }
  0x9b   : > { %6051 = shalt.err (!%p6048_p5)
}
  0x9c   : > { %s6052_s18 = scalar_lea.vmem %s6441_s27, 4096  ;;  %s6187_s8 = smov [#allocation10]  }
  0x9d   : > { %p6053_p12 = scmp.ne.s32.totalorder %s6441_s27, %s6052_s18  ;;  %s6057_s14 = sshll.u32 %s6187_s8, 4  ;;  %s6058_s14 = int_to_ptr.vmem [resolvable:$false] %s6057_s14 }
  0x9e   : > { %s6059_s17 = scalar_lea.vmem %s6058_s14, 8192  ;;  %p6060_p8 = scmp.lt.s32.totalorder %s6441_s27, %s6058_s14 }
  0x9f   : > { %p6055_p2 = pnand %p6053_p12, %p8064_p7  ;;  %p6061_p13 = scmp.lt.s32.totalorder %s6059_s17, %s6052_s18 }
  0xa1   : > { %p6056_p3 = pneg %p6055_p2  ;;  %p6062_p11 = por %p6061_p13, %p6060_p8 }
  0xa3   : > { %p6063_p6 = pnand %p6062_p11, %p6056_p3 }
  0xa5   : > { %6066 = shalt.err (!%p6063_p6)
}
  0xa6   : > { %p8065_p0 = scmp.ne.s32.totalorder %s8057_s22, 0  ;;  %s4618_s25 = sshll.u32 %s6346_s16, 6 }
  0xa7   : > { %s4789_s24 = sshll.u32 %s6175_s12, 10  ;;  %s392_s26 = scalar_lea.vmem [#allocation11], %s4618_s25 }
  0xa8   : > { %5567 = dma.hbm_to_vmem [thread:$0]  (!%p8065_p0), %s6439_s9, 4096, %s6441_s27, %s6365_s19, %s8063_s11, %s8063_s11, %s8062_s3  }
  0xa9   : > { %s6473_s1 = scalar_lea.hbm %s7950_s7, %s4789_s24  ;;  %s399_s15 = sshll.u32 %s392_s26, 4  ;;  %s6475_s15 = int_to_ptr.vmem [resolvable:$true] %s399_s15 }
  0xaa   : > { %s389_s21 = scalar_lea.sflag [#allocation12], %s6346_s16  ;;  %s6067_s6 = scalar_lea.hbm %s6473_s1, 1024 }
  0xab   : > { %p6068_p9 = scmp.ne.s32.totalorder %s6473_s1, %s6067_s6  ;;  %s6072_s27 = scalar_lea.hbm %s7950_s7, 2048 }
  0xac   : > { %p6073_p4 = scmp.lt.u32.totalorder %s6473_s1, %s7950_s7  ;;  %p6074_p5 = scmp.lt.u32.totalorder %s6072_s27, %s6067_s6 }
  0xad   : > { %p6070_p10 = pnand %p6068_p9, %p8064_p7  ;;  %p6076_p2 = scmp.lt.u32.totalorder %s6067_s6, %s6473_s1 }
  0xae   : > { %p6075_p12 = por %p6074_p5, %p6073_p4 }
  0xaf   : > { %p6071_p1 = pneg %p6070_p10 }
  0xb0   : > { %p6077_p3 = por %p6076_p2, %p6075_p12 }
  0xb2   : > { %p6078_p8 = pnand %p6077_p3, %p6071_p1 }
  0xb4   : > { %6081 = shalt.err (!%p6078_p8)
}
  0xb5   : > { %s6082_s14 = scalar_lea.vmem %s6475_s15, 1024  ;;  %s6188_s17 = smov [#allocation11]  }
  0xb6   : > { %p6083_p13 = scmp.ne.s32.totalorder %s6475_s15, %s6082_s14  ;;  %s6087_s25 = sshll.u32 %s6188_s17, 4  ;;  %s6088_s25 = int_to_ptr.vmem [resolvable:$false] %s6087_s25 }
  0xb7   : > { %s6089_s24 = scalar_lea.vmem %s6088_s25, 2048  ;;  %p6090_p9 = scmp.lt.s32.totalorder %s6475_s15, %s6088_s25 }
  0xb8   : > { %p6085_p11 = pnand %p6083_p13, %p8064_p7  ;;  %p6091_p10 = scmp.lt.s32.totalorder %s6089_s24, %s6082_s14 }
  0xba   : > { %p6086_p6 = pneg %p6085_p11  ;;  %p6092_p4 = por %p6091_p10, %p6090_p9 }
  0xbc   : > { %p6093_p5 = pnand %p6092_p4, %p6086_p6 }
  0xbe   : > { %6096 = shalt.err (!%p6093_p5)
}
  0xbf   : > { %5570 = dma.hbm_to_vmem [thread:$0]  (!%p8065_p0), %s6473_s1, 1024, %s6475_s15, %s389_s21, %s8063_s11, %s8063_s11, %s8062_s3  }
  0xc0   : > { %p8066_p7 = scmp.ne.s32.totalorder %s8051_s23, 0 }
  0xc2   : > { %417 = sbr.rel (%p8066_p7) target bundleno = 3110 (0xc26), region = 56 }
  0xc9   : > { %p8067_p1 = scmp.eq.s32.totalorder %s6264_s13, 0 }
  0xcb   : > { %6142 = dma.done.wait (%p8067_p1), [#allocation3], 2048   ;;  %p8068_p12 = pmov %p8067_p1 }
  0xcc   : > { %p8069_p2 = pmov %p8067_p1 }
  0xcd   : > { %6144 = vsyncadd (%p8068_p12), [#allocation3], 4294965248 }
  0xce   : > { %6146 = dma.done.wait (%p8069_p2), [#allocation6], 2080   ;;  %p8070_p3 = pmov %p8067_p1 }
  0xcf   : > { %s431_s22 = sand.u32 1, %s6264_s13   ;;  %s6516_s29 = sand.u32 1, %s6167_s10  }
  0xd0   : > { %6148 = vsyncadd (%p8070_p3), [#allocation6], 4294965216  ;;  %s5529_s23 = smul.u32 192, %s6516_s29  ;;  %s432_s16 = scalar_lea.sflag [#allocation9], %s431_s22 }
  0xd1   : > { %p8071_p0 = scmp.ne.s32.totalorder %s8046_s20, 0 }
  0xd2   : > { %s6519_s3 = scalar_lea.vmem [#allocation8], %s5529_s23 }
  0xd3   : > { %6150 = dma.done.wait (%p8071_p0), %s432_s16, 7168  }
  0xd4   : > { %6152 = vsyncadd (%p8071_p0), %s432_s16, 4294960128  ;;  %s4625_s11 = sshll.u32 %s6516_s29, 8  ;;  %s4626_s30 = sshll.u32 %s6516_s29, 6 }
  0xd5   : > { %s6529_s28 = scalar_lea.vmem [#allocation10], %s4625_s11  ;;  %s450_s1 = scalar_lea.sflag [#allocation12], %s6516_s29 }
  0xd6   : > { %s6532_s26 = scalar_lea.vmem [#allocation11], %s4626_s30 }
  0xd7   : > { %6154 = dma.done.wait (%p8071_p0), %s450_s1, 1024  }
  0xd8   : > { %6156 = vsyncadd (%p8071_p0), %s450_s1, 4294966272  ;;  %v5627_v0 = vld [vmem:[#allocation5] sm:$0xff]   ;;  %v5628_v1 = vld [vmem:[#allocation5 + $0x8] sm:$0xff]   ;;  %p509_p8 = scmp.lt.s32.totalorder %s6264_s13, 1  ;;  %s8203_s8 = sld [smem:[#allocation73_spill]] }
  0xd9   : > { %5143 = vmatprep.subr.bf16.mxu0 %v5627_v0  ;;  %v5629_v2 = vld [vmem:[#allocation5 + $0x10] sm:$0xff]   ;;  %v5630_v3 = vld [vmem:[#allocation5 + $0x18] sm:$0xff]   ;;  %v5635_v4 = vld [vmem:[#allocation2] sm:$0xff]   ;;  %s8204_s24 = sld [smem:[#allocation74_spill]]  ;;  %s7828_s23 = scalar_lea.vmem [#allocation13], %s4625_s11 }
  0xda   : > { %5144 = vmatpush3.bf16.msra.mxu0 %v5627_v0  ;;  %5159 = vmatprep.mubr.bf16.mxu0 %v5635_v4  ;;  %v5631_v5 = vld [vmem:[#allocation5 + $0x20] sm:$0xff]   ;;  %v5632_v6 = vld [vmem:[#allocation5 + $0x28] sm:$0xff]   ;;  %v5633_v7 = vld [vmem:[#allocation5 + $0x30] sm:$0xff]   ;;  %s6748_s20 = scalar_select %p509_p8, %s6264_s13, 1 }
  0xdb   : > { %5145 = vmatprep.subr.bf16.mxu0 %v5628_v1  ;;  %v5634_v8 = vld [vmem:[#allocation5 + $0x38] sm:$0xff]   ;;  %v5651_v9 = vld [vmem:[#allocation5 + $0x40] sm:$0xff]   ;;  %v5652_v10 = vld [vmem:[#allocation5 + $0x48] sm:$0xff]   ;;  %s4790_s16 = sshll.u32 %s6264_s13, 12  ;;  %s8205_s11 = sld [smem:[#allocation23_spill]] }
  0xdc   : > { %5191 = vmatprep.subr.bf16.mxu1 %v5651_v9  ;;  %v5636_v11 = vld [vmem:[#allocation2 + $0x8] sm:$0xff]   ;;  %v5653_v12 = vld [vmem:[#allocation5 + $0x50] sm:$0xff]   ;;  %v5654_v14 = vld [vmem:[#allocation5 + $0x58] sm:$0xff]   ;;  %s5530_s15 = smul.u32 3, %s6748_s20  ;;  %s4628_s9 = sshll.u32 %s6748_s20, 2 }
  0xdd   : > { %5192 = vmatpush3.bf16.msra.mxu1 %v5651_v9  ;;  %v5637_v13 = vld [vmem:[#allocation2 + $0x10] sm:$0xff]   ;;  %v5655_v15 = vld [vmem:[#allocation5 + $0x60] sm:$0xff]   ;;  %v5638_v16 = vld [vmem:[#allocation2 + $0x18] sm:$0xff]   ;;  %s8206_s1 = sld [smem:[#allocation75_spill]]  ;;  %s4415_s13 = scalar_lea.sflag [#allocation4], %s6516_s29 }
  0xde   : > { %5146 = vmatpush3.bf16.msra.mxu0 %v5628_v1  ;;  %5193 = vmatprep.subr.bf16.mxu1 %v5652_v10  ;;  %v5639_v17 = vld [vmem:[#allocation2 + $0x20] sm:$0xff]   ;;  %v5640_v18 = vld [vmem:[#allocation2 + $0x28] sm:$0xff]   ;;  %v5641_v19 = vld [vmem:[#allocation2 + $0x30] sm:$0xff]   ;;  %s512_s19 = scalar_lea.vmem %s7947_s4, %s5530_s15  ;;  %s7652_s14 = scalar_lea.vmem %s8203_s8, %s4628_s9 }
  0xdf   : > { %5147 = vmatprep.subr.bf16.mxu0 %v5629_v2  ;;  %v5642_v20 = vld [vmem:[#allocation2 + $0x38] sm:$0xff]   ;;  %v5643_v21 = vld [vmem:[#allocation2 + $0x40] sm:$0xff]   ;;  %v5644_v22 = vld [vmem:[#allocation2 + $0x48] sm:$0xff]   ;;  %s519_s22 = scalar_lea.vmem %s8204_s24, %s6748_s20  ;;  %s6190_s15 = smov [#allocation13]  }
  0xe0   : > { %v5645_v23 = vld [vmem:[#allocation2 + $0x50] sm:$0xff]   ;;  %v5646_v24 = vld [vmem:[#allocation2 + $0x58] sm:$0xff]   ;;  %v5647_v25 = vld [vmem:[#allocation2 + $0x60] sm:$0xff]   ;;  %s6101_s21 = sshll.u32 %s6190_s15, 4  ;;  %s6102_s21 = int_to_ptr.vmem [resolvable:$false] %s6101_s21 }
  0xe1   : > { %5194 = vmatpush3.bf16.msra.mxu1 %v5652_v10  ;;  %v5648_v26 = vld [vmem:[#allocation2 + $0x68] sm:$0xff]   ;;  %v5649_v27 = vld [vmem:[#allocation2 + $0x70] sm:$0xff]   ;;  %v5650_v28 = vld [vmem:[#allocation2 + $0x78] sm:$0xff]   ;;  %p8207_p11 = scmp.ne.s32.totalorder %s8205_s11, 0  ;;  %s6103_s6 = scalar_lea.vmem %s6102_s21, 8192 }
  0xe2   : > { %5148 = vmatpush3.bf16.msra.mxu0 %v5629_v2  ;;  %5195 = vmatprep.subr.bf16.mxu1 %v5653_v12  ;;  %v5656_v29 = vld [vmem:[#allocation5 + $0x68] sm:$0xff]   ;;  %v5657_v30 = vld [vmem:[#allocation5 + $0x70] sm:$0xff]   ;;  %v5658_v31 = vld [vmem:[#allocation5 + $0x78] sm:$0xff]  }
  0xe3   : > { %5149 = vmatprep.subr.bf16.mxu0 %v5630_v3  ;;  %v5659_v32 = vld [vmem:[%s6519_s3] ss:$12 sps:$4 sm:$0xff]   ;;  %v5661_v33 = vld [vmem:[%s6519_s3 + $0x4] ss:$12 sps:$4 sm:$0xff]   ;;  %v5664_v34 = vld [vmem:[%s6519_s3 + $0x1c] ss:$12 sps:$4 sm:$0xff]  }
  0xe4   : > { %v5662_v35 = vld [vmem:[%s6519_s3 + $0x18] ss:$12 sps:$4 sm:$0xff]   ;;  %v6543_v36 = vld [vmem:[%s6519_s3 + $0x8] ss:$12 sps:$4 sm:$0xff]   ;;  %v5665_v38 = vld [vmem:[%s6519_s3 + $0x30] ss:$12 sps:$4 sm:$0xff]  }
  0xe5   : > { %5196 = vmatpush3.bf16.msra.mxu1 %v5653_v12  ;;  %v5667_v37 = vld [vmem:[%s6519_s3 + $0x34] ss:$12 sps:$4 sm:$0xff]   ;;  %v5670_v39 = vld [vmem:[%s6519_s3 + $0x4c] ss:$12 sps:$4 sm:$0xff]   ;;  %v5673_v41 = vld [vmem:[%s6519_s3 + $0x64] ss:$12 sps:$4 sm:$0xff]  }
  0xe6   : > { %5150 = vmatpush3.bf16.msra.mxu0 %v5630_v3  ;;  %5197 = vmatprep.subr.bf16.mxu1 %v5654_v14  ;;  %v5668_v40 = vld [vmem:[%s6519_s3 + $0x48] ss:$12 sps:$4 sm:$0xff]   ;;  %v5671_v42 = vld [vmem:[%s6519_s3 + $0x60] ss:$12 sps:$4 sm:$0xff]   ;;  %v5676_v44 = vld [vmem:[%s6519_s3 + $0x78] ss:$12 sps:$4 sm:$0xff]  }
  0xe7   : > { %5151 = vmatprep.subr.bf16.mxu0 %v5631_v5  ;;  %v5678_v43 = vld [vmem:[%s6519_s3 + $0x7c] ss:$12 sps:$4 sm:$0xff]   ;;  %v5683_v45 = vld [vmem:[%s6519_s3 + $0x94] ss:$12 sps:$4 sm:$0xff]  }
  0xe8   : > { %v5681_v46 = vld [vmem:[%s6519_s3 + $0x90] ss:$12 sps:$4 sm:$0xff]  }
  0xe9   : > { %5198 = vmatpush3.bf16.msra.mxu1 %v5654_v14  ;;  %v6556_v47 = vld [vmem:[#allocation7] ss:$0 sm:$0xff] }
  0xea   : > { %5152 = vmatpush3.bf16.msra.mxu0 %v5631_v5  ;;  %5199 = vmatprep.subr.bf16.mxu1 %v5655_v15 }
  0xeb   : > { %5153 = vmatprep.subr.bf16.mxu0 %v5632_v6 }
  0xed   : > { %5200 = vmatpush3.bf16.msra.mxu1 %v5655_v15 }
  0xee   : > { %5154 = vmatpush3.bf16.msra.mxu0 %v5632_v6  ;;  %5201 = vmatprep.subr.bf16.mxu1 %v5656_v29 }
  0xef   : > { %5155 = vmatprep.subr.bf16.mxu0 %v5633_v7 }
  0xf1   : > { %5202 = vmatpush3.bf16.msra.mxu1 %v5656_v29 }
  0xf2   : > { %5156 = vmatpush3.bf16.msra.mxu0 %v5633_v7  ;;  %5203 = vmatprep.subr.bf16.mxu1 %v5657_v30  ;;  %v5675_v7 = vld [vmem:[%s6519_s3 + $0x20] ss:$12 sps:$4 sm:$0xff]  }
  0xf3   : > { %5157 = vmatprep.subr.bf16.mxu0 %v5634_v8 }
  0xf5   : > { %5204 = vmatpush3.bf16.msra.mxu1 %v5657_v30 }
  0xf6   : > { %5158 = vmatpush3.bf16.msra.mxu0 %v5634_v8  ;;  %5205 = vmatprep.subr.bf16.mxu1 %v5658_v31 }
  0xf7   : > { %1420 = vmatprep.subr.bf16.mxu0 %v5661_v33 }
  0xf9   : > { %5160 = vmatmul.mubr.bf16.vlgmr.msra.gmra.mrb[0].mxu0 %v5636_v11  ;;  %5206 = vmatpush3.bf16.msra.mxu1 %v5658_v31 }
  0xfa   : > { %5163 = vmatprep.mubr.bf16.mxu0 %v5637_v13  ;;  %1421 = vmatpush1.bf16.msra.mxu0 %v5659_v32 }
  0xfb   : > { %1422 = vmatprep.subr.bf16.mxu0 %v5664_v34  ;;  %5239 = vmatprep.subr.bf16.mxu1 %v6543_v36 }
  0xfe   : > { %1423 = vmatpush1.bf16.msra.mxu0 %v5662_v35 }
  0xff   : > { %1424 = vmatprep.subr.bf16.mxu0 %v5667_v37  ;;  %v5684_v37 = vld [vmem:[%s6519_s3 + $0x68] ss:$12 sps:$4 sm:$0xff]  }
 0x101   : > { %5164 = vmatmul.mubr.bf16.gmra.mrb[4].mxu0 %v5638_v16 }
 0x102   : > { %5167 = vmatprep.mubr.bf16.mxu0 %v5639_v17  ;;  %1425 = vmatpush1.bf16.msra.mxu0 %v5665_v38  ;;  %v5679_v17 = vld [vmem:[%s6519_s3 + $0x38] ss:$12 sps:$4 sm:$0xff]  }
 0x103   : > { %1426 = vmatprep.subr.bf16.mxu0 %v5670_v39 }
 0x106   : > { %1427 = vmatpush1.bf16.msra.mxu0 %v5668_v40 }
 0x107   : > { %1428 = vmatprep.subr.bf16.mxu0 %v5673_v41 }
 0x109   : > { %5168 = vmatmul.mubr.bf16.gmra.mrb[8].mxu0 %v5640_v18 }
 0x10a   : > { %5171 = vmatprep.mubr.bf16.mxu0 %v5641_v19  ;;  %1429 = vmatpush1.bf16.msra.mxu0 %v5671_v42 }
 0x10b   : > { %1430 = vmatprep.subr.bf16.mxu0 %v5678_v43 }
 0x10e   : > { %1431 = vmatpush1.bf16.msra.mxu0 %v5676_v44 }
 0x10f   : > { %1432 = vmatprep.subr.bf16.mxu0 %v5683_v45 }
 0x111   : > { %5172 = vmatmul.mubr.bf16.gmra.mrb[12].mxu0 %v5642_v20 }
 0x112   : > { %5175 = vmatprep.mubr.bf16.mxu0 %v5643_v21  ;;  %1433 = vmatpush1.bf16.msra.mxu0 %v5681_v46 }
 0x119   : > { %5176 = vmatmul.mubr.bf16.gmra.mrb[16].mxu0 %v5644_v22 }
 0x11a   : > { %5179 = vmatprep.mubr.bf16.mxu0 %v5645_v23 }
 0x121   : > { %5180 = vmatmul.mubr.bf16.gmra.mrb[20].mxu0 %v5646_v24 }
 0x122   : > { %5183 = vmatprep.mubr.bf16.mxu0 %v5647_v25 }
 0x129   : > { %5184 = vmatmul.mubr.bf16.gmra.mrb[24].mxu0 %v5648_v26 }
 0x12a   : > { %5187 = vmatprep.mubr.bf16.mxu0 %v5649_v27  ;;  %v5680_v27 = vld [vmem:[%s6519_s3 + $0x50] ss:$12 sps:$4 sm:$0xff]  }
 0x131   : > { %5188 = vmatmul.mubr.bf16.gmra.mrb[28].mxu0 %v5650_v28 }
 0x1cc   : > { %v5161_v48 = vpop.f32.mrb[0].mxu0 }
 0x1cd   : > { %v763_v49 = vadd.f32 %v5161_v48, %v6556_v47  ;;  %v754_v50 = vpop.f32.mrb[1].mxu0  ;;  %v5685_v48 = vld [vmem:[%s6519_s3 + $0x80] ss:$12 sps:$4 sm:$0xff]  }
 0x1ce   : > { %v755_v51 = vadd.f32 %v6556_v47, %v754_v50  ;;  %v5162_v52 = vpop.f32.mrb[2].mxu0 }
 0x1cf   : > { %v915_v53 = vmul.f32 0.01, %v763_v49  ;;  %v766_v54 = vadd.f32 %v5162_v52, %v6556_v47  ;;  %v757_v55 = vpop.f32.mrb[3].mxu0  ;;  %vm883_vm0 = vcmp.ge.f32.partialorder %v763_v49, 0.0 }
 0x1d0   : > { %v913_v56 = vmul.f32 0.01, %v755_v51  ;;  %v758_v57 = vadd.f32 %v6556_v47, %v757_v55  ;;  %vm881_vm2 = vcmp.ge.f32.partialorder %v755_v51, 0.0 }
 0x1d1   : > { %vm884_vm1 = vcmp.ge.f32.partialorder %v766_v54, 0.0  ;;  %v916_v58 = vmul.f32 0.01, %v766_v54  ;;  %v947_v60 = vsel %vm883_vm0, %v763_v49, %v915_v53 }
 0x1d2   : > { %v914_v59 = vmul.f32 0.01, %v758_v57  ;;  %vm882_vm3 = vcmp.ge.f32.partialorder %v758_v57, 0.0  ;;  %v945_v63 = vsel %vm881_vm2, %v755_v51, %v913_v56 }
 0x1d3   : > { %v948_v61 = vsel %vm884_vm1, %v766_v54, %v916_v58 }
 0x1d4   : > { %v5165_v62 = vpop.f32.mrb[4].mxu0  ;;  %v946_v0 = vsel %vm882_vm3, %v758_v57, %v914_v59  ;;  %v995_v1 = vpack.c.bf16 %v948_v61, %v947_v60 }
 0x1d5   : > { %v779_v2 = vadd.f32 %v5165_v62, %v6556_v47  ;;  %v770_v3 = vpop.f32.mrb[5].mxu0  ;;  %v994_v4 = vpack.c.bf16 %v946_v0, %v945_v63 }
 0x1d6   : > { %v771_v5 = vadd.f32 %v6556_v47, %v770_v3  ;;  %v5166_v6 = vpop.f32.mrb[6].mxu0 }
 0x1d7   : > { %vm887_vm4 = vcmp.ge.f32.partialorder %v779_v2, 0.0  ;;  %v919_v8 = vmul.f32 0.01, %v779_v2  ;;  %v782_v9 = vadd.f32 %v5166_v6, %v6556_v47  ;;  %v773_v10 = vpop.f32.mrb[7].mxu0  ;;  %5207 = vmatprep.mubr.bf16.mxu1 %v994_v4 }
 0x1d8   : > { %vm885_vm5 = vcmp.ge.f32.partialorder %v771_v5, 0.0  ;;  %v917_v11 = vmul.f32 0.01, %v771_v5  ;;  %v774_v12 = vadd.f32 %v6556_v47, %v773_v10  ;;  %5208 = vmatmul.mubr.bf16.vlgmr.msra.gmra.mrb[0].mxu1 %v995_v1 }
 0x1d9   : > { %vm888_vm6 = vcmp.ge.f32.partialorder %v782_v9, 0.0  ;;  %v920_v13 = vmul.f32 0.01, %v782_v9  ;;  %v951_v14 = vsel %vm887_vm4, %v779_v2, %v919_v8  ;;  %5240 = vmatpush3.bf16.msra.mxu1 %v6543_v36 }
 0x1da   : > { %vm886_vm7 = vcmp.ge.f32.partialorder %v774_v12, 0.0  ;;  %v918_v15 = vmul.f32 0.01, %v774_v12  ;;  %v949_v16 = vsel %vm885_vm5, %v771_v5, %v917_v11  ;;  %5241 = vmatprep.subr.bf16.mxu1 %v5675_v7 }
 0x1db   : > { %v952_v18 = vsel %vm888_vm6, %v782_v9, %v920_v13 }
 0x1dc   : > { %v5169_v19 = vpop.f32.mrb[8].mxu0  ;;  %v950_v20 = vsel %vm886_vm7, %v774_v12, %v918_v15  ;;  %v997_v21 = vpack.c.bf16 %v952_v18, %v951_v14 }
 0x1dd   : > { %v795_v22 = vadd.f32 %v5169_v19, %v6556_v47  ;;  %v786_v23 = vpop.f32.mrb[9].mxu0  ;;  %v996_v24 = vpack.c.bf16 %v950_v20, %v949_v16  ;;  %5242 = vmatpush3.bf16.msra.mxu1 %v5675_v7 }
 0x1de   : > { %v787_v25 = vadd.f32 %v6556_v47, %v786_v23  ;;  %v5170_v26 = vpop.f32.mrb[10].mxu0  ;;  %5243 = vmatprep.subr.bf16.mxu1 %v5679_v17 }
 0x1df   : > { %vm891_vm8 = vcmp.ge.f32.partialorder %v795_v22, 0.0  ;;  %v923_v28 = vmul.f32 0.01, %v795_v22  ;;  %v798_v29 = vadd.f32 %v5170_v26, %v6556_v47  ;;  %v789_v30 = vpop.f32.mrb[11].mxu0  ;;  %5211 = vmatprep.mubr.bf16.mxu1 %v996_v24 }
 0x1e0   : > { %vm889_vm9 = vcmp.ge.f32.partialorder %v787_v25, 0.0  ;;  %v921_v31 = vmul.f32 0.01, %v787_v25  ;;  %v790_v32 = vadd.f32 %v6556_v47, %v789_v30  ;;  %5212 = vmatmul.mubr.bf16.gmra.mrb[4].mxu1 %v997_v21 }
 0x1e1   : > { %vm892_vm10 = vcmp.ge.f32.partialorder %v798_v29, 0.0  ;;  %v924_v33 = vmul.f32 0.01, %v798_v29  ;;  %v955_v34 = vsel %vm891_vm8, %v795_v22, %v923_v28  ;;  %5244 = vmatpush3.bf16.msra.mxu1 %v5679_v17 }
 0x1e2   : > { %vm890_vm11 = vcmp.ge.f32.partialorder %v790_v32, 0.0  ;;  %v922_v35 = vmul.f32 0.01, %v790_v32  ;;  %v953_v36 = vsel %vm889_vm9, %v787_v25, %v921_v31  ;;  %5245 = vmatprep.subr.bf16.mxu1 %v5680_v27 }
 0x1e3   : > { %v956_v38 = vsel %vm892_vm10, %v798_v29, %v924_v33 }
 0x1e4   : > { %v5173_v39 = vpop.f32.mrb[12].mxu0  ;;  %v954_v40 = vsel %vm890_vm11, %v790_v32, %v922_v35  ;;  %v999_v41 = vpack.c.bf16 %v956_v38, %v955_v34 }
 0x1e5   : > { %v811_v42 = vadd.f32 %v5173_v39, %v6556_v47  ;;  %v802_v43 = vpop.f32.mrb[13].mxu0  ;;  %v998_v44 = vpack.c.bf16 %v954_v40, %v953_v36  ;;  %5246 = vmatpush3.bf16.msra.mxu1 %v5680_v27 }
 0x1e6   : > { %v803_v45 = vadd.f32 %v6556_v47, %v802_v43  ;;  %v5174_v46 = vpop.f32.mrb[14].mxu0  ;;  %5247 = vmatprep.subr.bf16.mxu1 %v5684_v37 }
 0x1e7   : > { %vm895_vm12 = vcmp.ge.f32.partialorder %v811_v42, 0.0  ;;  %v927_v49 = vmul.f32 0.01, %v811_v42  ;;  %v814_v50 = vadd.f32 %v5174_v46, %v6556_v47  ;;  %v805_v51 = vpop.f32.mrb[15].mxu0  ;;  %5215 = vmatprep.mubr.bf16.mxu1 %v998_v44 }
 0x1e8   : > { %vm893_vm13 = vcmp.ge.f32.partialorder %v803_v45, 0.0  ;;  %v925_v52 = vmul.f32 0.01, %v803_v45  ;;  %v806_v53 = vadd.f32 %v6556_v47, %v805_v51  ;;  %5216 = vmatmul.mubr.bf16.gmra.mrb[8].mxu1 %v999_v41 }
 0x1e9   : > { %vm896_vm14 = vcmp.ge.f32.partialorder %v814_v50, 0.0  ;;  %v928_v54 = vmul.f32 0.01, %v814_v50  ;;  %v959_v55 = vsel %vm895_vm12, %v811_v42, %v927_v49  ;;  %5248 = vmatpush3.bf16.msra.mxu1 %v5684_v37 }
 0x1ea   : > { %vm894_vm15 = vcmp.ge.f32.partialorder %v806_v53, 0.0  ;;  %v926_v56 = vmul.f32 0.01, %v806_v53  ;;  %v957_v57 = vsel %vm893_vm13, %v803_v45, %v925_v52  ;;  %5249 = vmatprep.subr.bf16.mxu1 %v5685_v48 }
 0x1eb   : > { %v960_v58 = vsel %vm896_vm14, %v814_v50, %v928_v54 }
 0x1ec   : > { %v5177_v59 = vpop.f32.mrb[16].mxu0  ;;  %v958_v60 = vsel %vm894_vm15, %v806_v53, %v926_v56  ;;  %v1001_v61 = vpack.c.bf16 %v960_v58, %v959_v55 }
 0x1ed   : > { %v827_v62 = vadd.f32 %v5177_v59, %v6556_v47  ;;  %v818_v63 = vpop.f32.mrb[17].mxu0  ;;  %v1000_v0 = vpack.c.bf16 %v958_v60, %v957_v57  ;;  %5250 = vmatpush3.bf16.msra.mxu1 %v5685_v48 }
 0x1ee   : > { %v819_v1 = vadd.f32 %v6556_v47, %v818_v63  ;;  %v5178_v2 = vpop.f32.mrb[18].mxu0 }
 0x1ef   : > { %vm899_vm0 = vcmp.ge.f32.partialorder %v827_v62, 0.0  ;;  %v931_v3 = vmul.f32 0.01, %v827_v62  ;;  %v830_v4 = vadd.f32 %v5178_v2, %v6556_v47  ;;  %v821_v5 = vpop.f32.mrb[19].mxu0  ;;  %5219 = vmatprep.mubr.bf16.mxu1 %v1000_v0 }
 0x1f0   : > { %vm897_vm1 = vcmp.ge.f32.partialorder %v819_v1, 0.0  ;;  %v929_v6 = vmul.f32 0.01, %v819_v1  ;;  %v822_v7 = vadd.f32 %v6556_v47, %v821_v5  ;;  %5220 = vmatmul.mubr.bf16.gmra.mrb[12].mxu1 %v1001_v61 }
 0x1f1   : > { %vm900_vm2 = vcmp.ge.f32.partialorder %v830_v4, 0.0  ;;  %v932_v8 = vmul.f32 0.01, %v830_v4  ;;  %v963_v9 = vsel %vm899_vm0, %v827_v62, %v931_v3 }
 0x1f2   : > { %vm898_vm3 = vcmp.ge.f32.partialorder %v822_v7, 0.0  ;;  %v930_v10 = vmul.f32 0.01, %v822_v7  ;;  %v961_v11 = vsel %vm897_vm1, %v819_v1, %v929_v6 }
 0x1f3   : > { %v964_v12 = vsel %vm900_vm2, %v830_v4, %v932_v8  ;;  %v5686_v8 = vld [vmem:[%s6519_s3 + $0xa8] ss:$12 sps:$4 sm:$0xff]  }
 0x1f4   : > { %v5181_v13 = vpop.f32.mrb[20].mxu0  ;;  %v962_v14 = vsel %vm898_vm3, %v822_v7, %v930_v10  ;;  %v1003_v15 = vpack.c.bf16 %v964_v12, %v963_v9  ;;  %v5689_v7 = vld [vmem:[%s6519_s3 + $0x98] ss:$12 sps:$4 sm:$0xff]   ;;  %v6189_v10 = vmov 0   ;;  %v6601_v12 = vld [vmem:[#allocation7 + $0x1] ss:$0 sm:$0xff] }
 0x1f5   : > { %v843_v16 = vadd.f32 %v5181_v13, %v6556_v47  ;;  %v834_v17 = vpop.f32.mrb[21].mxu0  ;;  %v1002_v18 = vpack.c.bf16 %v962_v14, %v961_v11  ;;  %v5688_v9 = vld [vmem:[%s6519_s3 + $0xac] ss:$12 sps:$4 sm:$0xff]   ;;  %5251 = vmatprep.subr.bf16.mxu1 %v5689_v7  ;;  %1452 = vmatprep.mubr.bf16.mxu0 %v6189_v10 }
 0x1f6   : > { %v835_v19 = vadd.f32 %v6556_v47, %v834_v17  ;;  %v5182_v20 = vpop.f32.mrb[22].mxu0  ;;  %5252 = vmatpush3.bf16.msra.mxu1 %v5689_v7  ;;  %1434 = vmatprep.subr.bf16.mxu0 %v5688_v9 }
 0x1f7   : > { %vm903_vm4 = vcmp.ge.f32.partialorder %v843_v16, 0.0  ;;  %v935_v21 = vmul.f32 0.01, %v843_v16  ;;  %v846_v22 = vadd.f32 %v5182_v20, %v6556_v47  ;;  %v837_v23 = vpop.f32.mrb[23].mxu0  ;;  %5223 = vmatprep.mubr.bf16.mxu1 %v1002_v18  ;;  %1435 = vmatpush1.bf16.msra.mxu0 %v5686_v8 }
 0x1f8   : > { %vm901_vm5 = vcmp.ge.f32.partialorder %v835_v19, 0.0  ;;  %v933_v24 = vmul.f32 0.01, %v835_v19  ;;  %v838_v25 = vadd.f32 %v6556_v47, %v837_v23  ;;  %5224 = vmatmul.mubr.bf16.gmra.mrb[16].mxu1 %v1003_v15 }
 0x1f9   : > { %vm904_vm6 = vcmp.ge.f32.partialorder %v846_v22, 0.0  ;;  %v936_v26 = vmul.f32 0.01, %v846_v22  ;;  %v967_v27 = vsel %vm903_vm4, %v843_v16, %v935_v21 }
 0x1fa   : > { %vm902_vm7 = vcmp.ge.f32.partialorder %v838_v25, 0.0  ;;  %v934_v28 = vmul.f32 0.01, %v838_v25  ;;  %v965_v29 = vsel %vm901_vm5, %v835_v19, %v933_v24 }
 0x1fb   : > { %v968_v30 = vsel %vm904_vm6, %v846_v22, %v936_v26 }
 0x1fc   : > { %v5185_v31 = vpop.f32.mrb[24].mxu0  ;;  %v966_v32 = vsel %vm902_vm7, %v838_v25, %v934_v28  ;;  %v1005_v33 = vpack.c.bf16 %v968_v30, %v967_v27 }
 0x1fd   : > { %v859_v34 = vadd.f32 %v5185_v31, %v6556_v47  ;;  %v850_v35 = vpop.f32.mrb[25].mxu0  ;;  %v1004_v36 = vpack.c.bf16 %v966_v32, %v965_v29 }
 0x1fe   : > { %v851_v37 = vadd.f32 %v6556_v47, %v850_v35  ;;  %v5186_v38 = vpop.f32.mrb[26].mxu0 }
 0x1ff   : > { %vm907_vm8 = vcmp.ge.f32.partialorder %v859_v34, 0.0  ;;  %v939_v39 = vmul.f32 0.01, %v859_v34  ;;  %v862_v40 = vadd.f32 %v5186_v38, %v6556_v47  ;;  %v853_v41 = vpop.f32.mrb[27].mxu0  ;;  %5227 = vmatprep.mubr.bf16.mxu1 %v1004_v36 }
 0x200   : > { %vm905_vm9 = vcmp.ge.f32.partialorder %v851_v37, 0.0  ;;  %v937_v42 = vmul.f32 0.01, %v851_v37  ;;  %v854_v43 = vadd.f32 %v6556_v47, %v853_v41  ;;  %5228 = vmatmul.mubr.bf16.gmra.mrb[20].mxu1 %v1005_v33 }
 0x201   : > { %vm908_vm10 = vcmp.ge.f32.partialorder %v862_v40, 0.0  ;;  %v940_v44 = vmul.f32 0.01, %v862_v40  ;;  %v971_v45 = vsel %vm907_vm8, %v859_v34, %v939_v39 }
 0x202   : > { %vm906_vm11 = vcmp.ge.f32.partialorder %v854_v43, 0.0  ;;  %v938_v46 = vmul.f32 0.01, %v854_v43  ;;  %v969_v48 = vsel %vm905_vm9, %v851_v37, %v937_v42 }
 0x203   : > { %v972_v49 = vsel %vm908_vm10, %v862_v40, %v940_v44 }
 0x204   : > { %v5189_v50 = vpop.f32.mrb[28].mxu0  ;;  %v970_v51 = vsel %vm906_vm11, %v854_v43, %v938_v46  ;;  %v1007_v52 = vpack.c.bf16 %v972_v49, %v971_v45 }
 0x205   : > { %v875_v53 = vadd.f32 %v5189_v50, %v6556_v47  ;;  %v866_v54 = vpop.f32.mrb[29].mxu0  ;;  %v1006_v55 = vpack.c.bf16 %v970_v51, %v969_v48 }
 0x206   : > { %v867_v56 = vadd.f32 %v6556_v47, %v866_v54  ;;  %v5190_v57 = vpop.f32.mrb[30].mxu0 }
 0x207   : > { %vm911_vm12 = vcmp.ge.f32.partialorder %v875_v53, 0.0  ;;  %v943_v58 = vmul.f32 0.01, %v875_v53  ;;  %v878_v59 = vadd.f32 %v5190_v57, %v6556_v47  ;;  %v869_v60 = vpop.f32.mrb[31].mxu0  ;;  %5231 = vmatprep.mubr.bf16.mxu1 %v1006_v55 }
 0x208   : > { %vm909_vm13 = vcmp.ge.f32.partialorder %v867_v56, 0.0  ;;  %v941_v61 = vmul.f32 0.01, %v867_v56  ;;  %v870_v62 = vadd.f32 %v6556_v47, %v869_v60  ;;  %5232 = vmatmul.mubr.bf16.gmra.mrb[24].mxu1 %v1007_v52  ;;  %v5690_v47 = vld [vmem:[%s6519_s3 + $0xb0] ss:$12 sps:$4 sm:$0xff]   ;;  %s4428_s3 = sshll.u32 %s7828_s23, 4  ;;  %s7895_s3 = int_to_ptr.vmem [resolvable:$true] %s4428_s3 }
 0x209   : > { %vm912_vm14 = vcmp.ge.f32.partialorder %v878_v59, 0.0  ;;  %v944_v63 = vmul.f32 0.01, %v878_v59  ;;  %v975_v0 = vsel %vm911_vm12, %v875_v53, %v943_v58  ;;  %5253 = vmatprep.subr.bf16.mxu1 %v5690_v47  ;;  %s6097_s20 = scalar_lea.vmem %s7895_s3, 4096  ;;  %p6104_p10 = scmp.lt.s32.totalorder %s7895_s3, %s6102_s21 }
 0x20a   : > { %vm910_vm15 = vcmp.ge.f32.partialorder %v870_v62, 0.0  ;;  %v942_v1 = vmul.f32 0.01, %v870_v62  ;;  %v973_v2 = vsel %vm909_vm13, %v867_v56, %v941_v61  ;;  %5254 = vmatpush3.bf16.msra.mxu1 %v5690_v47  ;;  %p6098_p13 = scmp.ne.s32.totalorder %s7895_s3, %s6097_s20  ;;  %p6105_p4 = scmp.lt.s32.totalorder %s6103_s6, %s6097_s20 }
 0x20b   : > { %v976_v3 = vsel %vm912_vm14, %v878_v59, %v944_v63 }
 0x20c   : > { %v974_v4 = vsel %vm910_vm15, %v870_v62, %v942_v1  ;;  %v1009_v5 = vpack.c.bf16 %v976_v3, %v975_v0  ;;  %p6099_p6 = pnand %p6098_p13, %p8207_p11  ;;  %p6106_p5 = por %p6105_p4, %p6104_p10 }
 0x20d   : > { %v1008_v6 = vpack.c.bf16 %v974_v4, %v973_v2 }
 0x20e   : > { %p6100_p9 = pneg %p6099_p6 }
 0x20f   : > { %5235 = vmatprep.mubr.bf16.mxu1 %v1008_v6 }
 0x210   : > { %5236 = vmatmul.mubr.bf16.gmra.mrb[28].mxu1 %v1009_v5  ;;  %p6107_p7 = pnand %p6106_p5, %p6100_p9 }
 0x2ab   : > { %v5209_v11 = vpop.f32.mrb[0].mxu1 }
 0x2ac   : > { %v1100_v13 = vpop.f32.mrb[1].mxu1  ;;  %v6613_v19 = vadd.f32 %v5209_v11, %v6601_v12 }
 0x2ad   : > { %v5210_v14 = vpop.f32.mrb[2].mxu1  ;;  %v6607_v17 = vadd.f32 %v6601_v12, %v1100_v13 }
 0x2ae   : > { %v6604_v15 = vadd.f32 %v5210_v14, %v6601_v12  ;;  %v1103_v16 = vpop.f32.mrb[3].mxu1  ;;  %8075 = vst [vmem:[#allocation28_spill] sm:$0xff] %v6613_v19 }
 0x2af   : > { %8073 = vst [vmem:[#allocation26_spill] sm:$0xff] %v6607_v17  ;;  %v6610_v18 = vadd.f32 %v6601_v12, %v1103_v16 }
 0x2b0   : > { %8072 = vst [vmem:[#allocation25_spill] sm:$0xff] %v6604_v15  ;;  %v1260_v21 = vpack.c.bf16 %v6604_v15, %v6613_v19 }
 0x2b1   : > { %8074 = vst [vmem:[#allocation27_spill] sm:$0xff] %v6610_v18  ;;  %v1259_v20 = vpack.c.bf16 %v6610_v18, %v6607_v17 }
 0x2b3   : > { %v5213_v22 = vpop.f32.mrb[4].mxu1  ;;  %1453 = vmatmul.mubr.bf16.vlgmr.msra.gmra.mrb[32].mxu0 %v1259_v20  ;;  %5255 = vmatprep.mubr.bf16.mxu1 %v1259_v20 }
 0x2b4   : > { %v1116_v23 = vpop.f32.mrb[5].mxu1  ;;  %5256 = vmatmul.mubr.bf16.vlgmr.msra.gmra.mrb[32].mxu1 %v1260_v21  ;;  %1462 = vmatprep.mubr.bf16.mxu0 %v6189_v10  ;;  %v6624_v26 = vadd.f32 %v5213_v22, %v6601_v12 }
 0x2b5   : > { %v6621_v24 = vadd.f32 %v6601_v12, %v1116_v23  ;;  %v5214_v25 = vpop.f32.mrb[6].mxu1 }
 0x2b6   : > { %8077 = vst [vmem:[#allocation30_spill] sm:$0xff] %v6624_v26  ;;  %v6627_v27 = vadd.f32 %v5214_v25, %v6601_v12  ;;  %v1119_v28 = vpop.f32.mrb[7].mxu1 }
 0x2b7   : > { %8076 = vst [vmem:[#allocation29_spill] sm:$0xff] %v6621_v24  ;;  %v6630_v29 = vadd.f32 %v6601_v12, %v1119_v28 }
 0x2b8   : > { %8078 = vst [vmem:[#allocation31_spill] sm:$0xff] %v6627_v27  ;;  %v1262_v31 = vpack.c.bf16 %v6627_v27, %v6624_v26 }
 0x2b9   : > { %8079 = vst [vmem:[#allocation32_spill] sm:$0xff] %v6630_v29  ;;  %v1261_v30 = vpack.c.bf16 %v6630_v29, %v6621_v24 }
 0x2bb   : > { %v5217_v32 = vpop.f32.mrb[8].mxu1  ;;  %1463 = vmatmul.mubr.bf16.gmra.mrb[36].mxu0 %v1260_v21  ;;  %5259 = vmatprep.mubr.bf16.mxu1 %v1261_v30 }
 0x2bc   : > { %v6637_v33 = vadd.f32 %v5217_v32, %v6601_v12  ;;  %v1132_v34 = vpop.f32.mrb[9].mxu1  ;;  %5260 = vmatmul.mubr.bf16.gmra.mrb[36].mxu1 %v1262_v31  ;;  %1472 = vmatprep.mubr.bf16.mxu0 %v6189_v10 }
 0x2bd   : > { %v6641_v35 = vadd.f32 %v6601_v12, %v1132_v34  ;;  %v5218_v36 = vpop.f32.mrb[10].mxu1 }
 0x2be   : > { %8080 = vst [vmem:[#allocation33_spill] sm:$0xff] %v6637_v33  ;;  %v6644_v37 = vadd.f32 %v5218_v36, %v6601_v12  ;;  %v1135_v38 = vpop.f32.mrb[11].mxu1 }
 0x2bf   : > { %8081 = vst [vmem:[#allocation34_spill] sm:$0xff] %v6641_v35  ;;  %v6647_v39 = vadd.f32 %v6601_v12, %v1135_v38 }
 0x2c0   : > { %8082 = vst [vmem:[#allocation35_spill] sm:$0xff] %v6644_v37  ;;  %v1264_v40 = vpack.c.bf16 %v6644_v37, %v6637_v33 }
 0x2c1   : > { %8083 = vst [vmem:[#allocation36_spill] sm:$0xff] %v6647_v39  ;;  %v1263_v41 = vpack.c.bf16 %v6647_v39, %v6641_v35 }
 0x2c3   : > { %v5221_v42 = vpop.f32.mrb[12].mxu1  ;;  %1473 = vmatmul.mubr.bf16.gmra.mrb[40].mxu0 %v1261_v30  ;;  %5263 = vmatprep.mubr.bf16.mxu1 %v1263_v41 }
 0x2c4   : > { %v6654_v43 = vadd.f32 %v5221_v42, %v6601_v12  ;;  %v1148_v44 = vpop.f32.mrb[13].mxu1  ;;  %5264 = vmatmul.mubr.bf16.gmra.mrb[40].mxu1 %v1264_v40  ;;  %1482 = vmatprep.mubr.bf16.mxu0 %v6189_v10 }
 0x2c5   : > { %v6658_v45 = vadd.f32 %v6601_v12, %v1148_v44  ;;  %v5222_v46 = vpop.f32.mrb[14].mxu1 }
 0x2c6   : > { %8084 = vst [vmem:[#allocation37_spill] sm:$0xff] %v6654_v43  ;;  %v6661_v48 = vadd.f32 %v5222_v46, %v6601_v12  ;;  %v1151_v49 = vpop.f32.mrb[15].mxu1  ;;  %v1275_v46 = vld [vmem:[%s512_s19] sm:$0x7] }
 0x2c7   : > { %8085 = vst [vmem:[#allocation38_spill] sm:$0xff] %v6658_v45  ;;  %v6664_v50 = vadd.f32 %v6601_v12, %v1151_v49 }
 0x2c8   : > { %8086 = vst [vmem:[#allocation39_spill] sm:$0xff] %v6661_v48  ;;  %v1266_v51 = vpack.c.bf16 %v6661_v48, %v6654_v43 }
 0x2c9   : > { %8087 = vst [vmem:[#allocation40_spill] sm:$0xff] %v6664_v50  ;;  %v1265_v52 = vpack.c.bf16 %v6664_v50, %v6658_v45 }
 0x2cb   : > { %v5225_v53 = vpop.f32.mrb[16].mxu1  ;;  %1483 = vmatmul.mubr.bf16.gmra.mrb[44].mxu0 %v1262_v31  ;;  %5267 = vmatprep.mubr.bf16.mxu1 %v1265_v52 }
 0x2cc   : > { %v6671_v54 = vadd.f32 %v5225_v53, %v6601_v12  ;;  %v1164_v55 = vpop.f32.mrb[17].mxu1  ;;  %5268 = vmatmul.mubr.bf16.gmra.mrb[44].mxu1 %v1266_v51  ;;  %1492 = vmatprep.mubr.bf16.mxu0 %v6189_v10 }
 0x2cd   : > { %v6675_v56 = vadd.f32 %v6601_v12, %v1164_v55  ;;  %v5226_v57 = vpop.f32.mrb[18].mxu1 }
 0x2ce   : > { %8088 = vst [vmem:[#allocation41_spill] sm:$0xff] %v6671_v54  ;;  %v6678_v58 = vadd.f32 %v5226_v57, %v6601_v12  ;;  %v1167_v59 = vpop.f32.mrb[19].mxu1 }
 0x2cf   : > { %8089 = vst [vmem:[#allocation42_spill] sm:$0xff] %v6675_v56  ;;  %v6681_v60 = vadd.f32 %v6601_v12, %v1167_v59 }
 0x2d0   : > { %8090 = vst [vmem:[#allocation43_spill] sm:$0xff] %v6678_v58  ;;  %v1268_v61 = vpack.c.bf16 %v6678_v58, %v6671_v54 }
 0x2d1   : > { %8091 = vst [vmem:[#allocation44_spill] sm:$0xff] %v6681_v60  ;;  %v1267_v62 = vpack.c.bf16 %v6681_v60, %v6675_v56 }
 0x2d3   : > { %v5229_v63 = vpop.f32.mrb[20].mxu1  ;;  %1493 = vmatmul.mubr.bf16.gmra.mrb[48].mxu0 %v1263_v41  ;;  %5271 = vmatprep.mubr.bf16.mxu1 %v1267_v62 }
 0x2d4   : > { %v6688_v0 = vadd.f32 %v5229_v63, %v6601_v12  ;;  %v1180_v1 = vpop.f32.mrb[21].mxu1  ;;  %5272 = vmatmul.mubr.bf16.gmra.mrb[48].mxu1 %v1268_v61  ;;  %1502 = vmatprep.mubr.bf16.mxu0 %v6189_v10 }
 0x2d5   : > { %v6692_v2 = vadd.f32 %v6601_v12, %v1180_v1  ;;  %v5230_v3 = vpop.f32.mrb[22].mxu1 }
 0x2d6   : > { %8092 = vst [vmem:[#allocation45_spill] sm:$0xff] %v6688_v0  ;;  %v6695_v4 = vadd.f32 %v5230_v3, %v6601_v12  ;;  %v1183_v5 = vpop.f32.mrb[23].mxu1 }
 0x2d7   : > { %8093 = vst [vmem:[#allocation46_spill] sm:$0xff] %v6692_v2  ;;  %v6698_v6 = vadd.f32 %v6601_v12, %v1183_v5 }
 0x2d8   : > { %8094 = vst [vmem:[#allocation47_spill] sm:$0xff] %v6695_v4  ;;  %v1270_v7 = vpack.c.bf16 %v6695_v4, %v6688_v0 }
 0x2d9   : > { %8095 = vst [vmem:[#allocation48_spill] sm:$0xff] %v6698_v6  ;;  %v1269_v8 = vpack.c.bf16 %v6698_v6, %v6692_v2 }
 0x2db   : > { %v5233_v9 = vpop.f32.mrb[24].mxu1  ;;  %1503 = vmatmul.mubr.bf16.gmra.mrb[52].mxu0 %v1264_v40  ;;  %5275 = vmatprep.mubr.bf16.mxu1 %v1269_v8 }
 0x2dc   : > { %v6705_v47 = vadd.f32 %v5233_v9, %v6601_v12  ;;  %v1196_v11 = vpop.f32.mrb[25].mxu1  ;;  %5276 = vmatmul.mubr.bf16.gmra.mrb[52].mxu1 %v1270_v7  ;;  %1512 = vmatprep.mubr.bf16.mxu0 %v6189_v10 }
 0x2dd   : > { %v6709_v13 = vadd.f32 %v6601_v12, %v1196_v11  ;;  %v5234_v14 = vpop.f32.mrb[26].mxu1 }
 0x2de   : > { %8096 = vst [vmem:[#allocation49_spill] sm:$0xff] %v6705_v47  ;;  %v6712_v16 = vadd.f32 %v5234_v14, %v6601_v12  ;;  %v1199_v20 = vpop.f32.mrb[27].mxu1 }
 0x2df   : > { %8097 = vst [vmem:[#allocation50_spill] sm:$0xff] %v6709_v13  ;;  %v6715_v21 = vadd.f32 %v6601_v12, %v1199_v20 }
 0x2e0   : > { %8098 = vst [vmem:[#allocation51_spill] sm:$0xff] %v6712_v16  ;;  %v1272_v22 = vpack.c.bf16 %v6712_v16, %v6705_v47 }
 0x2e1   : > { %8099 = vst [vmem:[#allocation52_spill] sm:$0xff] %v6715_v21  ;;  %v1271_v23 = vpack.c.bf16 %v6715_v21, %v6709_v13 }
 0x2e3   : > { %v5237_v25 = vpop.f32.mrb[28].mxu1  ;;  %1513 = vmatmul.mubr.bf16.gmra.mrb[56].mxu0 %v1265_v52  ;;  %5279 = vmatprep.mubr.bf16.mxu1 %v1271_v23 }
 0x2e4   : > { %v6722_v28 = vadd.f32 %v5237_v25, %v6601_v12  ;;  %v1212_v30 = vpop.f32.mrb[29].mxu1  ;;  %5280 = vmatmul.mubr.bf16.gmra.mrb[56].mxu1 %v1272_v22  ;;  %1522 = vmatprep.mubr.bf16.mxu0 %v6189_v10 }
 0x2e5   : > { %v6726_v31 = vadd.f32 %v6601_v12, %v1212_v30  ;;  %v5238_v32 = vpop.f32.mrb[30].mxu1 }
 0x2e6   : > { %8100 = vst [vmem:[#allocation53_spill] sm:$0xff] %v6722_v28  ;;  %v6729_v34 = vadd.f32 %v5238_v32, %v6601_v12  ;;  %v1215_v36 = vpop.f32.mrb[31].mxu1 }
 0x2e7   : > { %8101 = vst [vmem:[#allocation54_spill] sm:$0xff] %v6726_v31  ;;  %v6732_v38 = vadd.f32 %v6601_v12, %v1215_v36  ;;  %v1277_v12 = vlaneseq }
 0x2e8   : > { %8102 = vst [vmem:[#allocation55_spill] sm:$0xff] %v6729_v34  ;;  %v1274_v40 = vpack.c.bf16 %v6729_v34, %v6722_v28 }
 0x2e9   : > { %8103 = vst [vmem:[#allocation56_spill] sm:$0xff] %v6732_v38  ;;  %v1273_v41 = vpack.c.bf16 %v6732_v38, %v6726_v31  ;;  %v1278_v42 = vshrl.u32 %v1277_v12, 7 }
 0x2eb   : > { %1523 = vmatmul.mubr.bf16.gmra.mrb[60].mxu0 %v1266_v51  ;;  %5283 = vmatprep.mubr.bf16.mxu1 %v1273_v41  ;;  %v1279_v44 = vsub.s32 0, %v1278_v42  ;;  %v1283_v49 = vsub.s32 1, %v1278_v42  ;;  %v1287_v51 = vsub.s32 2, %v1278_v42 }
 0x2ec   : > { %5284 = vmatmul.mubr.bf16.gmra.mrb[60].mxu1 %v1274_v40  ;;  %1532 = vmatprep.mubr.bf16.mxu0 %v6189_v10 }
 0x2ed   : > { %v6754_v52 = vrot.slane %v1275_v46, %v1279_v44  ;;  %v6758_v55 = vrot.slane %v1275_v46, %v1287_v51 }
 0x2f3   : > { %1533 = vmatmul.mubr.bf16.gmra.mrb[64].mxu0 %v1267_v62 }
 0x2f4   : > { %1542 = vmatprep.mubr.bf16.mxu0 %v6189_v10 }
 0x2fb   : > { %1543 = vmatmul.mubr.bf16.gmra.mrb[68].mxu0 %v1268_v61 }
 0x2fc   : > { %1552 = vmatprep.mubr.bf16.mxu0 %v6189_v10 }
 0x303   : > { %1553 = vmatmul.mubr.bf16.gmra.mrb[72].mxu0 %v1269_v8 }
 0x304   : > { %1562 = vmatprep.mubr.bf16.mxu0 %v6189_v10 }
 0x30b   : > { %1563 = vmatmul.mubr.bf16.gmra.mrb[76].mxu0 %v1270_v7 }
 0x30c   : > { %1572 = vmatprep.mubr.bf16.mxu0 %v6189_v10 }
 0x313   : > { %1573 = vmatmul.mubr.bf16.gmra.mrb[80].mxu0 %v1271_v23 }
 0x314   : > { %1582 = vmatprep.mubr.bf16.mxu0 %v6189_v10 }
 0x31b   : > { %1583 = vmatmul.mubr.bf16.gmra.mrb[84].mxu0 %v1272_v22 }
 0x31c   : > { %1592 = vmatprep.mubr.bf16.mxu0 %v6189_v10 }
 0x323   : > { %1593 = vmatmul.mubr.bf16.gmra.mrb[88].mxu0 %v1273_v41 }
 0x324   : > { %1602 = vmatprep.mubr.bf16.mxu0 %v6189_v10  ;;  %v6756_v10 = vrot.slane %v1275_v46, %v1283_v49 }
 0x32b   : > { %1603 = vmatmul.mubr.bf16.gmra.mrb[92].mxu0 %v1274_v40 }
 0x386   : > { %v1454_v53 = vpop.f32.mrb[32].mxu0 }
 0x387   : > { %v1456_v57 = vpop.f32.mrb[33].mxu0  ;;  %v5257_v59 = vpop.f32.mrb[32].mxu1  ;;  %v1455_v63 = vadd.f32 %v1454_v53, %v6754_v52 }
 0x388   : > { %v1458_v61 = vpop.f32.mrb[34].mxu0  ;;  %v1647_v62 = vpop.f32.mrb[33].mxu1  ;;  %v6763_v7 = vadd.f32 %v1456_v57, %v6756_v10  ;;  %v6766_v8 = vadd.f32 %v5257_v59, %v6758_v55 }
 0x389   : > { %v1459_v1 = vadd.f32 %v1458_v61, %v6754_v52  ;;  %v1460_v3 = vpop.f32.mrb[35].mxu0  ;;  %v5258_v5 = vpop.f32.mrb[34].mxu1  ;;  %v6777_v22 = vadd.f32 %v1647_v62, %v6758_v55 }
 0x38a   : > { %v6769_v9 = vadd.f32 %v1460_v3, %v6756_v10  ;;  %v6772_v11 = vadd.f32 %v5258_v5, %v6758_v55  ;;  %v1650_v14 = vpop.f32.mrb[35].mxu1 }
 0x38b   : > { %v6774_v20 = vpack.c.bf16 %v1459_v1, %v1455_v63  ;;  %v6780_v23 = vadd.f32 %v1650_v14, %v6758_v55 }
 0x38d   : > { %4879 = vmatprep.mubr.bf16.mxu1 %v6774_v20 }
 0x38e   : > { %v1464_v36 = vpop.f32.mrb[36].mxu0 }
 0x38f   : > { %v1466_v40 = vpop.f32.mrb[37].mxu0  ;;  %v5261_v41 = vpop.f32.mrb[36].mxu1  ;;  %v1465_v44 = vadd.f32 %v1464_v36, %v6754_v52 }
 0x390   : > { %v1468_v12 = vpop.f32.mrb[38].mxu0  ;;  %v1663_v42 = vpop.f32.mrb[37].mxu1  ;;  %v6792_v53 = vadd.f32 %v1466_v40, %v6756_v10  ;;  %v6795_v57 = vadd.f32 %v5261_v41, %v6758_v55 }
 0x391   : > { %v1469_v46 = vadd.f32 %v1468_v12, %v6754_v52  ;;  %v1470_v49 = vpop.f32.mrb[39].mxu0  ;;  %v5262_v51 = vpop.f32.mrb[38].mxu1  ;;  %v6806_v1 = vadd.f32 %v1663_v42, %v6758_v55 }
 0x392   : > { %v6798_v59 = vadd.f32 %v1470_v49, %v6756_v10  ;;  %v6801_v61 = vadd.f32 %v5262_v51, %v6758_v55  ;;  %v1666_v62 = vpop.f32.mrb[39].mxu1 }
 0x393   : > { %v6803_v63 = vpack.c.bf16 %v1469_v46, %v1465_v44  ;;  %v6809_v3 = vadd.f32 %v1666_v62, %v6758_v55 }
 0x396   : > { %v1474_v40 = vpop.f32.mrb[40].mxu0 }
 0x397   : > { %v1476_v41 = vpop.f32.mrb[41].mxu0  ;;  %v5265_v12 = vpop.f32.mrb[40].mxu1  ;;  %v1475_v49 = vadd.f32 %v1474_v40, %v6754_v52 }
 0x398   : > { %v1478_v44 = vpop.f32.mrb[42].mxu0  ;;  %v6818_v46 = vadd.f32 %v5265_v12, %v6758_v55  ;;  %v1679_v42 = vpop.f32.mrb[41].mxu1  ;;  %v6826_v14 = vadd.f32 %v1476_v41, %v6756_v10 }
 0x399   : > { %v1479_v51 = vadd.f32 %v1478_v44, %v6754_v52  ;;  %v1480_v62 = vpop.f32.mrb[43].mxu0  ;;  %v6823_v5 = vadd.f32 %v1679_v42, %v6758_v55  ;;  %v5266_v25 = vpop.f32.mrb[42].mxu1 }
 0x39a   : > { %v6829_v36 = vadd.f32 %v1480_v62, %v6756_v10  ;;  %v6832_v30 = vadd.f32 %v5266_v25, %v6758_v55  ;;  %v1682_v12 = vpop.f32.mrb[43].mxu1 }
 0x39b   : > { %v6834_v32 = vpack.c.bf16 %v1479_v51, %v1475_v49  ;;  %v6837_v40 = vadd.f32 %v1682_v12, %v6758_v55 }
 0x39e   : > { %v1484_v62 = vpop.f32.mrb[44].mxu0 }
 0x39f   : > { %v1486_v34 = vpop.f32.mrb[45].mxu0  ;;  %v5269_v28 = vpop.f32.mrb[44].mxu1  ;;  %v1485_v51 = vadd.f32 %v1484_v62, %v6754_v52 }
 0x3a0   : > { %v1488_v25 = vpop.f32.mrb[46].mxu0  ;;  %v6846_v38 = vadd.f32 %v5269_v28, %v6758_v55  ;;  %v1695_v49 = vpop.f32.mrb[45].mxu1  ;;  %v6854_v16 = vadd.f32 %v1486_v34, %v6756_v10 }
 0x3a1   : > { %v1489_v12 = vadd.f32 %v1488_v25, %v6754_v52  ;;  %v1490_v31 = vpop.f32.mrb[47].mxu0  ;;  %v6851_v44 = vadd.f32 %v1695_v49, %v6758_v55  ;;  %v5270_v42 = vpop.f32.mrb[46].mxu1 }
 0x3a2   : > { %v6857_v41 = vadd.f32 %v1490_v31, %v6756_v10  ;;  %v6860_v47 = vadd.f32 %v5270_v42, %v6758_v55  ;;  %v1698_v28 = vpop.f32.mrb[47].mxu1 }
 0x3a3   : > { %v6862_v21 = vpack.c.bf16 %v1489_v12, %v1485_v51  ;;  %v6865_v62 = vadd.f32 %v1698_v28, %v6758_v55 }
 0x3a6   : > { %v1494_v31 = vpop.f32.mrb[48].mxu0 }
 0x3a7   : > { %v1496_v13 = vpop.f32.mrb[49].mxu0  ;;  %v5273_v4 = vpop.f32.mrb[48].mxu1  ;;  %v1495_v12 = vadd.f32 %v1494_v31, %v6754_v52 }
 0x3a8   : > { %v1720_v42 = vadd.f32 %v5273_v4, %v6758_v55  ;;  %v1498_v0 = vpop.f32.mrb[50].mxu0  ;;  %v1711_v51 = vpop.f32.mrb[49].mxu1  ;;  %v6878_v49 = vadd.f32 %v1496_v13, %v6756_v10 }
 0x3a9   : > { %v1499_v28 = vadd.f32 %v1498_v0, %v6754_v52  ;;  %v1712_v6 = vadd.f32 %v1711_v51, %v6758_v55  ;;  %v1500_v25 = vpop.f32.mrb[51].mxu0  ;;  %v5274_v2 = vpop.f32.mrb[50].mxu1 }
 0x3aa   : > { %v6881_v34 = vadd.f32 %v1500_v25, %v6756_v10  ;;  %v1723_v58 = vadd.f32 %v5274_v2, %v6758_v55  ;;  %v1714_v54 = vpop.f32.mrb[51].mxu1  ;;  %v8104_v2 = vpack.c.bf16 %v6780_v23, %v6777_v22 }
 0x3ab   : > { %v6884_v4 = vpack.c.bf16 %v1499_v28, %v1495_v12  ;;  %v1715_v60 = vadd.f32 %v1714_v54, %v6758_v55 }
 0x3ac   : > { %v2584_v31 = vpack.c.bf16 %v1723_v58, %v1720_v42 }
 0x3ad   : > { %v2583_v51 = vpack.c.bf16 %v1715_v60, %v1712_v6 }
 0x3ae   : > { %v1504_v56 = vpop.f32.mrb[52].mxu0 }
 0x3af   : > { %v1506_v48 = vpop.f32.mrb[53].mxu0  ;;  %v5277_v43 = vpop.f32.mrb[52].mxu1  ;;  %4911 = vmatprep.subr.bf16.mxu0 %v2583_v51  ;;  %v1505_v12 = vadd.f32 %v1504_v56, %v6754_v52 }
 0x3b0   : > { %v1736_v13 = vadd.f32 %v5277_v43, %v6758_v55  ;;  %v1508_v25 = vpop.f32.mrb[54].mxu0  ;;  %v1727_v50 = vpop.f32.mrb[53].mxu1  ;;  %4912 = vmatpush3.bf16.msra.mxu0 %v8104_v2  ;;  %v6897_v6 = vadd.f32 %v1506_v48, %v6756_v10 }
 0x3b1   : > { %v1509_v54 = vadd.f32 %v1508_v25, %v6754_v52  ;;  %v1728_v28 = vadd.f32 %v1727_v50, %v6758_v55  ;;  %v1510_v58 = vpop.f32.mrb[55].mxu0  ;;  %v5278_v60 = vpop.f32.mrb[54].mxu1  ;;  %4913 = vmatprep.subr.bf16.mxu0 %v2584_v31  ;;  %v8105_v31 = vpack.c.bf16 %v6772_v11, %v6766_v8 }
 0x3b2   : > { %v6900_v43 = vadd.f32 %v1510_v58, %v6756_v10  ;;  %v1739_v42 = vadd.f32 %v5278_v60, %v6758_v55  ;;  %v1730_v51 = vpop.f32.mrb[55].mxu1 }
 0x3b3   : > { %v6903_v22 = vpack.c.bf16 %v1509_v54, %v1505_v12  ;;  %v1731_v56 = vadd.f32 %v1730_v51, %v6758_v55  ;;  %v8106_v54 = vpack.c.bf16 %v6809_v3, %v6806_v1 }
 0x3b4   : > { %v1795_v23 = vpack.c.bf16 %v6900_v43, %v6897_v6  ;;  %v2586_v50 = vpack.c.bf16 %v1739_v42, %v1736_v13  ;;  %4914 = vmatpush3.bf16.msra.mxu0 %v8105_v31 }
 0x3b5   : > { %v2585_v48 = vpack.c.bf16 %v1731_v56, %v1728_v28 }
 0x3b6   : > { %v1514_v25 = vpop.f32.mrb[56].mxu0 }
 0x3b7   : > { %v1516_v2 = vpop.f32.mrb[57].mxu0  ;;  %v5281_v58 = vpop.f32.mrb[56].mxu1  ;;  %4915 = vmatprep.subr.bf16.mxu0 %v2585_v48  ;;  %v1515_v51 = vadd.f32 %v1514_v25, %v6754_v52 }
 0x3b8   : > { %v1752_v60 = vadd.f32 %v5281_v58, %v6758_v55  ;;  %v1518_v0 = vpop.f32.mrb[58].mxu0  ;;  %v1743_v12 = vpop.f32.mrb[57].mxu1  ;;  %4916 = vmatpush3.bf16.msra.mxu0 %v8106_v54  ;;  %v6919_v42 = vadd.f32 %v1516_v2, %v6756_v10 }
 0x3b9   : > { %v1519_v13 = vadd.f32 %v1518_v0, %v6754_v52  ;;  %v1744_v8 = vadd.f32 %v1743_v12, %v6758_v55  ;;  %v1520_v11 = vpop.f32.mrb[59].mxu0  ;;  %v5282_v28 = vpop.f32.mrb[58].mxu1  ;;  %4917 = vmatprep.subr.bf16.mxu0 %v2586_v50  ;;  %v8107_v50 = vpack.c.bf16 %v6801_v61, %v6795_v57 }
 0x3ba   : > { %v6922_v56 = vadd.f32 %v1520_v11, %v6756_v10  ;;  %v1755_v31 = vadd.f32 %v5282_v28, %v6758_v55  ;;  %v1746_v48 = vpop.f32.mrb[59].mxu1 }
 0x3bb   : > { %v6925_v1 = vpack.c.bf16 %v1519_v13, %v1515_v51  ;;  %v1747_v3 = vadd.f32 %v1746_v48, %v6758_v55  ;;  %v8108_v13 = vpack.c.bf16 %v6837_v40, %v6823_v5 }
 0x3bc   : > { %v1796_v0 = vpack.c.bf16 %v6922_v56, %v6919_v42  ;;  %v2588_v25 = vpack.c.bf16 %v1755_v31, %v1752_v60  ;;  %4918 = vmatpush3.bf16.msra.mxu0 %v8107_v50 }
 0x3bd   : > { %v2587_v2 = vpack.c.bf16 %v1747_v3, %v1744_v8 }
 0x3be   : > { %v1524_v58 = vpop.f32.mrb[60].mxu0 }
 0x3bf   : > { %v1526_v12 = vpop.f32.mrb[61].mxu0  ;;  %v5285_v54 = vpop.f32.mrb[60].mxu1  ;;  %4919 = vmatprep.subr.bf16.mxu0 %v2587_v2  ;;  %v1525_v48 = vadd.f32 %v1524_v58, %v6754_v52 }
 0x3c0   : > { %v1768_v11 = vadd.f32 %v5285_v54, %v6758_v55  ;;  %v1528_v28 = vpop.f32.mrb[62].mxu0  ;;  %v1759_v51 = vpop.f32.mrb[61].mxu1  ;;  %4920 = vmatpush3.bf16.msra.mxu0 %v8108_v13  ;;  %v6941_v31 = vadd.f32 %v1526_v12, %v6756_v10 }
 0x3c1   : > { %v1529_v60 = vadd.f32 %v1528_v28, %v6754_v52  ;;  %v1760_v57 = vadd.f32 %v1759_v51, %v6758_v55  ;;  %v1530_v61 = vpop.f32.mrb[63].mxu0  ;;  %v5286_v8 = vpop.f32.mrb[62].mxu1  ;;  %4921 = vmatprep.subr.bf16.mxu0 %v2588_v25  ;;  %v8109_v25 = vpack.c.bf16 %v6832_v30, %v6818_v46 }
 0x3c2   : > { %v6944_v3 = vadd.f32 %v1530_v61, %v6756_v10  ;;  %v1771_v50 = vadd.f32 %v5286_v8, %v6758_v55  ;;  %v1762_v2 = vpop.f32.mrb[63].mxu1  ;;  %v8110_v61 = vpack.c.bf16 %v6865_v62, %v6851_v44  ;;  %v8111_v8 = vpack.c.bf16 %v6860_v47, %v6846_v38 }
 0x3c3   : > { %v6947_v5 = vpack.c.bf16 %v1529_v60, %v1525_v48  ;;  %v1763_v40 = vadd.f32 %v1762_v2, %v6758_v55  ;;  %v8112_v62 = vpack.c.bf16 %v6769_v9, %v6763_v7  ;;  %v8113_v7 = vpack.c.bf16 %v6798_v59, %v6792_v53 }
 0x3c4   : > { %v1797_v58 = vpack.c.bf16 %v6944_v3, %v6941_v31  ;;  %v2590_v54 = vpack.c.bf16 %v1771_v50, %v1768_v11  ;;  %4922 = vmatpush3.bf16.msra.mxu0 %v8109_v25  ;;  %v8114_v53 = vpack.c.bf16 %v6829_v36, %v6826_v14  ;;  %v8115_v14 = vpack.c.bf16 %v6857_v41, %v6854_v16 }
 0x3c5   : > { %v2589_v12 = vpack.c.bf16 %v1763_v40, %v1760_v57  ;;  %v8116_v16 = vpack.c.bf16 %v6881_v34, %v6878_v49 }
 0x3c6   : > { %v1534_v28 = vpop.f32.mrb[64].mxu0 }
 0x3c7   : > { %v1536_v51 = vpop.f32.mrb[65].mxu0  ;;  %4923 = vmatprep.subr.bf16.mxu0 %v2589_v12  ;;  %v1535_v48 = vadd.f32 %v1534_v28, %v6754_v52 }
 0x3c8   : > { %v1538_v13 = vpop.f32.mrb[66].mxu0  ;;  %4924 = vmatpush3.bf16.msra.mxu0 %v8110_v61  ;;  %v1537_v11 = vadd.f32 %v1536_v51, %v6756_v10 }
 0x3c9   : > { %v1539_v55 = vadd.f32 %v1538_v13, %v6754_v52  ;;  %v1540_v60 = vpop.f32.mrb[67].mxu0  ;;  %4925 = vmatprep.subr.bf16.mxu0 %v2590_v54 }
 0x3ca   : > { %v1541_v30 = vadd.f32 %v1540_v60, %v6756_v10 }
 0x3cb   : > { %v6962_v46 = vpack.c.bf16 %v1539_v55, %v1535_v48 }
 0x3cc   : > { %v1798_v57 = vpack.c.bf16 %v1541_v30, %v1537_v11  ;;  %4926 = vmatpush3.bf16.msra.mxu0 %v8111_v8 }
 0x3ce   : > { %v1544_v50 = vpop.f32.mrb[68].mxu0  ;;  %4863 = vmatprep.subr.bf16.mxu1 %v1798_v57 }
 0x3cf   : > { %v1546_v44 = vpop.f32.mrb[69].mxu0  ;;  %4864 = vmatpush3.bf16.xpose.msra.mxu1 %v8112_v62  ;;  %v1545_v40 = vadd.f32 %v1544_v50, %v6754_v52 }
 0x3d0   : > { %v1548_v2 = vpop.f32.mrb[70].mxu0  ;;  %v1547_v12 = vadd.f32 %v1546_v44, %v6756_v10 }
 0x3d1   : > { %v1549_v54 = vadd.f32 %v1548_v2, %v6754_v52  ;;  %v1550_v25 = vpop.f32.mrb[71].mxu0 }
 0x3d2   : > { %v1551_v28 = vadd.f32 %v1550_v25, %v6756_v10 }
 0x3d3   : > { %v6974_v51 = vpack.c.bf16 %v1549_v54, %v1545_v40 }
 0x3d4   : > { %v1799_v47 = vpack.c.bf16 %v1551_v28, %v1547_v12 }
 0x3d6   : > { %v1554_v38 = vpop.f32.mrb[72].mxu0  ;;  %4865 = vmatprep.subr.bf16.mxu1 %v1799_v47 }
 0x3d7   : > { %v1556_v13 = vpop.f32.mrb[73].mxu0  ;;  %4866 = vmatpush3.bf16.xpose.msra.mxu1 %v8113_v7  ;;  %v1555_v61 = vadd.f32 %v1554_v38, %v6754_v52 }
 0x3d8   : > { %v1558_v9 = vpop.f32.mrb[74].mxu0  ;;  %v1557_v60 = vadd.f32 %v1556_v13, %v6756_v10 }
 0x3d9   : > { %v1559_v48 = vadd.f32 %v1558_v9, %v6754_v52  ;;  %v1560_v55 = vpop.f32.mrb[75].mxu0 }
 0x3da   : > { %v1561_v11 = vadd.f32 %v1560_v55, %v6756_v10 }
 0x3db   : > { %v6983_v30 = vpack.c.bf16 %v1559_v48, %v1555_v61 }
 0x3dc   : > { %v1800_v57 = vpack.c.bf16 %v1561_v11, %v1557_v60 }
 0x3de   : > { %v1564_v8 = vpop.f32.mrb[76].mxu0  ;;  %4867 = vmatprep.subr.bf16.mxu1 %v1800_v57 }
 0x3df   : > { %v1566_v50 = vpop.f32.mrb[77].mxu0  ;;  %4868 = vmatpush3.bf16.xpose.msra.mxu1 %v8114_v53  ;;  %v1565_v44 = vadd.f32 %v1564_v8, %v6754_v52 }
 0x3e0   : > { %v1568_v59 = vpop.f32.mrb[78].mxu0  ;;  %v1567_v40 = vadd.f32 %v1566_v50, %v6756_v10 }
 0x3e1   : > { %v1569_v62 = vadd.f32 %v1568_v59, %v6754_v52  ;;  %v1570_v2 = vpop.f32.mrb[79].mxu0 }
 0x3e2   : > { %v1571_v54 = vadd.f32 %v1570_v2, %v6756_v10 }
 0x3e3   : > { %v6992_v25 = vpack.c.bf16 %v1569_v62, %v1565_v44 }
 0x3e4   : > { %v1801_v12 = vpack.c.bf16 %v1571_v54, %v1567_v40 }
 0x3e6   : > { %v1574_v28 = vpop.f32.mrb[80].mxu0  ;;  %4869 = vmatprep.subr.bf16.mxu1 %v1801_v12 }
 0x3e7   : > { %v1576_v47 = vpop.f32.mrb[81].mxu0  ;;  %4870 = vmatpush3.bf16.xpose.msra.mxu1 %v8115_v14  ;;  %v1575_v38 = vadd.f32 %v1574_v28, %v6754_v52 }
 0x3e8   : > { %v1578_v36 = vpop.f32.mrb[82].mxu0  ;;  %v1577_v9 = vadd.f32 %v1576_v47, %v6756_v10 }
 0x3e9   : > { %v1579_v13 = vadd.f32 %v1578_v36, %v6754_v52  ;;  %v1580_v7 = vpop.f32.mrb[83].mxu0 }
 0x3ea   : > { %v1581_v61 = vadd.f32 %v1580_v7, %v6756_v10 }
 0x3eb   : > { %v7001_v48 = vpack.c.bf16 %v1579_v13, %v1575_v38 }
 0x3ec   : > { %v1802_v55 = vpack.c.bf16 %v1581_v61, %v1577_v9 }
 0x3ee   : > { %v1584_v60 = vpop.f32.mrb[84].mxu0  ;;  %4871 = vmatprep.subr.bf16.mxu1 %v1802_v55 }
 0x3ef   : > { %v1586_v11 = vpop.f32.mrb[85].mxu0  ;;  %4872 = vmatpush3.bf16.xpose.msra.mxu1 %v8116_v16  ;;  %v1585_v57 = vadd.f32 %v1584_v60, %v6754_v52 }
 0x3f0   : > { %v1588_v41 = vpop.f32.mrb[86].mxu0  ;;  %v1587_v53 = vadd.f32 %v1586_v11, %v6756_v10 }
 0x3f1   : > { %v1589_v8 = vadd.f32 %v1588_v41, %v6754_v52  ;;  %v1590_v50 = vpop.f32.mrb[87].mxu0 }
 0x3f2   : > { %v1591_v59 = vadd.f32 %v1590_v50, %v6756_v10 }
 0x3f3   : > { %v1787_v44 = vpack.c.bf16 %v1589_v8, %v1585_v57 }
 0x3f4   : > { %v1803_v62 = vpack.c.bf16 %v1591_v59, %v1587_v53 }
 0x3f6   : > { %v1594_v2 = vpop.f32.mrb[88].mxu0  ;;  %4873 = vmatprep.subr.bf16.mxu1 %v1803_v62 }
 0x3f7   : > { %v1596_v40 = vpop.f32.mrb[89].mxu0  ;;  %4874 = vmatpush3.bf16.xpose.msra.mxu1 %v1795_v23  ;;  %v1595_v34 = vadd.f32 %v1594_v2, %v6754_v52 }
 0x3f8   : > { %v1598_v49 = vpop.f32.mrb[90].mxu0  ;;  %v1597_v28 = vadd.f32 %v1596_v40, %v6756_v10 }
 0x3f9   : > { %v1599_v54 = vadd.f32 %v1598_v49, %v6754_v52  ;;  %v1600_v12 = vpop.f32.mrb[91].mxu0 }
 0x3fa   : > { %v1601_v47 = vadd.f32 %v1600_v12, %v6756_v10 }
 0x3fb   : > { %v1788_v14 = vpack.c.bf16 %v1599_v54, %v1595_v34 }
 0x3fc   : > { %v1804_v36 = vpack.c.bf16 %v1601_v47, %v1597_v28 }
 0x3fe   : > { %v1604_v38 = vpop.f32.mrb[92].mxu0  ;;  %4875 = vmatprep.subr.bf16.mxu1 %v1804_v36 }
 0x3ff   : > { %v1606_v13 = vpop.f32.mrb[93].mxu0  ;;  %4876 = vmatpush3.bf16.xpose.msra.mxu1 %v1796_v0  ;;  %v1605_v43 = vadd.f32 %v1604_v38, %v6754_v52 }
 0x400   : > { %v1608_v6 = vpop.f32.mrb[94].mxu0  ;;  %v1607_v9 = vadd.f32 %v1606_v13, %v6756_v10 }
 0x401   : > { %v1609_v23 = vadd.f32 %v1608_v6, %v6754_v52  ;;  %v1610_v7 = vpop.f32.mrb[95].mxu0 }
 0x402   : > { %v1611_v61 = vadd.f32 %v1610_v7, %v6756_v10 }
 0x403   : > { %v1789_v55 = vpack.c.bf16 %v1609_v23, %v1605_v43 }
 0x404   : > { %v1805_v60 = vpack.c.bf16 %v1611_v61, %v1607_v9 }
 0x406   : > { %4877 = vmatprep.subr.bf16.mxu1 %v1805_v60 }
 0x407   : > { %4878 = vmatpush3.bf16.xpose.msra.mxu1 %v1797_v58 }
 0x40e   : > { %4880 = vmatmul.mubr.bf16.vlgmr.msra.gmra.mrb[64].mxu1 %v6774_v20 }
 0x40f   : > { %4881 = vmatprep.mubr.bf16.mxu1 %v6803_v63 }
 0x416   : > { %4882 = vmatmul.mubr.bf16.gmra.mrb[68].mxu1 %v6803_v63 }
 0x417   : > { %4883 = vmatprep.mubr.bf16.mxu1 %v6834_v32 }
 0x41e   : > { %4884 = vmatmul.mubr.bf16.gmra.mrb[72].mxu1 %v6834_v32 }
 0x41f   : > { %4885 = vmatprep.mubr.bf16.mxu1 %v6862_v21 }
 0x426   : > { %4886 = vmatmul.mubr.bf16.gmra.mrb[76].mxu1 %v6862_v21 }
 0x427   : > { %4887 = vmatprep.mubr.bf16.mxu1 %v6884_v4 }
 0x42e   : > { %4888 = vmatmul.mubr.bf16.gmra.mrb[80].mxu1 %v6884_v4 }
 0x42f   : > { %4889 = vmatprep.mubr.bf16.mxu1 %v6903_v22 }
 0x436   : > { %4890 = vmatmul.mubr.bf16.gmra.mrb[84].mxu1 %v6903_v22 }
 0x437   : > { %4891 = vmatprep.mubr.bf16.mxu1 %v6925_v1 }
 0x43e   : > { %4892 = vmatmul.mubr.bf16.gmra.mrb[88].mxu1 %v6925_v1 }
 0x43f   : > { %4893 = vmatprep.mubr.bf16.mxu1 %v6947_v5 }
 0x446   : > { %4894 = vmatmul.mubr.bf16.gmra.mrb[92].mxu1 %v6947_v5 }
 0x447   : > { %4895 = vmatprep.mubr.bf16.mxu1 %v6962_v46 }
 0x44e   : > { %4896 = vmatmul.mubr.bf16.gmra.mrb[96].mxu1 %v6962_v46 }
 0x44f   : > { %4897 = vmatprep.mubr.bf16.mxu1 %v6974_v51 }
 0x456   : > { %4898 = vmatmul.mubr.bf16.gmra.mrb[100].mxu1 %v6974_v51 }
 0x457   : > { %4899 = vmatprep.mubr.bf16.mxu1 %v6983_v30 }
 0x45e   : > { %4900 = vmatmul.mubr.bf16.gmra.mrb[104].mxu1 %v6983_v30 }
 0x45f   : > { %4901 = vmatprep.mubr.bf16.mxu1 %v6992_v25 }
 0x466   : > { %4902 = vmatmul.mubr.bf16.gmra.mrb[108].mxu1 %v6992_v25 }
 0x467   : > { %4903 = vmatprep.mubr.bf16.mxu1 %v7001_v48 }
 0x46e   : > { %4904 = vmatmul.mubr.bf16.gmra.mrb[112].mxu1 %v7001_v48 }
 0x46f   : > { %4905 = vmatprep.mubr.bf16.mxu1 %v1787_v44 }
 0x476   : > { %4906 = vmatmul.mubr.bf16.gmra.mrb[116].mxu1 %v1787_v44 }
 0x477   : > { %4907 = vmatprep.mubr.bf16.mxu1 %v1788_v14 }
 0x47e   : > { %4908 = vmatmul.mubr.bf16.gmra.mrb[120].mxu1 %v1788_v14 }
 0x47f   : > { %4909 = vmatprep.mubr.bf16.mxu1 %v1789_v55 }
 0x486   : > { %4910 = vmatmul.mubr.bf16.gmra.mrb[124].mxu1 %v1789_v55 }
 0x4e1   : > { %v1840_v21 = vpop.f32.mrb[64].mxu1 }
 0x4e2   : > { %v7052_v52 = vmul.f32 0.088388346, %v1840_v21  ;;  %v1842_v10 = vpop.f32.mrb[65].mxu1 }
 0x4e3   : > { %v7054_v20 = vmul.f32 0.088388346, %v1842_v10  ;;  %v1844_v32 = vpop.f32.mrb[66].mxu1 }
 0x4e4   : > { %v1846_v63 = vpop.f32.mrb[67].mxu1  ;;  %v7056_v4 = vmul.f32 0.088388346, %v1844_v32 }
 0x4e5   : > { %v7058_v22 = vmul.f32 0.088388346, %v1846_v63  ;;  %v2063_v42 = vmax.f32 %v7052_v52, %v7054_v20 }
 0x4e7   : > { %2064 = vmax.xlane.f32.xlu0 %v2063_v42  ;;  %v2066_v1 = vmax.f32 %v7056_v4, %v7058_v22 }
 0x4e9   : > { %v1850_v56 = vpop.f32.mrb[68].mxu1 }
 0x4ea   : > { %v7064_v0 = vmul.f32 0.088388346, %v1850_v56  ;;  %v1852_v31 = vpop.f32.mrb[69].mxu1 }
 0x4eb   : > { %v7066_v3 = vmul.f32 0.088388346, %v1852_v31  ;;  %2067 = vmax.xlane.f32.xlu0 %v2066_v1  ;;  %v1854_v5 = vpop.f32.mrb[70].mxu1 }
 0x4ec   : > { %v1856_v58 = vpop.f32.mrb[71].mxu1  ;;  %v7068_v46 = vmul.f32 0.088388346, %v1854_v5 }
 0x4ed   : > { %v7070_v51 = vmul.f32 0.088388346, %v1856_v58  ;;  %v2069_v30 = vmax.f32 %v7064_v0, %v7066_v3 }
 0x4ef   : > { %2070 = vmax.xlane.f32.xlu1 %v2069_v30  ;;  %v2072_v48 = vmax.f32 %v7068_v46, %v7070_v51 }
 0x4f1   : > { %v1860_v25 = vpop.f32.mrb[72].mxu1 }
 0x4f2   : > { %v7076_v11 = vmul.f32 0.088388346, %v1860_v25  ;;  %v1862_v16 = vpop.f32.mrb[73].mxu1 }
 0x4f3   : > { %v7078_v41 = vmul.f32 0.088388346, %v1862_v16  ;;  %2073 = vmax.xlane.f32.xlu1 %v2072_v48  ;;  %v1864_v57 = vpop.f32.mrb[74].mxu1 }
 0x4f4   : > { %v7080_v8 = vmul.f32 0.088388346, %v1864_v57  ;;  %v1866_v50 = vpop.f32.mrb[75].mxu1 }
 0x4f5   : > { %v7082_v53 = vmul.f32 0.088388346, %v1866_v50  ;;  %v2075_v59 = vmax.f32 %v7076_v11, %v7078_v41 }
 0x4f7   : > { %2076 = vmax.xlane.f32.xlu0 %v2075_v59  ;;  %v2078_v44 = vmax.f32 %v7080_v8, %v7082_v53 }
 0x4f9   : > { %2079 = vmax.xlane.f32.xlu1 %v2078_v44  ;;  %v1870_v62 = vpop.f32.mrb[76].mxu1 }
 0x4fa   : > { %v7088_v2 = vmul.f32 0.088388346, %v1870_v62  ;;  %v1872_v40 = vpop.f32.mrb[77].mxu1 }
 0x4fb   : > { %v7090_v49 = vmul.f32 0.088388346, %v1872_v40  ;;  %v1874_v34 = vpop.f32.mrb[78].mxu1 }
 0x4fc   : > { %v7092_v54 = vmul.f32 0.088388346, %v1874_v34  ;;  %v1876_v12 = vpop.f32.mrb[79].mxu1 }
 0x4fd   : > { %v7094_v28 = vmul.f32 0.088388346, %v1876_v12  ;;  %v2081_v47 = vmax.f32 %v7088_v2, %v7090_v49 }
 0x4ff   : > { %2082 = vmax.xlane.f32.xlu0 %v2081_v47  ;;  %v2084_v14 = vmax.f32 %v7092_v54, %v7094_v28 }
 0x501   : > { %2085 = vmax.xlane.f32.xlu1 %v2084_v14  ;;  %v1880_v36 = vpop.f32.mrb[80].mxu1 }
 0x502   : > { %v7100_v38 = vmul.f32 0.088388346, %v1880_v36  ;;  %v1882_v13 = vpop.f32.mrb[81].mxu1 }
 0x503   : > { %v7102_v6 = vmul.f32 0.088388346, %v1882_v13  ;;  %v1884_v43 = vpop.f32.mrb[82].mxu1 }
 0x504   : > { %v7104_v23 = vmul.f32 0.088388346, %v1884_v43  ;;  %v1886_v7 = vpop.f32.mrb[83].mxu1 }
 0x505   : > { %v7106_v9 = vmul.f32 0.088388346, %v1886_v7  ;;  %v2087_v61 = vmax.f32 %v7100_v38, %v7102_v6 }
 0x507   : > { %2088 = vmax.xlane.f32.xlu0 %v2087_v61  ;;  %v2090_v55 = vmax.f32 %v7104_v23, %v7106_v9 }
 0x509   : > { %2091 = vmax.xlane.f32.xlu1 %v2090_v55  ;;  %v1890_v60 = vpop.f32.mrb[84].mxu1 }
 0x50a   : > { %v7112_v21 = vmul.f32 0.088388346, %v1890_v60  ;;  %v1892_v10 = vpop.f32.mrb[85].mxu1 }
 0x50b   : > { %v7114_v32 = vmul.f32 0.088388346, %v1892_v10  ;;  %v1894_v63 = vpop.f32.mrb[86].mxu1 }
 0x50c   : > { %v7116_v42 = vmul.f32 0.088388346, %v1894_v63  ;;  %v1896_v56 = vpop.f32.mrb[87].mxu1 }
 0x50d   : > { %v7118_v1 = vmul.f32 0.088388346, %v1896_v56  ;;  %v2093_v31 = vmax.f32 %v7112_v21, %v7114_v32 }
 0x50f   : > { %2094 = vmax.xlane.f32.xlu0 %v2093_v31  ;;  %v2096_v5 = vmax.f32 %v7116_v42, %v7118_v1 }
 0x511   : > { %2097 = vmax.xlane.f32.xlu1 %v2096_v5  ;;  %v1900_v58 = vpop.f32.mrb[88].mxu1 }
 0x512   : > { %v7124_v30 = vmul.f32 0.088388346, %v1900_v58  ;;  %v1902_v25 = vpop.f32.mrb[89].mxu1 }
 0x513   : > { %v7126_v48 = vmul.f32 0.088388346, %v1902_v25  ;;  %v1904_v16 = vpop.f32.mrb[90].mxu1 }
 0x514   : > { %v7128_v57 = vmul.f32 0.088388346, %v1904_v16  ;;  %v1906_v50 = vpop.f32.mrb[91].mxu1 }
 0x515   : > { %v7130_v59 = vmul.f32 0.088388346, %v1906_v50  ;;  %v2099_v44 = vmax.f32 %v7124_v30, %v7126_v48 }
 0x517   : > { %2100 = vmax.xlane.f32.xlu0 %v2099_v44  ;;  %v2102_v62 = vmax.f32 %v7128_v57, %v7130_v59 }
 0x519   : > { %2103 = vmax.xlane.f32.xlu1 %v2102_v62  ;;  %v1910_v40 = vpop.f32.mrb[92].mxu1 }
 0x51a   : > { %v7136_v34 = vmul.f32 0.088388346, %v1910_v40  ;;  %v1912_v12 = vpop.f32.mrb[93].mxu1 }
 0x51b   : > { %v7138_v47 = vmul.f32 0.088388346, %v1912_v12  ;;  %v1914_v14 = vpop.f32.mrb[94].mxu1 }
 0x51c   : > { %v7140_v36 = vmul.f32 0.088388346, %v1914_v14  ;;  %v1916_v13 = vpop.f32.mrb[95].mxu1 }
 0x51d   : > { %v7142_v43 = vmul.f32 0.088388346, %v1916_v13  ;;  %v2105_v7 = vmax.f32 %v7136_v34, %v7138_v47 }
 0x51f   : > { %2106 = vmax.xlane.f32.xlu0 %v2105_v7  ;;  %v2108_v61 = vmax.f32 %v7140_v36, %v7142_v43 }
 0x521   : > { %2109 = vmax.xlane.f32.xlu1 %v2108_v61  ;;  %v1920_v55 = vpop.f32.mrb[96].mxu1 }
 0x522   : > { %v7148_v60 = vmul.f32 0.088388346, %v1920_v55  ;;  %v1922_v10 = vpop.f32.mrb[97].mxu1 }
 0x523   : > { %v7150_v63 = vmul.f32 0.088388346, %v1922_v10  ;;  %v1924_v56 = vpop.f32.mrb[98].mxu1 }
 0x524   : > { %v7152_v31 = vmul.f32 0.088388346, %v1924_v56  ;;  %v1926_v5 = vpop.f32.mrb[99].mxu1 }
 0x525   : > { %v7154_v58 = vmul.f32 0.088388346, %v1926_v5  ;;  %v2111_v25 = vmax.f32 %v7148_v60, %v7150_v63 }
 0x527   : > { %8117 = vst [vmem:[#allocation57_spill] sm:$0xff] %v7154_v58  ;;  %2112 = vmax.xlane.f32.xlu0 %v2111_v25  ;;  %v2114_v16 = vmax.f32 %v7152_v31, %v7154_v58 }
 0x529   : > { %2115 = vmax.xlane.f32.xlu1 %v2114_v16  ;;  %v1930_v50 = vpop.f32.mrb[100].mxu1 }
 0x52a   : > { %v7160_v44 = vmul.f32 0.088388346, %v1930_v50  ;;  %v1932_v62 = vpop.f32.mrb[101].mxu1 }
 0x52b   : > { %v7162_v40 = vmul.f32 0.088388346, %v1932_v62  ;;  %v1934_v12 = vpop.f32.mrb[102].mxu1 }
 0x52c   : > { %8118 = vst [vmem:[#allocation58_spill] sm:$0xff] %v7160_v44  ;;  %v7164_v14 = vmul.f32 0.088388346, %v1934_v12  ;;  %v1936_v13 = vpop.f32.mrb[103].mxu1 }
 0x52d   : > { %8119 = vst [vmem:[#allocation59_spill] sm:$0xff] %v7162_v40  ;;  %v7166_v7 = vmul.f32 0.088388346, %v1936_v13  ;;  %v2117_v61 = vmax.f32 %v7160_v44, %v7162_v40 }
 0x52e   : > { %8120 = vst [vmem:[#allocation60_spill] sm:$0xff] %v7164_v14 }
 0x52f   : > { %8121 = vst [vmem:[#allocation61_spill] sm:$0xff] %v7166_v7  ;;  %2118 = vmax.xlane.f32.xlu0 %v2117_v61  ;;  %v2120_v55 = vmax.f32 %v7164_v14, %v7166_v7 }
 0x531   : > { %2121 = vmax.xlane.f32.xlu1 %v2120_v55  ;;  %v1940_v10 = vpop.f32.mrb[104].mxu1 }
 0x532   : > { %v7172_v56 = vmul.f32 0.088388346, %v1940_v10  ;;  %v1942_v5 = vpop.f32.mrb[105].mxu1 }
 0x533   : > { %v7174_v25 = vmul.f32 0.088388346, %v1942_v5  ;;  %v1944_v16 = vpop.f32.mrb[106].mxu1 }
 0x534   : > { %8122 = vst [vmem:[#allocation62_spill] sm:$0xff] %v7172_v56  ;;  %v7176_v50 = vmul.f32 0.088388346, %v1944_v16  ;;  %v1946_v62 = vpop.f32.mrb[107].mxu1 }
 0x535   : > { %8123 = vst [vmem:[#allocation63_spill] sm:$0xff] %v7174_v25  ;;  %v7178_v12 = vmul.f32 0.088388346, %v1946_v62  ;;  %v2123_v13 = vmax.f32 %v7172_v56, %v7174_v25 }
 0x536   : > { %8124 = vst [vmem:[#allocation64_spill] sm:$0xff] %v7176_v50 }
 0x537   : > { %8125 = vst [vmem:[#allocation65_spill] sm:$0xff] %v7178_v12  ;;  %2124 = vmax.xlane.f32.xlu0 %v2123_v13  ;;  %v2126_v61 = vmax.f32 %v7176_v50, %v7178_v12 }
 0x539   : > { %2127 = vmax.xlane.f32.xlu1 %v2126_v61  ;;  %v1950_v55 = vpop.f32.mrb[108].mxu1 }
 0x53a   : > { %v7184_v10 = vmul.f32 0.088388346, %v1950_v55  ;;  %v1952_v45 = vpop.f32.mrb[109].mxu1 }
 0x53b   : > { %v7186_v5 = vmul.f32 0.088388346, %v1952_v45  ;;  %v1954_v37 = vpop.f32.mrb[110].mxu1 }
 0x53c   : > { %8126 = vst [vmem:[#allocation66_spill] sm:$0xff] %v7184_v10  ;;  %v7188_v16 = vmul.f32 0.088388346, %v1954_v37  ;;  %v1956_v33 = vpop.f32.mrb[111].mxu1 }
 0x53d   : > { %8127 = vst [vmem:[#allocation67_spill] sm:$0xff] %v7186_v5  ;;  %v7190_v62 = vmul.f32 0.088388346, %v1956_v33  ;;  %v2129_v39 = vmax.f32 %v7184_v10, %v7186_v5 }
 0x53e   : > { %8128 = vst [vmem:[#allocation68_spill] sm:$0xff] %v7188_v16 }
 0x53f   : > { %8129 = vst [vmem:[#allocation69_spill] sm:$0xff] %v7190_v62  ;;  %2130 = vmax.xlane.f32.xlu0 %v2129_v39  ;;  %v2132_v13 = vmax.f32 %v7188_v16, %v7190_v62 }
 0x541   : > { %2133 = vmax.xlane.f32.xlu1 %v2132_v13  ;;  %v1960_v61 = vpop.f32.mrb[112].mxu1 }
 0x542   : > { %v1962_v55 = vpop.f32.mrb[113].mxu1 }
 0x543   : > { %v1964_v35 = vpop.f32.mrb[114].mxu1 }
 0x544   : > { %v1966_v27 = vpop.f32.mrb[115].mxu1 }
 0x549   : > { %v7196_v45 = vpop.f32.mrb[116].mxu1 }
 0x54a   : > { %v7198_v26 = vpop.f32.mrb[117].mxu1 }
 0x54b   : > { %v7200_v37 = vpop.f32.mrb[118].mxu1 }
 0x54c   : > { %v7202_v33 = vpop.f32.mrb[119].mxu1 }
 0x551   : > { %v7204_v29 = vpop.f32.mrb[120].mxu1 }
 0x552   : > { %v7206_v24 = vpop.f32.mrb[121].mxu1 }
 0x553   : > { %v7208_v39 = vpop.f32.mrb[122].mxu1 }
 0x554   : > { %v7210_v15 = vpop.f32.mrb[123].mxu1 }
 0x559   : > { %v7212_v13 = vpop.f32.mrb[124].mxu1 }
 0x55a   : > { %v7214_v19 = vpop.f32.mrb[125].mxu1 }
 0x55b   : > { %v7216_v18 = vpop.f32.mrb[126].mxu1 }
 0x55c   : > { %v7218_v17 = vpop.f32.mrb[127].mxu1 }
 0x574   : > { %v2065_v62 = vpop.xlane.xlu0 %2064 }
 0x575   : > { %v2159_v16 = vsub.f32 %v7052_v52, %v2065_v62  ;;  %v2160_v5 = vsub.f32 %v7054_v20, %v2065_v62 }
 0x577   : > { %v2223_v10 = vmul.f32 1.442695, %v2159_v16  ;;  %v2225_v12 = vmul.f32 1.442695, %v2160_v5 }
 0x578   : > { %v2068_v50 = vpop.xlane.xlu0 %2067 }
 0x579   : > { %5731 = vpow2.f32 %v2223_v10  ;;  %v2161_v25 = vsub.f32 %v7056_v4, %v2068_v50  ;;  %v2162_v56 = vsub.f32 %v7058_v22, %v2068_v50 }
 0x57a   : > { %5733 = vpow2.f32 %v2225_v12 }
 0x57b   : > { %v2227_v7 = vmul.f32 1.442695, %v2161_v25  ;;  %v2229_v14 = vmul.f32 1.442695, %v2162_v56 }
 0x57c   : > { %v2071_v40 = vpop.xlane.xlu1 %2070 }
 0x57d   : > { %5735 = vpow2.f32 %v2227_v7  ;;  %v2163_v44 = vsub.f32 %v7064_v0, %v2071_v40  ;;  %v2164_v58 = vsub.f32 %v7066_v3, %v2071_v40  ;;  %v7232_v7 = vmul.f32 0.088388346, %v1960_v61 }
 0x57e   : > { %5737 = vpow2.f32 %v2229_v14  ;;  %v7234_v0 = vmul.f32 0.088388346, %v1962_v55  ;;  %v7246_v55 = vmul.f32 0.088388346, %v1964_v35  ;;  %v7262_v35 = vmul.f32 0.088388346, %v7198_v26 }
 0x57f   : > { %v2231_v52 = vmul.f32 1.442695, %v2163_v44  ;;  %v2233_v20 = vmul.f32 1.442695, %v2164_v58 }
 0x580   : > { %v2074_v16 = vpop.xlane.xlu1 %2073 }
 0x581   : > { %5739 = vpow2.f32 %v2231_v52  ;;  %v2165_v10 = vsub.f32 %v7068_v46, %v2074_v16  ;;  %v2166_v4 = vsub.f32 %v7070_v51, %v2074_v16 }
 0x582   : > { %5741 = vpow2.f32 %v2233_v20 }
 0x583   : > { %v7228_v22 = vpop.eup %5731  ;;  %v2235_v25 = vmul.f32 1.442695, %v2165_v10  ;;  %v2237_v56 = vmul.f32 1.442695, %v2166_v4 }
 0x584   : > { %v7230_v50 = vpop.eup %5733  ;;  %v2077_v3 = vpop.xlane.xlu0 %2076 }
 0x585   : > { %5743 = vpow2.f32 %v2235_v25  ;;  %v2167_v58 = vsub.f32 %v7076_v11, %v2077_v3  ;;  %v2168_v44 = vsub.f32 %v7078_v41, %v2077_v3  ;;  %v2351_v46 = vadd.f32 %v7230_v50, %v7228_v22 }
 0x586   : > { %5745 = vpow2.f32 %v2237_v56  ;;  %v2080_v51 = vpop.xlane.xlu1 %2079  ;;  %v7248_v11 = vmul.f32 0.088388346, %v1966_v27  ;;  %v2135_v41 = vmax.f32 %v7232_v7, %v7234_v0  ;;  %v7259_v27 = vmul.f32 0.088388346, %v7196_v45 }
 0x587   : > { %v7240_v40 = vpop.eup %5735  ;;  %v2239_v14 = vmul.f32 1.442695, %v2167_v58  ;;  %v2241_v12 = vmul.f32 1.442695, %v2168_v44  ;;  %v2169_v5 = vsub.f32 %v7080_v8, %v2080_v51  ;;  %v2170_v62 = vsub.f32 %v7082_v53, %v2080_v51  ;;  %2352 = vadd.xlane.f32.xlu0 %v2351_v46 }
 0x588   : > { %v7244_v61 = vpop.eup %5737  ;;  %v2138_v3 = vmax.f32 %v7246_v55, %v7248_v11 }
 0x589   : > { %5747 = vpow2.f32 %v2239_v14  ;;  %v2243_v52 = vmul.f32 1.442695, %v2169_v5  ;;  %v2245_v20 = vmul.f32 1.442695, %v2170_v62  ;;  %v2354_v16 = vadd.f32 %v7244_v61, %v7240_v40 }
 0x58a   : > { %5749 = vpow2.f32 %v2241_v12  ;;  %v7280_v14 = vmul.f32 0.088388346, %v7202_v33  ;;  %v2141_v12 = vmax.f32 %v7259_v27, %v7262_v35  ;;  %v7291_v33 = vmul.f32 0.088388346, %v7204_v29 }
 0x58b   : > { %v7254_v8 = vpop.eup %5739  ;;  %5751 = vpow2.f32 %v2243_v52  ;;  %2355 = vadd.xlane.f32.xlu1 %v2354_v16  ;;  %2136 = vmax.xlane.f32.xlu0 %v2135_v41  ;;  %v7294_v41 = vmul.f32 0.088388346, %v7206_v24 }
 0x58c   : > { %v7256_v53 = vpop.eup %5741  ;;  %5753 = vpow2.f32 %v2245_v20  ;;  %v2083_v10 = vpop.xlane.xlu0 %2082 }
 0x58d   : > { %v2171_v4 = vsub.f32 %v7088_v2, %v2083_v10  ;;  %v2172_v25 = vsub.f32 %v7090_v49, %v2083_v10  ;;  %v2357_v56 = vadd.f32 %v7256_v53, %v7254_v8  ;;  %v7277_v49 = vmul.f32 0.088388346, %v7200_v37 }
 0x58e   : > { %v2086_v58 = vpop.xlane.xlu1 %2085 }
 0x58f   : > { %v7270_v44 = vpop.eup %5743  ;;  %v2247_v45 = vmul.f32 1.442695, %v2171_v4  ;;  %v2249_v46 = vmul.f32 1.442695, %v2172_v25  ;;  %v2173_v26 = vsub.f32 %v7092_v54, %v2086_v58  ;;  %v2174_v51 = vsub.f32 %v7094_v28, %v2086_v58  ;;  %2358 = vadd.xlane.f32.xlu0 %v2357_v56  ;;  %2139 = vmax.xlane.f32.xlu1 %v2138_v3 }
 0x590   : > { %v7274_v2 = vpop.eup %5745  ;;  %v2144_v25 = vmax.f32 %v7277_v49, %v7280_v14 }
 0x591   : > { %5755 = vpow2.f32 %v2247_v45  ;;  %v2251_v5 = vmul.f32 1.442695, %v2173_v26  ;;  %v2253_v62 = vmul.f32 1.442695, %v2174_v51  ;;  %v2360_v54 = vadd.f32 %v7274_v2, %v7270_v44 }
 0x592   : > { %5757 = vpow2.f32 %v2249_v46  ;;  %v2147_v46 = vmax.f32 %v7291_v33, %v7294_v41 }
 0x593   : > { %v7286_v28 = vpop.eup %5747  ;;  %5759 = vpow2.f32 %v2251_v5  ;;  %2361 = vadd.xlane.f32.xlu1 %v2360_v54  ;;  %2142 = vmax.xlane.f32.xlu0 %v2141_v12 }
 0x594   : > { %v7288_v37 = vpop.eup %5749  ;;  %5761 = vpow2.f32 %v2253_v62  ;;  %v2089_v52 = vpop.xlane.xlu0 %2088 }
 0x595   : > { %v7296_v20 = vpop.eup %5751  ;;  %v2175_v16 = vsub.f32 %v7100_v38, %v2089_v52  ;;  %v2176_v10 = vsub.f32 %v7102_v6, %v2089_v52  ;;  %v2363_v4 = vadd.f32 %v7288_v37, %v7286_v28  ;;  %v7309_v38 = vmul.f32 0.088388346, %v7208_v39 }
 0x596   : > { %v7304_v56 = vpop.eup %5753  ;;  %v2092_v29 = vpop.xlane.xlu1 %2091  ;;  %v7312_v6 = vmul.f32 0.088388346, %v7210_v15  ;;  %v7323_v15 = vmul.f32 0.088388346, %v7212_v13  ;;  %v7326_v39 = vmul.f32 0.088388346, %v7214_v19 }
 0x597   : > { %v2255_v3 = vmul.f32 1.442695, %v2175_v16  ;;  %v2257_v24 = vmul.f32 1.442695, %v2176_v10  ;;  %v2177_v58 = vsub.f32 %v7104_v23, %v2092_v29  ;;  %v2178_v45 = vsub.f32 %v7106_v9, %v2092_v29  ;;  %2364 = vadd.xlane.f32.xlu0 %v2363_v4  ;;  %2145 = vmax.xlane.f32.xlu1 %v2144_v25 }
 0x598   : > { %v2366_v12 = vadd.f32 %v7304_v56, %v7296_v20  ;;  %v2150_v10 = vmax.f32 %v7309_v38, %v7312_v6 }
 0x599   : > { %5763 = vpow2.f32 %v2255_v3  ;;  %v2259_v26 = vmul.f32 1.442695, %v2177_v58  ;;  %v2261_v51 = vmul.f32 1.442695, %v2178_v45 }
 0x59a   : > { %5765 = vpow2.f32 %v2257_v24  ;;  %v2153_v24 = vmax.f32 %v7323_v15, %v7326_v39 }
 0x59b   : > { %v7318_v23 = vpop.eup %5755  ;;  %5767 = vpow2.f32 %v2259_v26  ;;  %2367 = vadd.xlane.f32.xlu1 %v2366_v12  ;;  %2148 = vmax.xlane.f32.xlu0 %v2147_v46 }
 0x59c   : > { %v7320_v9 = vpop.eup %5757  ;;  %5769 = vpow2.f32 %v2261_v51  ;;  %v2095_v5 = vpop.xlane.xlu0 %2094 }
 0x59d   : > { %v7328_v62 = vpop.eup %5759  ;;  %v2179_v54 = vsub.f32 %v7112_v21, %v2095_v5  ;;  %v2180_v52 = vsub.f32 %v7114_v32, %v2095_v5  ;;  %v2369_v16 = vadd.f32 %v7320_v9, %v7318_v23  ;;  %v7341_v21 = vmul.f32 0.088388346, %v7216_v18 }
 0x59e   : > { %v7336_v4 = vpop.eup %5761  ;;  %v2098_v13 = vpop.xlane.xlu1 %2097  ;;  %v7344_v32 = vmul.f32 0.088388346, %v7218_v17 }
 0x59f   : > { %v2263_v25 = vmul.f32 1.442695, %v2179_v54  ;;  %v2265_v19 = vmul.f32 1.442695, %v2180_v52  ;;  %v2181_v29 = vsub.f32 %v7116_v42, %v2098_v13  ;;  %v2182_v3 = vsub.f32 %v7118_v1, %v2098_v13  ;;  %2370 = vadd.xlane.f32.xlu0 %v2369_v16  ;;  %2151 = vmax.xlane.f32.xlu1 %v2150_v10 }
 0x5a0   : > { %v2372_v46 = vadd.f32 %v7336_v4, %v7328_v62  ;;  %v2156_v5 = vmax.f32 %v7341_v21, %v7344_v32 }
 0x5a1   : > { %5771 = vpow2.f32 %v2263_v25  ;;  %v2267_v58 = vmul.f32 1.442695, %v2181_v29  ;;  %v2269_v45 = vmul.f32 1.442695, %v2182_v3 }
 0x5a2   : > { %5773 = vpow2.f32 %v2265_v19 }
 0x5a3   : > { %v7350_v42 = vpop.eup %5763  ;;  %5775 = vpow2.f32 %v2267_v58  ;;  %2373 = vadd.xlane.f32.xlu1 %v2372_v46  ;;  %2154 = vmax.xlane.f32.xlu0 %v2153_v24 }
 0x5a4   : > { %v7352_v18 = vpop.eup %5765  ;;  %5777 = vpow2.f32 %v2269_v45  ;;  %v2101_v17 = vpop.xlane.xlu0 %2100 }
 0x5a5   : > { %v7354_v1 = vpop.eup %5767  ;;  %v2183_v26 = vsub.f32 %v7124_v30, %v2101_v17  ;;  %v2184_v51 = vsub.f32 %v7126_v48, %v2101_v17  ;;  %v2375_v12 = vadd.f32 %v7352_v18, %v7350_v42 }
 0x5a6   : > { %v7362_v54 = vpop.eup %5769  ;;  %v2104_v52 = vpop.xlane.xlu1 %2103 }
 0x5a7   : > { %v2271_v16 = vmul.f32 1.442695, %v2183_v26  ;;  %v2273_v10 = vmul.f32 1.442695, %v2184_v51  ;;  %v2185_v13 = vsub.f32 %v7128_v57, %v2104_v52  ;;  %v2186_v25 = vsub.f32 %v7130_v59, %v2104_v52  ;;  %2376 = vadd.xlane.f32.xlu0 %v2375_v12  ;;  %2157 = vmax.xlane.f32.xlu1 %v2156_v5 }
 0x5a8   : > { %v2378_v19 = vadd.f32 %v7362_v54, %v7354_v1 }
 0x5a9   : > { %5779 = vpow2.f32 %v2271_v16  ;;  %v2275_v30 = vmul.f32 1.442695, %v2185_v13  ;;  %v2277_v48 = vmul.f32 1.442695, %v2186_v25 }
 0x5aa   : > { %5781 = vpow2.f32 %v2273_v10 }
 0x5ab   : > { %v7368_v29 = vpop.eup %5771  ;;  %5783 = vpow2.f32 %v2275_v30  ;;  %2379 = vadd.xlane.f32.xlu1 %v2378_v19 }
 0x5ac   : > { %v7370_v3 = vpop.eup %5773  ;;  %5785 = vpow2.f32 %v2277_v48  ;;  %v2107_v24 = vpop.xlane.xlu0 %2106 }
 0x5ad   : > { %v7372_v57 = vpop.eup %5775  ;;  %v2187_v59 = vsub.f32 %v7136_v34, %v2107_v24  ;;  %v2188_v58 = vsub.f32 %v7138_v47, %v2107_v24  ;;  %v2381_v45 = vadd.f32 %v7370_v3, %v7368_v29 }
 0x5ae   : > { %v7378_v46 = vpop.eup %5777  ;;  %v2110_v17 = vpop.xlane.xlu1 %2109 }
 0x5af   : > { %v2279_v26 = vmul.f32 1.442695, %v2187_v59  ;;  %v2281_v51 = vmul.f32 1.442695, %v2188_v58  ;;  %v2189_v12 = vsub.f32 %v7140_v36, %v2110_v17  ;;  %v2190_v5 = vsub.f32 %v7142_v43, %v2110_v17  ;;  %2382 = vadd.xlane.f32.xlu0 %v2381_v45  ;;  %v8130_v45 = vld [vmem:[#allocation57_spill] sm:$0xff] }
 0x5b0   : > { %v2384_v52 = vadd.f32 %v7378_v46, %v7372_v57 }
 0x5b1   : > { %5787 = vpow2.f32 %v2279_v26  ;;  %v2283_v34 = vmul.f32 1.442695, %v2189_v12  ;;  %v2285_v16 = vmul.f32 1.442695, %v2190_v5 }
 0x5b2   : > { %5789 = vpow2.f32 %v2281_v51  ;;  %2385 = vadd.xlane.f32.xlu1 %v2384_v52 }
 0x5b3   : > { %v7384_v47 = vpop.eup %5779  ;;  %5791 = vpow2.f32 %v2283_v34 }
 0x5b4   : > { %v7386_v10 = vpop.eup %5781  ;;  %5793 = vpow2.f32 %v2285_v16  ;;  %v2113_v13 = vpop.xlane.xlu0 %2112  ;;  %v8134_v16 = vld [vmem:[#allocation59_spill] sm:$0xff] }
 0x5b5   : > { %v7388_v25 = vpop.eup %5783  ;;  %v2191_v36 = vsub.f32 %v7148_v60, %v2113_v13  ;;  %v2192_v43 = vsub.f32 %v7150_v63, %v2113_v13  ;;  %v2387_v30 = vadd.f32 %v7386_v10, %v7384_v47 }
 0x5b6   : > { %v7394_v48 = vpop.eup %5785  ;;  %v2116_v19 = vpop.xlane.xlu1 %2115 }
 0x5b7   : > { %v2287_v24 = vmul.f32 1.442695, %v2191_v36  ;;  %v2289_v59 = vmul.f32 1.442695, %v2192_v43  ;;  %v2193_v58 = vsub.f32 %v7152_v31, %v2116_v19  ;;  %v2194_v17 = vsub.f32 %v8130_v45, %v2116_v19  ;;  %2388 = vadd.xlane.f32.xlu0 %v2387_v30  ;;  %v8133_v31 = vld [vmem:[#allocation58_spill] sm:$0xff]  ;;  %v8137_v45 = vld [vmem:[#allocation61_spill] sm:$0xff] }
 0x5b8   : > { %v2390_v26 = vadd.f32 %v7394_v48, %v7388_v25 }
 0x5b9   : > { %5795 = vpow2.f32 %v2287_v24  ;;  %v2291_v60 = vmul.f32 1.442695, %v2193_v58  ;;  %v2293_v51 = vmul.f32 1.442695, %v2194_v17 }
 0x5ba   : > { %5797 = vpow2.f32 %v2289_v59  ;;  %2391 = vadd.xlane.f32.xlu1 %v2390_v26  ;;  %v8136_v59 = vld [vmem:[#allocation60_spill] sm:$0xff] }
 0x5bb   : > { %v7400_v63 = vpop.eup %5787  ;;  %5799 = vpow2.f32 %v2291_v60 }
 0x5bc   : > { %8131 = vst [vmem:[#allocation57_spill] sm:$0xff] %v7400_v63  ;;  %v7402_v12 = vpop.eup %5789  ;;  %5801 = vpow2.f32 %v2293_v51  ;;  %v2119_v5 = vpop.xlane.xlu0 %2118 }
 0x5bd   : > { %v7404_v52 = vpop.eup %5791  ;;  %v2195_v34 = vsub.f32 %v8133_v31, %v2119_v5  ;;  %v2196_v13 = vsub.f32 %v8134_v16, %v2119_v5  ;;  %v2393_v36 = vadd.f32 %v7402_v12, %v7400_v63  ;;  %v8145_v63 = vld [vmem:[#allocation65_spill] sm:$0xff] }
 0x5be   : > { %8132 = vst [vmem:[#allocation70_spill] sm:$0xff] %v7404_v52  ;;  %v7410_v43 = vpop.eup %5793  ;;  %v2122_v30 = vpop.xlane.xlu1 %2121 }
 0x5bf   : > { %8135 = vst [vmem:[#allocation58_spill] sm:$0xff] %v7410_v43  ;;  %v2295_v19 = vmul.f32 1.442695, %v2195_v34  ;;  %v2297_v24 = vmul.f32 1.442695, %v2196_v13  ;;  %v2197_v58 = vsub.f32 %v8136_v59, %v2122_v30  ;;  %v2198_v17 = vsub.f32 %v8137_v45, %v2122_v30  ;;  %2394 = vadd.xlane.f32.xlu0 %v2393_v36  ;;  %v8141_v13 = vld [vmem:[#allocation62_spill] sm:$0xff] }
 0x5c0   : > { %v2396_v26 = vadd.f32 %v7410_v43, %v7404_v52  ;;  %v8142_v36 = vld [vmem:[#allocation63_spill] sm:$0xff] }
 0x5c1   : > { %5803 = vpow2.f32 %v2295_v19  ;;  %v2299_v60 = vmul.f32 1.442695, %v2197_v58  ;;  %v2301_v51 = vmul.f32 1.442695, %v2198_v17 }
 0x5c2   : > { %5805 = vpow2.f32 %v2297_v24  ;;  %2397 = vadd.xlane.f32.xlu1 %v2396_v26  ;;  %v8144_v26 = vld [vmem:[#allocation64_spill] sm:$0xff] }
 0x5c3   : > { %v7416_v5 = vpop.eup %5795  ;;  %5807 = vpow2.f32 %v2299_v60 }
 0x5c4   : > { %8138 = vst [vmem:[#allocation59_spill] sm:$0xff] %v7416_v5  ;;  %v7418_v31 = vpop.eup %5797  ;;  %5809 = vpow2.f32 %v2301_v51  ;;  %v2125_v34 = vpop.xlane.xlu0 %2124 }
 0x5c5   : > { %8139 = vst [vmem:[#allocation60_spill] sm:$0xff] %v7418_v31  ;;  %v7420_v16 = vpop.eup %5799  ;;  %v2199_v30 = vsub.f32 %v8141_v13, %v2125_v34  ;;  %v2200_v59 = vsub.f32 %v8142_v36, %v2125_v34  ;;  %v2399_v19 = vadd.f32 %v7418_v31, %v7416_v5  ;;  %v8148_v5 = vld [vmem:[#allocation68_spill] sm:$0xff] }
 0x5c6   : > { %8140 = vst [vmem:[#allocation61_spill] sm:$0xff] %v7420_v16  ;;  %v7426_v58 = vpop.eup %5801  ;;  %v2128_v24 = vpop.xlane.xlu1 %2127 }
 0x5c7   : > { %8143 = vst [vmem:[#allocation62_spill] sm:$0xff] %v7426_v58  ;;  %v2303_v45 = vmul.f32 1.442695, %v2199_v30  ;;  %v2305_v17 = vmul.f32 1.442695, %v2200_v59  ;;  %v2201_v60 = vsub.f32 %v8144_v26, %v2128_v24  ;;  %v2202_v52 = vsub.f32 %v8145_v63, %v2128_v24  ;;  %2400 = vadd.xlane.f32.xlu0 %v2399_v19  ;;  %v8146_v26 = vld [vmem:[#allocation66_spill] sm:$0xff] }
 0x5c8   : > { %v2402_v51 = vadd.f32 %v7426_v58, %v7420_v16  ;;  %v8147_v19 = vld [vmem:[#allocation67_spill] sm:$0xff]  ;;  %v8149_v16 = vld [vmem:[#allocation69_spill] sm:$0xff] }
 0x5c9   : > { %5811 = vpow2.f32 %v2303_v45  ;;  %v2307_v13 = vmul.f32 1.442695, %v2201_v60  ;;  %v2309_v43 = vmul.f32 1.442695, %v2202_v52 }
 0x5ca   : > { %5813 = vpow2.f32 %v2305_v17  ;;  %2403 = vadd.xlane.f32.xlu1 %v2402_v51 }
 0x5cb   : > { %v7432_v34 = vpop.eup %5803  ;;  %5815 = vpow2.f32 %v2307_v13 }
 0x5cc   : > { %v7434_v36 = vpop.eup %5805  ;;  %5817 = vpow2.f32 %v2309_v43  ;;  %v2131_v30 = vpop.xlane.xlu0 %2130 }
 0x5cd   : > { %v7436_v59 = vpop.eup %5807  ;;  %v2203_v63 = vsub.f32 %v8146_v26, %v2131_v30  ;;  %v2204_v24 = vsub.f32 %v8147_v19, %v2131_v30  ;;  %v2405_v45 = vadd.f32 %v7434_v36, %v7432_v34 }
 0x5ce   : > { %v7442_v60 = vpop.eup %5809  ;;  %v2134_v52 = vpop.xlane.xlu1 %2133 }
 0x5cf   : > { %v2311_v17 = vmul.f32 1.442695, %v2203_v63  ;;  %v2313_v51 = vmul.f32 1.442695, %v2204_v24  ;;  %v2205_v13 = vsub.f32 %v8148_v5, %v2134_v52  ;;  %v2206_v58 = vsub.f32 %v8149_v16, %v2134_v52  ;;  %2406 = vadd.xlane.f32.xlu0 %v2405_v45 }
 0x5d0   : > { %v2408_v43 = vadd.f32 %v7442_v60, %v7436_v59 }
 0x5d1   : > { %5819 = vpow2.f32 %v2311_v17  ;;  %v2315_v26 = vmul.f32 1.442695, %v2205_v13  ;;  %v2317_v31 = vmul.f32 1.442695, %v2206_v58 }
 0x5d2   : > { %5821 = vpow2.f32 %v2313_v51  ;;  %2409 = vadd.xlane.f32.xlu1 %v2408_v43 }
 0x5d3   : > { %v7448_v30 = vpop.eup %5811  ;;  %5823 = vpow2.f32 %v2315_v26 }
 0x5d4   : > { %8150 = vst [vmem:[#allocation63_spill] sm:$0xff] %v7448_v30  ;;  %v7450_v19 = vpop.eup %5813  ;;  %5825 = vpow2.f32 %v2317_v31 }
 0x5d5   : > { %v7452_v63 = vpop.eup %5815  ;;  %v2411_v5 = vadd.f32 %v7450_v19, %v7448_v30 }
 0x5d6   : > { %8151 = vst [vmem:[#allocation64_spill] sm:$0xff] %v7452_v63  ;;  %v7456_v16 = vpop.eup %5817 }
 0x5d7   : > { %8152 = vst [vmem:[#allocation65_spill] sm:$0xff] %v7456_v16  ;;  %2412 = vadd.xlane.f32.xlu0 %v2411_v5  ;;  %v2414_v24 = vadd.f32 %v7456_v16, %v7452_v63 }
 0x5d9   : > { %2415 = vadd.xlane.f32.xlu1 %v2414_v24 }
 0x5db   : > { %v7460_v58 = vpop.eup %5819 }
 0x5dc   : > { %8153 = vst [vmem:[#allocation66_spill] sm:$0xff] %v7460_v58  ;;  %v7462_v45 = vpop.eup %5821 }
 0x5dd   : > { %8154 = vst [vmem:[#allocation67_spill] sm:$0xff] %v7462_v45  ;;  %v7464_v52 = vpop.eup %5823  ;;  %v2417_v31 = vadd.f32 %v7462_v45, %v7460_v58 }
 0x5de   : > { %8155 = vst [vmem:[#allocation68_spill] sm:$0xff] %v7464_v52  ;;  %v7468_v17 = vpop.eup %5825 }
 0x5df   : > { %8156 = vst [vmem:[#allocation69_spill] sm:$0xff] %v7468_v17  ;;  %2418 = vadd.xlane.f32.xlu0 %v2417_v31  ;;  %v2420_v51 = vadd.f32 %v7468_v17, %v7464_v52 }
 0x5e1   : > { %2421 = vadd.xlane.f32.xlu1 %v2420_v51 }
 0x614   : > { %v2353_v13 = vpop.xlane.xlu0 %2352 }
 0x615   : > { %5827 = vrcp.f32 %v2353_v13 }
 0x618   : > { %v2356_v43 = vpop.xlane.xlu1 %2355  ;;  %v2137_v26 = vpop.xlane.xlu0 %2136 }
 0x619   : > { %5829 = vrcp.f32 %v2356_v43  ;;  %v2207_v5 = vsub.f32 %v7232_v7, %v2137_v26  ;;  %v2208_v24 = vsub.f32 %v7234_v0, %v2137_v26 }
 0x61b   : > { %v2319_v30 = vmul.f32 1.442695, %v2207_v5  ;;  %v2321_v63 = vmul.f32 1.442695, %v2208_v24 }
 0x61c   : > { %v2359_v16 = vpop.xlane.xlu0 %2358  ;;  %v2140_v58 = vpop.xlane.xlu1 %2139 }
 0x61d   : > { %5831 = vpow2.f32 %v2319_v30  ;;  %v2209_v31 = vsub.f32 %v7246_v55, %v2140_v58  ;;  %v2210_v45 = vsub.f32 %v7248_v11, %v2140_v58 }
 0x61e   : > { %5833 = vpow2.f32 %v2321_v63 }
 0x61f   : > { %5835 = vrcp.f32 %v2359_v16  ;;  %v2323_v51 = vmul.f32 1.442695, %v2209_v31  ;;  %v2325_v13 = vmul.f32 1.442695, %v2210_v45  ;;  %v5828_v43 = vpop.eup %5827 }
 0x620   : > { %v2362_v52 = vpop.xlane.xlu1 %2361  ;;  %v2143_v17 = vpop.xlane.xlu0 %2142  ;;  %v2479_v55 = vmul.f32 %v5828_v43, %v7228_v22  ;;  %v2480_v58 = vmul.f32 %v5828_v43, %v7230_v50 }
 0x621   : > { %5837 = vpow2.f32 %v2323_v51  ;;  %v2211_v7 = vsub.f32 %v7259_v27, %v2143_v17  ;;  %v2212_v0 = vsub.f32 %v7262_v35, %v2143_v17 }
 0x622   : > { %5839 = vpow2.f32 %v2325_v13 }
 0x623   : > { %v5830_v26 = vpop.eup %5829  ;;  %5841 = vrcp.f32 %v2362_v52  ;;  %v2327_v30 = vmul.f32 1.442695, %v2211_v7  ;;  %v2329_v5 = vmul.f32 1.442695, %v2212_v0 }
 0x624   : > { %v2481_v11 = vmul.f32 %v5830_v26, %v7240_v40  ;;  %v2365_v63 = vpop.xlane.xlu0 %2364  ;;  %v2146_v16 = vpop.xlane.xlu1 %2145  ;;  %v2482_v45 = vmul.f32 %v5830_v26, %v7244_v61 }
 0x625   : > { %5843 = vpow2.f32 %v2327_v30  ;;  %v2213_v27 = vsub.f32 %v7277_v49, %v2146_v16  ;;  %v2214_v35 = vsub.f32 %v7280_v14, %v2146_v16 }
 0x626   : > { %5845 = vpow2.f32 %v2329_v5  ;;  %v2544_v17 = vpack.c.bf16 %v2482_v45, %v2480_v58  ;;  %v2543_v52 = vpack.c.bf16 %v2481_v11, %v2479_v55 }
 0x627   : > { %v7484_v24 = vpop.eup %5831  ;;  %5847 = vrcp.f32 %v2365_v63  ;;  %v2331_v22 = vmul.f32 1.442695, %v2213_v27  ;;  %v2333_v31 = vmul.f32 1.442695, %v2214_v35 }
 0x628   : > { %v7486_v40 = vpop.eup %5833  ;;  %2623 = vmatprep.mubr.bf16.mxu0 %v2544_v17  ;;  %v2368_v51 = vpop.xlane.xlu1 %2367 }
 0x629   : > { %v2149_v50 = vpop.xlane.xlu0 %2148  ;;  %v5836_v13 = vpop.eup %5835  ;;  %5849 = vpow2.f32 %v2331_v22  ;;  %2624 = vmatmul.mubr.bf16.vlgmr.msra.gmra.mrb[96].mxu0 %v2543_v52  ;;  %v2423_v14 = vadd.f32 %v7486_v40, %v7484_v24 }
 0x62a   : > { %v2215_v61 = vsub.f32 %v7291_v33, %v2149_v50  ;;  %v2216_v49 = vsub.f32 %v7294_v41, %v2149_v50  ;;  %5851 = vpow2.f32 %v2333_v31  ;;  %v2484_v55 = vmul.f32 %v5836_v13, %v7256_v53 }
 0x62b   : > { %v7492_v43 = vpop.eup %5837  ;;  %5853 = vrcp.f32 %v2368_v51  ;;  %2424 = vadd.xlane.f32.xlu0 %v2423_v14  ;;  %v2483_v58 = vmul.f32 %v5836_v13, %v7254_v8 }
 0x62c   : > { %v2335_v7 = vmul.f32 1.442695, %v2215_v61  ;;  %v2337_v0 = vmul.f32 1.442695, %v2216_v49  ;;  %v7494_v26 = vpop.eup %5839  ;;  %v2152_v5 = vpop.xlane.xlu1 %2151 }
 0x62d   : > { %v2371_v30 = vpop.xlane.xlu0 %2370  ;;  %v5842_v33 = vpop.eup %5841  ;;  %v2217_v41 = vsub.f32 %v7309_v38, %v2152_v5  ;;  %v2218_v11 = vsub.f32 %v7312_v6, %v2152_v5  ;;  %v2426_v63 = vadd.f32 %v7494_v26, %v7492_v43 }
 0x62e   : > { %5855 = vpow2.f32 %v2335_v7  ;;  %v2486_v16 = vmul.f32 %v5842_v33, %v7274_v2  ;;  %v2485_v45 = vmul.f32 %v5842_v33, %v7270_v44 }
 0x62f   : > { %5857 = vpow2.f32 %v2337_v0  ;;  %v7504_v27 = vpop.eup %5843  ;;  %v2339_v35 = vmul.f32 1.442695, %v2217_v41  ;;  %v2341_v53 = vmul.f32 1.442695, %v2218_v11  ;;  %2427 = vadd.xlane.f32.xlu1 %v2426_v63 }
 0x630   : > { %v7506_v17 = vpop.eup %5845  ;;  %5859 = vrcp.f32 %v2371_v30  ;;  %v2546_v38 = vpack.c.bf16 %v2486_v16, %v2484_v55  ;;  %v2374_v6 = vpop.xlane.xlu1 %2373  ;;  %v2545_v22 = vpack.c.bf16 %v2485_v45, %v2483_v58 }
 0x631   : > { %v2155_v52 = vpop.xlane.xlu0 %2154  ;;  %v5848_v31 = vpop.eup %5847  ;;  %5861 = vpow2.f32 %v2339_v35  ;;  %v2429_v44 = vadd.f32 %v7506_v17, %v7504_v27 }
 0x632   : > { %v2219_v2 = vsub.f32 %v7323_v15, %v2155_v52  ;;  %v2220_v8 = vsub.f32 %v7326_v39, %v2155_v52  ;;  %5863 = vpow2.f32 %v2341_v53  ;;  %2631 = vmatprep.mubr.bf16.mxu0 %v2546_v38  ;;  %v2488_v14 = vmul.f32 %v5848_v31, %v7288_v37 }
 0x633   : > { %v7512_v51 = vpop.eup %5849  ;;  %5865 = vrcp.f32 %v2374_v6  ;;  %2632 = vmatmul.mubr.bf16.gmra.mrb[100].mxu0 %v2545_v22  ;;  %2430 = vadd.xlane.f32.xlu0 %v2429_v44  ;;  %v2487_v55 = vmul.f32 %v5848_v31, %v7286_v28 }
 0x634   : > { %v2343_v50 = vmul.f32 1.442695, %v2219_v2  ;;  %v2345_v13 = vmul.f32 1.442695, %v2220_v8  ;;  %v7514_v61 = vpop.eup %5851  ;;  %v2158_v49 = vpop.xlane.xlu1 %2157 }
 0x635   : > { %v5854_v15 = vpop.eup %5853  ;;  %v2377_v39 = vpop.xlane.xlu0 %2376  ;;  %v2221_v7 = vsub.f32 %v7341_v21, %v2158_v49  ;;  %v2222_v0 = vsub.f32 %v7344_v32, %v2158_v49  ;;  %v2432_v30 = vadd.f32 %v7514_v61, %v7512_v51 }
 0x636   : > { %5867 = vpow2.f32 %v2343_v50  ;;  %v2490_v5 = vmul.f32 %v5854_v15, %v7304_v56  ;;  %v2489_v33 = vmul.f32 %v5854_v15, %v7296_v20 }
 0x637   : > { %5869 = vpow2.f32 %v2345_v13  ;;  %v2347_v37 = vmul.f32 1.442695, %v2221_v7  ;;  %v2349_v11 = vmul.f32 1.442695, %v2222_v0  ;;  %2433 = vadd.xlane.f32.xlu1 %v2432_v30 }
 0x638   : > { %v7524_v41 = vpop.eup %5855  ;;  %5871 = vrcp.f32 %v2377_v39  ;;  %v2548_v21 = vpack.c.bf16 %v2490_v5, %v2488_v14  ;;  %v2380_v32 = vpop.xlane.xlu1 %2379  ;;  %v2547_v16 = vpack.c.bf16 %v2489_v33, %v2487_v55 }
 0x639   : > { %v7526_v63 = vpop.eup %5857  ;;  %5873 = vpow2.f32 %v2347_v37 }
 0x63a   : > { %v2435_v58 = vadd.f32 %v7526_v63, %v7524_v41  ;;  %v5860_v56 = vpop.eup %5859  ;;  %5875 = vpow2.f32 %v2349_v11  ;;  %2639 = vmatprep.mubr.bf16.mxu0 %v2548_v21 }
 0x63b   : > { %v7530_v28 = vpop.eup %5861  ;;  %5877 = vrcp.f32 %v2380_v32  ;;  %2640 = vmatmul.mubr.bf16.gmra.mrb[104].mxu0 %v2547_v16  ;;  %v2492_v38 = vmul.f32 %v5860_v56, %v7320_v9  ;;  %v2491_v52 = vmul.f32 %v5860_v56, %v7318_v23 }
 0x63c   : > { %2436 = vadd.xlane.f32.xlu0 %v2435_v58  ;;  %v7532_v20 = vpop.eup %5863  ;;  %v2383_v45 = vpop.xlane.xlu0 %2382 }
 0x63d   : > { %v5866_v35 = vpop.eup %5865  ;;  %v2438_v53 = vadd.f32 %v7532_v20, %v7530_v28  ;;  %5879 = vrcp.f32 %v2383_v45 }
 0x63e   : > { %v2494_v6 = vmul.f32 %v5866_v35, %v7336_v4  ;;  %v2493_v22 = vmul.f32 %v5866_v35, %v7328_v62 }
 0x63f   : > { %2439 = vadd.xlane.f32.xlu1 %v2438_v53  ;;  %v2386_v2 = vpop.xlane.xlu1 %2385 }
 0x640   : > { %v7540_v31 = vpop.eup %5867  ;;  %5881 = vrcp.f32 %v2386_v2  ;;  %v2550_v44 = vpack.c.bf16 %v2494_v6, %v2492_v38  ;;  %v2549_v50 = vpack.c.bf16 %v2493_v22, %v2491_v52  ;;  %v8157_v2 = vld [vmem:[#allocation58_spill] sm:$0xff] }
 0x641   : > { %v7542_v8 = vpop.eup %5869 }
 0x642   : > { %v2441_v13 = vadd.f32 %v7542_v8, %v7540_v31  ;;  %v5872_v9 = vpop.eup %5871  ;;  %2647 = vmatprep.mubr.bf16.mxu0 %v2550_v44 }
 0x643   : > { %v7546_v49 = vpop.eup %5873  ;;  %2648 = vmatmul.mubr.bf16.gmra.mrb[108].mxu0 %v2549_v50  ;;  %v2496_v15 = vmul.f32 %v5872_v9, %v7352_v18  ;;  %v2495_v7 = vmul.f32 %v5872_v9, %v7350_v42  ;;  %v8158_v50 = vld [vmem:[#allocation70_spill] sm:$0xff]  ;;  %v8159_v9 = vld [vmem:[#allocation57_spill] sm:$0xff] }
 0x644   : > { %2442 = vadd.xlane.f32.xlu0 %v2441_v13  ;;  %v7548_v23 = vpop.eup %5875  ;;  %v2389_v62 = vpop.xlane.xlu0 %2388 }
 0x645   : > { %v5878_v4 = vpop.eup %5877  ;;  %v2444_v14 = vadd.f32 %v7548_v23, %v7546_v49  ;;  %5883 = vrcp.f32 %v2389_v62 }
 0x646   : > { %v2498_v39 = vmul.f32 %v5878_v4, %v7362_v54  ;;  %v2497_v0 = vmul.f32 %v5878_v4, %v7354_v1 }
 0x647   : > { %2445 = vadd.xlane.f32.xlu1 %v2444_v14  ;;  %v2392_v30 = vpop.xlane.xlu1 %2391  ;;  %v5880_v5 = vpop.eup %5879 }
 0x648   : > { %5885 = vrcp.f32 %v2392_v30  ;;  %v2552_v55 = vpack.c.bf16 %v2498_v39, %v2496_v15  ;;  %v2551_v33 = vpack.c.bf16 %v2497_v0, %v2495_v7  ;;  %v2500_v11 = vmul.f32 %v5880_v5, %v7370_v3  ;;  %v8160_v15 = vld [vmem:[#allocation60_spill] sm:$0xff]  ;;  %v8161_v39 = vld [vmem:[#allocation62_spill] sm:$0xff] }
 0x649   : > { %v2499_v1 = vmul.f32 %v5880_v5, %v7368_v29  ;;  %v8162_v5 = vld [vmem:[#allocation61_spill] sm:$0xff] }
 0x64a   : > { %v5882_v37 = vpop.eup %5881  ;;  %2655 = vmatprep.mubr.bf16.mxu0 %v2552_v55 }
 0x64b   : > { %2656 = vmatmul.mubr.bf16.gmra.mrb[112].mxu0 %v2551_v33  ;;  %v2502_v18 = vmul.f32 %v5882_v37, %v7378_v46  ;;  %v2501_v54 = vmul.f32 %v5882_v37, %v7372_v57  ;;  %v5691_v33 = vld [vmem:[%s6529_s28] sm:$0xff]   ;;  %v5692_v37 = vld [vmem:[%s6529_s28 + $0x8] sm:$0xff]  }
 0x64c   : > { %v2395_v21 = vpop.xlane.xlu0 %2394  ;;  %5287 = vmatprep.subr.bf16.mxu1 %v5691_v33 }
 0x64d   : > { %v2554_v32 = vpack.c.bf16 %v2502_v18, %v2500_v11  ;;  %5887 = vrcp.f32 %v2395_v21  ;;  %v2553_v58 = vpack.c.bf16 %v2501_v54, %v2499_v1  ;;  %v8163_v18 = vld [vmem:[#allocation59_spill] sm:$0xff]  ;;  %5288 = vmatpush3.bf16.msra.mxu1 %v5691_v33 }
 0x64e   : > { %5289 = vmatprep.subr.bf16.mxu1 %v5692_v37 }
 0x64f   : > { %2663 = vmatprep.mubr.bf16.mxu0 %v2554_v32  ;;  %v2398_v42 = vpop.xlane.xlu1 %2397  ;;  %v5884_v16 = vpop.eup %5883 }
 0x650   : > { %5889 = vrcp.f32 %v2398_v42  ;;  %v2504_v45 = vmul.f32 %v5884_v16, %v7386_v10  ;;  %v2503_v38 = vmul.f32 %v5884_v16, %v7384_v47  ;;  %v5693_v42 = vld [vmem:[%s6529_s28 + $0x10] sm:$0xff]  }
 0x651   : > { %5290 = vmatpush3.bf16.msra.mxu1 %v5692_v37 }
 0x652   : > { %v5886_v56 = vpop.eup %5885  ;;  %5291 = vmatprep.subr.bf16.mxu1 %v5693_v42 }
 0x653   : > { %2664 = vmatmul.mubr.bf16.gmra.mrb[116].mxu0 %v2553_v58  ;;  %v2506_v3 = vmul.f32 %v5886_v56, %v7394_v48  ;;  %v2505_v53 = vmul.f32 %v5886_v56, %v7388_v25 }
 0x654   : > { %v2401_v35 = vpop.xlane.xlu0 %2400 }
 0x655   : > { %v2556_v46 = vpack.c.bf16 %v2506_v3, %v2504_v45  ;;  %5891 = vrcp.f32 %v2401_v35  ;;  %v2555_v29 = vpack.c.bf16 %v2505_v53, %v2503_v38  ;;  %v5694_v35 = vld [vmem:[%s6529_s28 + $0x18] sm:$0xff]   ;;  %5292 = vmatpush3.bf16.msra.mxu1 %v5693_v42 }
 0x656   : > { %5293 = vmatprep.subr.bf16.mxu1 %v5694_v35 }
 0x657   : > { %2671 = vmatprep.mubr.bf16.mxu0 %v2556_v46  ;;  %v2404_v57 = vpop.xlane.xlu1 %2403  ;;  %v5888_v6 = vpop.eup %5887 }
 0x658   : > { %5893 = vrcp.f32 %v2404_v57  ;;  %v2508_v22 = vmul.f32 %v5888_v6, %v7402_v12  ;;  %v2507_v47 = vmul.f32 %v5888_v6, %v8159_v9 }
 0x659   : > { %5294 = vmatpush3.bf16.msra.mxu1 %v5694_v35 }
 0x65a   : > { %v5890_v52 = vpop.eup %5889 }
 0x65b   : > { %2672 = vmatmul.mubr.bf16.gmra.mrb[120].mxu0 %v2555_v29  ;;  %v2510_v10 = vmul.f32 %v5890_v52, %v8157_v2  ;;  %v2509_v13 = vmul.f32 %v5890_v52, %v8158_v50  ;;  %v8167_v50 = vld [vmem:[#allocation67_spill] sm:$0xff] }
 0x65c   : > { %v2407_v44 = vpop.xlane.xlu0 %2406 }
 0x65d   : > { %v2558_v48 = vpack.c.bf16 %v2510_v10, %v2508_v22  ;;  %5895 = vrcp.f32 %v2407_v44  ;;  %v2557_v4 = vpack.c.bf16 %v2509_v13, %v2507_v47  ;;  %v8166_v10 = vld [vmem:[#allocation63_spill] sm:$0xff]  ;;  %v8169_v47 = vld [vmem:[#allocation68_spill] sm:$0xff] }
 0x65f   : > { %2679 = vmatprep.mubr.bf16.mxu0 %v2558_v48  ;;  %v2410_v25 = vpop.xlane.xlu1 %2409  ;;  %v5892_v62 = vpop.eup %5891 }
 0x660   : > { %5897 = vrcp.f32 %v2410_v25  ;;  %v2512_v12 = vmul.f32 %v5892_v62, %v8160_v15  ;;  %v2511_v21 = vmul.f32 %v5892_v62, %v8163_v18  ;;  %v8168_v25 = vld [vmem:[#allocation69_spill] sm:$0xff] }
 0x662   : > { %v5894_v14 = vpop.eup %5893 }
 0x663   : > { %2680 = vmatmul.mubr.bf16.gmra.mrb[124].mxu0 %v2557_v4  ;;  %v2514_v7 = vmul.f32 %v5894_v14, %v8161_v39  ;;  %v2513_v55 = vmul.f32 %v5894_v14, %v8162_v5  ;;  %v5695_v4 = vld [vmem:[%s6529_s28 + $0x20] sm:$0xff]   ;;  %v8170_v14 = vld [vmem:[#allocation66_spill] sm:$0xff] }
 0x664   : > { %v2413_v0 = vpop.xlane.xlu0 %2412  ;;  %5295 = vmatprep.subr.bf16.mxu1 %v5695_v4  ;;  %v5696_v39 = vld [vmem:[%s6529_s28 + $0x28] sm:$0xff]  }
 0x665   : > { %5899 = vrcp.f32 %v2413_v0  ;;  %v2560_v30 = vpack.c.bf16 %v2514_v7, %v2512_v12  ;;  %v2559_v54 = vpack.c.bf16 %v2513_v55, %v2511_v21  ;;  %5296 = vmatpush3.bf16.msra.mxu1 %v5695_v4  ;;  %v5697_v7 = vld [vmem:[%s6529_s28 + $0x30] sm:$0xff]   ;;  %v5698_v0 = vld [vmem:[%s6529_s28 + $0x38] sm:$0xff]  }
 0x666   : > { %v2416_v11 = vpop.xlane.xlu1 %2415  ;;  %5297 = vmatprep.subr.bf16.mxu1 %v5696_v39  ;;  %v8173_v4 = vld [vmem:[#allocation28_spill] sm:$0xff] }
 0x667   : > { %2687 = vmatprep.mubr.bf16.mxu0 %v2560_v30  ;;  %5901 = vrcp.f32 %v2416_v11  ;;  %v5896_v32 = vpop.eup %5895 }
 0x668   : > { %v2516_v16 = vmul.f32 %v5896_v32, %v7434_v36  ;;  %v2515_v57 = vmul.f32 %v5896_v32, %v7432_v34 }
 0x669   : > { %5298 = vmatpush3.bf16.msra.mxu1 %v5696_v39 }
 0x66a   : > { %v5898_v1 = vpop.eup %5897  ;;  %5299 = vmatprep.subr.bf16.mxu1 %v5697_v7 }
 0x66b   : > { %2688 = vmatmul.mubr.bf16.gmra.mrb[128].mxu0 %v2559_v54  ;;  %v2518_v58 = vmul.f32 %v5898_v1, %v7442_v60  ;;  %v2517_v3 = vmul.f32 %v5898_v1, %v7436_v59  ;;  %v8164_v60 = vld [vmem:[#allocation65_spill] sm:$0xff]  ;;  %v8165_v59 = vld [vmem:[#allocation64_spill] sm:$0xff] }
 0x66c   : > { %v2419_v56 = vpop.xlane.xlu0 %2418 }
 0x66d   : > { %5903 = vrcp.f32 %v2419_v56  ;;  %v2562_v45 = vpack.c.bf16 %v2518_v58, %v2516_v16  ;;  %v2561_v6 = vpack.c.bf16 %v2517_v3, %v2515_v57  ;;  %5300 = vmatpush3.bf16.msra.mxu1 %v5697_v7 }
 0x66e   : > { %v2422_v46 = vpop.xlane.xlu1 %2421  ;;  %5301 = vmatprep.subr.bf16.mxu1 %v5698_v0 }
 0x66f   : > { %v5900_v53 = vpop.eup %5899  ;;  %2695 = vmatprep.mubr.bf16.mxu0 %v2562_v45  ;;  %5905 = vrcp.f32 %v2422_v46 }
 0x670   : > { %v2520_v36 = vmul.f32 %v5900_v53, %v7450_v19  ;;  %v2519_v44 = vmul.f32 %v5900_v53, %v8166_v10 }
 0x671   : > { %v5902_v38 = vpop.eup %5901  ;;  %5302 = vmatpush3.bf16.msra.mxu1 %v5698_v0 }
 0x672   : > { %v2522_v29 = vmul.f32 %v5902_v38, %v8164_v60  ;;  %v2521_v22 = vmul.f32 %v5902_v38, %v8165_v59 }
 0x673   : > { %2696 = vmatmul.mubr.bf16.gmra.mrb[132].mxu0 %v2561_v6 }
 0x674   : > { %v2564_v52 = vpack.c.bf16 %v2522_v29, %v2520_v36  ;;  %v2563_v48 = vpack.c.bf16 %v2521_v22, %v2519_v44 }
 0x676   : > { %2703 = vmatprep.mubr.bf16.mxu0 %v2564_v52 }
 0x677   : > { %v5904_v2 = vpop.eup %5903 }
 0x678   : > { %v2524_v13 = vmul.f32 %v5904_v2, %v8167_v50  ;;  %v2523_v15 = vmul.f32 %v5904_v2, %v8170_v14  ;;  %v8171_v50 = vld [vmem:[#allocation26_spill] sm:$0xff] }
 0x679   : > { %v5906_v34 = vpop.eup %5905 }
 0x67a   : > { %v2526_v19 = vmul.f32 %v5906_v34, %v8168_v25  ;;  %v2525_v62 = vmul.f32 %v5906_v34, %v8169_v47  ;;  %v8172_v25 = vld [vmem:[#allocation27_spill] sm:$0xff] }
 0x67b   : > { %2704 = vmatmul.mubr.bf16.gmra.mrb[136].mxu0 %v2563_v48 }
 0x67c   : > { %v2566_v9 = vpack.c.bf16 %v2526_v19, %v2524_v13  ;;  %v2565_v12 = vpack.c.bf16 %v2525_v62, %v2523_v15  ;;  %v8174_v15 = vld [vmem:[#allocation25_spill] sm:$0xff] }
 0x67e   : > { %2711 = vmatprep.mubr.bf16.mxu0 %v2566_v9 }
 0x683   : > { %2712 = vmatmul.mubr.bf16.gmra.mrb[140].mxu0 %v2565_v12 }
 0x6b8   : > { %v2425_v30 = vpop.xlane.xlu0 %2424 }
 0x6b9   : > { %5907 = vrcp.f32 %v2425_v30 }
 0x6bc   : > { %v2428_v5 = vpop.xlane.xlu1 %2427 }
 0x6bd   : > { %5909 = vrcp.f32 %v2428_v5 }
 0x6c0   : > { %v2431_v55 = vpop.xlane.xlu0 %2430 }
 0x6c1   : > { %5911 = vrcp.f32 %v2431_v55 }
 0x6c3   : > { %v5908_v37 = vpop.eup %5907 }
 0x6c4   : > { %v2434_v33 = vpop.xlane.xlu1 %2433  ;;  %v2528_v21 = vmul.f32 %v5908_v37, %v7486_v40  ;;  %v2527_v54 = vmul.f32 %v5908_v37, %v7484_v24  ;;  %v8175_v37 = vld [vmem:[#allocation29_spill] sm:$0xff] }
 0x6c5   : > { %5913 = vrcp.f32 %v2434_v33 }
 0x6c7   : > { %v5910_v11 = vpop.eup %5909 }
 0x6c8   : > { %v2530_v32 = vmul.f32 %v5910_v11, %v7494_v26  ;;  %v2529_v42 = vmul.f32 %v5910_v11, %v7492_v43 }
 0x6c9   : > { %v2437_v18 = vpop.xlane.xlu0 %2436 }
 0x6ca   : > { %v2568_v1 = vpack.c.bf16 %v2530_v32, %v2528_v21  ;;  %v2567_v16 = vpack.c.bf16 %v2529_v42, %v2527_v54  ;;  %5915 = vrcp.f32 %v2437_v18  ;;  %v8176_v18 = vld [vmem:[#allocation32_spill] sm:$0xff] }
 0x6cb   : > { %v5912_v56 = vpop.eup %5911 }
 0x6cc   : > { %2719 = vmatprep.mubr.bf16.mxu0 %v2568_v1  ;;  %v2440_v58 = vpop.xlane.xlu1 %2439  ;;  %v2532_v35 = vmul.f32 %v5912_v56, %v7506_v17  ;;  %v2531_v26 = vmul.f32 %v5912_v56, %v7504_v27 }
 0x6cd   : > { %5917 = vrcp.f32 %v2440_v58  ;;  %2720 = vmatmul.mubr.bf16.gmra.mrb[144].mxu0 %v2567_v16 }
 0x6cf   : > { %v5914_v45 = vpop.eup %5913 }
 0x6d0   : > { %v2534_v40 = vmul.f32 %v5914_v45, %v7514_v61  ;;  %v2533_v24 = vmul.f32 %v5914_v45, %v7512_v51  ;;  %v8177_v45 = vld [vmem:[#allocation30_spill] sm:$0xff] }
 0x6d1   : > { %v2443_v3 = vpop.xlane.xlu0 %2442 }
 0x6d2   : > { %v2570_v46 = vpack.c.bf16 %v2534_v40, %v2532_v35  ;;  %v2569_v43 = vpack.c.bf16 %v2533_v24, %v2531_v26  ;;  %5919 = vrcp.f32 %v2443_v3  ;;  %v8178_v35 = vld [vmem:[#allocation31_spill] sm:$0xff] }
 0x6d4   : > { %2727 = vmatprep.mubr.bf16.mxu0 %v2570_v46  ;;  %v2446_v53 = vpop.xlane.xlu1 %2445  ;;  %v5916_v57 = vpop.eup %5915 }
 0x6d5   : > { %5921 = vrcp.f32 %v2446_v53  ;;  %2728 = vmatmul.mubr.bf16.gmra.mrb[148].mxu0 %v2569_v43  ;;  %v2536_v6 = vmul.f32 %v5916_v57, %v7526_v63  ;;  %v2535_v17 = vmul.f32 %v5916_v57, %v7524_v41 }
 0x6d7   : > { %v5918_v38 = vpop.eup %5917 }
 0x6d8   : > { %v2538_v36 = vmul.f32 %v5918_v38, %v7532_v20  ;;  %v2537_v61 = vmul.f32 %v5918_v38, %v7530_v28 }
 0x6da   : > { %v2572_v27 = vpack.c.bf16 %v2538_v36, %v2536_v6  ;;  %v2571_v60 = vpack.c.bf16 %v2537_v61, %v2535_v17  ;;  %v8179_v6 = vld [vmem:[#allocation34_spill] sm:$0xff]  ;;  %v8180_v17 = vld [vmem:[#allocation36_spill] sm:$0xff] }
 0x6dc   : > { %2735 = vmatprep.mubr.bf16.mxu0 %v2572_v27  ;;  %v5920_v51 = vpop.eup %5919 }
 0x6dd   : > { %2736 = vmatmul.mubr.bf16.gmra.mrb[152].mxu0 %v2571_v60  ;;  %v2540_v52 = vmul.f32 %v5920_v51, %v7542_v8  ;;  %v2539_v22 = vmul.f32 %v5920_v51, %v7540_v31 }
 0x6df   : > { %v5922_v29 = vpop.eup %5921 }
 0x6e0   : > { %v2542_v59 = vmul.f32 %v5922_v29, %v7548_v23  ;;  %v2541_v63 = vmul.f32 %v5922_v29, %v7546_v49 }
 0x6e2   : > { %v2574_v2 = vpack.c.bf16 %v2542_v59, %v2540_v52  ;;  %v2573_v20 = vpack.c.bf16 %v2541_v63, %v2539_v22  ;;  %v8181_v63 = vld [vmem:[#allocation33_spill] sm:$0xff] }
 0x6e4   : > { %2743 = vmatprep.mubr.bf16.mxu0 %v2574_v2 }
 0x6e5   : > { %2744 = vmatmul.mubr.bf16.gmra.mrb[156].mxu0 %v2573_v20  ;;  %v8182_v20 = vld [vmem:[#allocation35_spill] sm:$0xff] }
 0x6fc   : > { %v4927_v41 = vpop.f32.mrb[96].mxu0 }
 0x6fd   : > { %v4928_v28 = vpop.f32.mrb[97].mxu0 }
 0x6fe   : > { %v4929_v10 = vadd.f32 %v4928_v28, %v4927_v41  ;;  %v4930_v44 = vpop.f32.mrb[98].mxu0 }
 0x6ff   : > { %v4931_v34 = vpop.f32.mrb[99].mxu0 }
 0x700   : > { %v4932_v48 = vadd.f32 %v4931_v34, %v4930_v44  ;;  %v2626_v13 = vadd.f32 %v4929_v10, %v8171_v50 }
 0x702   : > { %v2629_v8 = vadd.f32 %v4932_v48, %v8172_v25  ;;  %v8183_v25 = vld [vmem:[#allocation38_spill] sm:$0xff] }
 0x704   : > { %v2768_v19 = vpack.c.bf16 %v2629_v8, %v2626_v13 }
 0x706   : > { %v4933_v23 = vpop.f32.mrb[100].mxu0  ;;  %5303 = vmatprep.mubr.bf16.mxu1 %v2768_v19  ;;  %v8184_v19 = vld [vmem:[#allocation40_spill] sm:$0xff] }
 0x707   : > { %v4934_v31 = vpop.f32.mrb[101].mxu0 }
 0x708   : > { %v4935_v9 = vadd.f32 %v4934_v31, %v4933_v23  ;;  %v4936_v49 = vpop.f32.mrb[102].mxu0 }
 0x709   : > { %v4937_v47 = vpop.f32.mrb[103].mxu0 }
 0x70a   : > { %v4938_v62 = vadd.f32 %v4937_v47, %v4936_v49  ;;  %v2634_v14 = vadd.f32 %v4935_v9, %v8173_v4 }
 0x70c   : > { %v2637_v12 = vadd.f32 %v4938_v62, %v8174_v15  ;;  %v8185_v15 = vld [vmem:[#allocation37_spill] sm:$0xff] }
 0x70e   : > { %v2769_v39 = vpack.c.bf16 %v2637_v12, %v2634_v14  ;;  %v4939_v7 = vpop.f32.mrb[104].mxu0 }
 0x70f   : > { %v4940_v0 = vpop.f32.mrb[105].mxu0 }
 0x710   : > { %v4941_v30 = vadd.f32 %v4940_v0, %v4939_v7  ;;  %v4942_v5 = vpop.f32.mrb[106].mxu0  ;;  %5304 = vmatmul.mubr.bf16.vlgmr.msra.gmra.mrb[128].mxu1 %v2769_v39  ;;  %v8186_v39 = vld [vmem:[#allocation39_spill] sm:$0xff] }
 0x711   : > { %v4943_v55 = vpop.f32.mrb[107].mxu0 }
 0x712   : > { %v4944_v33 = vadd.f32 %v4943_v55, %v4942_v5  ;;  %v2642_v11 = vadd.f32 %v4941_v30, %v8175_v37 }
 0x714   : > { %v2645_v21 = vadd.f32 %v4944_v33, %v8176_v18  ;;  %v5699_v18 = vld [vmem:[%s6529_s28 + $0x40] sm:$0xff]  }
 0x715   : > { %5335 = vmatprep.subr.bf16.mxu0 %v5699_v18 }
 0x716   : > { %v4945_v32 = vpop.f32.mrb[108].mxu0  ;;  %v2770_v54 = vpack.c.bf16 %v2645_v21, %v2642_v11  ;;  %v5700_v21 = vld [vmem:[%s6529_s28 + $0x48] sm:$0xff]   ;;  %5336 = vmatpush3.bf16.msra.mxu0 %v5699_v18 }
 0x717   : > { %v4946_v42 = vpop.f32.mrb[109].mxu0  ;;  %5337 = vmatprep.subr.bf16.mxu0 %v5700_v21 }
 0x718   : > { %v4947_v1 = vadd.f32 %v4946_v42, %v4945_v32  ;;  %v4948_v16 = vpop.f32.mrb[110].mxu0  ;;  %5307 = vmatprep.mubr.bf16.mxu1 %v2770_v54  ;;  %v8187_v32 = vld [vmem:[#allocation42_spill] sm:$0xff]  ;;  %v8188_v42 = vld [vmem:[#allocation44_spill] sm:$0xff] }
 0x719   : > { %v4949_v58 = vpop.f32.mrb[111].mxu0 }
 0x71a   : > { %v4950_v56 = vadd.f32 %v4949_v58, %v4948_v16  ;;  %v2650_v3 = vadd.f32 %v4947_v1, %v8177_v45  ;;  %5338 = vmatpush3.bf16.msra.mxu0 %v5700_v21  ;;  %v8198_v21 = vld [vmem:[#allocation51_spill] sm:$0xff] }
 0x71c   : > { %v2653_v40 = vadd.f32 %v4950_v56, %v8178_v35  ;;  %v5701_v56 = vld [vmem:[%s6529_s28 + $0x50] sm:$0xff]  }
 0x71d   : > { %5339 = vmatprep.subr.bf16.mxu0 %v5701_v56 }
 0x71e   : > { %v4951_v26 = vpop.f32.mrb[112].mxu0  ;;  %v2771_v24 = vpack.c.bf16 %v2653_v40, %v2650_v3  ;;  %5340 = vmatpush3.bf16.msra.mxu0 %v5701_v56 }
 0x71f   : > { %v4952_v46 = vpop.f32.mrb[113].mxu0 }
 0x720   : > { %v4953_v43 = vadd.f32 %v4952_v46, %v4951_v26  ;;  %v4954_v53 = vpop.f32.mrb[114].mxu0  ;;  %5308 = vmatmul.mubr.bf16.gmra.mrb[132].mxu1 %v2771_v24  ;;  %v5702_v24 = vld [vmem:[%s6529_s28 + $0x58] sm:$0xff]   ;;  %v8189_v46 = vld [vmem:[#allocation41_spill] sm:$0xff] }
 0x721   : > { %v4955_v57 = vpop.f32.mrb[115].mxu0  ;;  %5341 = vmatprep.subr.bf16.mxu0 %v5702_v24 }
 0x722   : > { %v4956_v38 = vadd.f32 %v4955_v57, %v4954_v53  ;;  %v2658_v36 = vadd.f32 %v4953_v43, %v8179_v6  ;;  %v8190_v53 = vld [vmem:[#allocation43_spill] sm:$0xff]  ;;  %5342 = vmatpush3.bf16.msra.mxu0 %v5702_v24 }
 0x724   : > { %v2661_v61 = vadd.f32 %v4956_v38, %v8180_v17 }
 0x726   : > { %v4957_v27 = vpop.f32.mrb[116].mxu0  ;;  %v2772_v60 = vpack.c.bf16 %v2661_v61, %v2658_v36  ;;  %v5703_v36 = vld [vmem:[%s6529_s28 + $0x60] sm:$0xff]  }
 0x727   : > { %v4958_v51 = vpop.f32.mrb[117].mxu0  ;;  %5343 = vmatprep.subr.bf16.mxu0 %v5703_v36 }
 0x728   : > { %v4959_v29 = vadd.f32 %v4958_v51, %v4957_v27  ;;  %v4960_v52 = vpop.f32.mrb[118].mxu0  ;;  %5311 = vmatprep.mubr.bf16.mxu1 %v2772_v60  ;;  %5344 = vmatpush3.bf16.msra.mxu0 %v5703_v36  ;;  %v8201_v36 = vld [vmem:[#allocation53_spill] sm:$0xff] }
 0x729   : > { %v4961_v59 = vpop.f32.mrb[119].mxu0 }
 0x72a   : > { %v4962_v22 = vadd.f32 %v4961_v59, %v4960_v52  ;;  %v2666_v2 = vadd.f32 %v4959_v29, %v8181_v63  ;;  %v8191_v29 = vld [vmem:[#allocation46_spill] sm:$0xff]  ;;  %v8192_v59 = vld [vmem:[#allocation48_spill] sm:$0xff] }
 0x72c   : > { %v2669_v41 = vadd.f32 %v4962_v22, %v8182_v20 }
 0x72e   : > { %v4963_v28 = vpop.f32.mrb[120].mxu0  ;;  %v2773_v10 = vpack.c.bf16 %v2669_v41, %v2666_v2 }
 0x72f   : > { %v4964_v44 = vpop.f32.mrb[121].mxu0 }
 0x730   : > { %v4965_v34 = vadd.f32 %v4964_v44, %v4963_v28  ;;  %v4966_v48 = vpop.f32.mrb[122].mxu0  ;;  %5312 = vmatmul.mubr.bf16.gmra.mrb[136].mxu1 %v2773_v10 }
 0x731   : > { %v4967_v50 = vpop.f32.mrb[123].mxu0 }
 0x732   : > { %v4968_v13 = vadd.f32 %v4967_v50, %v4966_v48  ;;  %v2674_v8 = vadd.f32 %v4965_v34, %v8183_v25  ;;  %v8193_v34 = vld [vmem:[#allocation45_spill] sm:$0xff]  ;;  %v8194_v50 = vld [vmem:[#allocation47_spill] sm:$0xff] }
 0x734   : > { %v2677_v23 = vadd.f32 %v4968_v13, %v8184_v19  ;;  %v5705_v19 = vld [vmem:[%s6529_s28 + $0x70] sm:$0xff]  }
 0x736   : > { %v4969_v31 = vpop.f32.mrb[124].mxu0  ;;  %v2774_v9 = vpack.c.bf16 %v2677_v23, %v2674_v8  ;;  %v5704_v8 = vld [vmem:[%s6529_s28 + $0x68] sm:$0xff]   ;;  %v5706_v23 = vld [vmem:[%s6529_s28 + $0x78] sm:$0xff]  }
 0x737   : > { %v4970_v49 = vpop.f32.mrb[125].mxu0  ;;  %5345 = vmatprep.subr.bf16.mxu0 %v5704_v8 }
 0x738   : > { %v4971_v47 = vadd.f32 %v4970_v49, %v4969_v31  ;;  %v4972_v62 = vpop.f32.mrb[126].mxu0  ;;  %5315 = vmatprep.mubr.bf16.mxu1 %v2774_v9  ;;  %5346 = vmatpush3.bf16.msra.mxu0 %v5704_v8 }
 0x739   : > { %v4973_v4 = vpop.f32.mrb[127].mxu0  ;;  %5347 = vmatprep.subr.bf16.mxu0 %v5705_v19 }
 0x73a   : > { %v4974_v14 = vadd.f32 %v4973_v4, %v4972_v62  ;;  %v2682_v12 = vadd.f32 %v4971_v47, %v8185_v15 }
 0x73c   : > { %v2685_v7 = vadd.f32 %v4974_v14, %v8186_v39  ;;  %5348 = vmatpush3.bf16.msra.mxu0 %v5705_v19  ;;  %v8195_v14 = vld [vmem:[#allocation50_spill] sm:$0xff] }
 0x73d   : > { %5349 = vmatprep.subr.bf16.mxu0 %v5706_v23 }
 0x73e   : > { %v4975_v0 = vpop.f32.mrb[128].mxu0  ;;  %v2775_v30 = vpack.c.bf16 %v2685_v7, %v2682_v12  ;;  %v8196_v12 = vld [vmem:[#allocation52_spill] sm:$0xff] }
 0x73f   : > { %v4976_v5 = vpop.f32.mrb[129].mxu0 }
 0x740   : > { %v4977_v55 = vadd.f32 %v4976_v5, %v4975_v0  ;;  %v4978_v33 = vpop.f32.mrb[130].mxu0  ;;  %5316 = vmatmul.mubr.bf16.gmra.mrb[140].mxu1 %v2775_v30  ;;  %5350 = vmatpush3.bf16.msra.mxu0 %v5706_v23 }
 0x741   : > { %v4979_v37 = vpop.f32.mrb[131].mxu0 }
 0x742   : > { %v4980_v11 = vadd.f32 %v4979_v37, %v4978_v33  ;;  %v2690_v54 = vadd.f32 %v4977_v55, %v8187_v32 }
 0x744   : > { %v2693_v1 = vadd.f32 %v4980_v11, %v8188_v42  ;;  %v8197_v11 = vld [vmem:[#allocation49_spill] sm:$0xff] }
 0x746   : > { %v4981_v16 = vpop.f32.mrb[132].mxu0  ;;  %v2776_v58 = vpack.c.bf16 %v2693_v1, %v2690_v54 }
 0x747   : > { %v4982_v45 = vpop.f32.mrb[133].mxu0 }
 0x748   : > { %v4983_v3 = vadd.f32 %v4982_v45, %v4981_v16  ;;  %v4984_v35 = vpop.f32.mrb[134].mxu0  ;;  %5319 = vmatprep.mubr.bf16.mxu1 %v2776_v58 }
 0x749   : > { %v4985_v40 = vpop.f32.mrb[135].mxu0 }
 0x74a   : > { %v4986_v26 = vadd.f32 %v4985_v40, %v4984_v35  ;;  %v2698_v43 = vadd.f32 %v4983_v3, %v8189_v46  ;;  %v8199_v3 = vld [vmem:[#allocation54_spill] sm:$0xff]  ;;  %v8200_v40 = vld [vmem:[#allocation56_spill] sm:$0xff] }
 0x74c   : > { %v2701_v57 = vadd.f32 %v4986_v26, %v8190_v53 }
 0x74e   : > { %v4987_v38 = vpop.f32.mrb[136].mxu0  ;;  %v2777_v6 = vpack.c.bf16 %v2701_v57, %v2698_v43 }
 0x74f   : > { %v4988_v17 = vpop.f32.mrb[137].mxu0 }
 0x750   : > { %v4989_v61 = vadd.f32 %v4988_v17, %v4987_v38  ;;  %v4990_v27 = vpop.f32.mrb[138].mxu0  ;;  %5320 = vmatmul.mubr.bf16.gmra.mrb[144].mxu1 %v2777_v6 }
 0x751   : > { %v4991_v60 = vpop.f32.mrb[139].mxu0 }
 0x752   : > { %v4992_v51 = vadd.f32 %v4991_v60, %v4990_v27  ;;  %v2706_v52 = vadd.f32 %v4989_v61, %v8191_v29  ;;  %v8202_v61 = vld [vmem:[#allocation55_spill] sm:$0xff] }
 0x754   : > { %v2709_v22 = vadd.f32 %v4992_v51, %v8192_v59  ;;  %v7655_v51 = vld [vmem:[%s7652_s14] ss:$0 sm:$0xff] }
 0x756   : > { %v4993_v63 = vpop.f32.mrb[140].mxu0  ;;  %v2778_v2 = vpack.c.bf16 %v2709_v22, %v2706_v52 }
 0x757   : > { %v4994_v20 = vpop.f32.mrb[141].mxu0 }
 0x758   : > { %v4995_v41 = vadd.f32 %v4994_v20, %v4993_v63  ;;  %v4996_v28 = vpop.f32.mrb[142].mxu0  ;;  %5323 = vmatprep.mubr.bf16.mxu1 %v2778_v2 }
 0x759   : > { %v4997_v10 = vpop.f32.mrb[143].mxu0 }
 0x75a   : > { %v4998_v44 = vadd.f32 %v4997_v10, %v4996_v28  ;;  %v2714_v48 = vadd.f32 %v4995_v41, %v8193_v34 }
 0x75c   : > { %v2717_v13 = vadd.f32 %v4998_v44, %v8194_v50 }
 0x75e   : > { %v2779_v25 = vpack.c.bf16 %v2717_v13, %v2714_v48 }
 0x760   : > { %5324 = vmatmul.mubr.bf16.gmra.mrb[148].mxu1 %v2779_v25 }
 0x7a0   : > { %v4999_v31 = vpop.f32.mrb[144].mxu0 }
 0x7a1   : > { %v5000_v9 = vpop.f32.mrb[145].mxu0 }
 0x7a2   : > { %v5001_v49 = vadd.f32 %v5000_v9, %v4999_v31  ;;  %v5002_v47 = vpop.f32.mrb[146].mxu0 }
 0x7a3   : > { %v5003_v62 = vpop.f32.mrb[147].mxu0 }
 0x7a4   : > { %v5004_v4 = vadd.f32 %v5003_v62, %v5002_v47  ;;  %v2722_v15 = vadd.f32 %v5001_v49, %v8195_v14 }
 0x7a6   : > { %v2725_v39 = vadd.f32 %v5004_v4, %v8196_v12 }
 0x7a8   : > { %v5005_v7 = vpop.f32.mrb[148].mxu0  ;;  %v2780_v0 = vpack.c.bf16 %v2725_v39, %v2722_v15 }
 0x7a9   : > { %v5006_v30 = vpop.f32.mrb[149].mxu0 }
 0x7aa   : > { %v5007_v5 = vadd.f32 %v5006_v30, %v5005_v7  ;;  %v5008_v55 = vpop.f32.mrb[150].mxu0  ;;  %5327 = vmatprep.mubr.bf16.mxu1 %v2780_v0 }
 0x7ab   : > { %v5009_v33 = vpop.f32.mrb[151].mxu0 }
 0x7ac   : > { %v5010_v37 = vadd.f32 %v5009_v33, %v5008_v55  ;;  %v2730_v18 = vadd.f32 %v5007_v5, %v8197_v11 }
 0x7ae   : > { %v2733_v32 = vadd.f32 %v5010_v37, %v8198_v21 }
 0x7b0   : > { %v5011_v54 = vpop.f32.mrb[152].mxu0  ;;  %v2781_v42 = vpack.c.bf16 %v2733_v32, %v2730_v18 }
 0x7b1   : > { %v5012_v1 = vpop.f32.mrb[153].mxu0 }
 0x7b2   : > { %v5013_v16 = vadd.f32 %v5012_v1, %v5011_v54  ;;  %v5014_v58 = vpop.f32.mrb[154].mxu0  ;;  %5328 = vmatmul.mubr.bf16.gmra.mrb[152].mxu1 %v2781_v42 }
 0x7b3   : > { %v5015_v56 = vpop.f32.mrb[155].mxu0 }
 0x7b4   : > { %v5016_v45 = vadd.f32 %v5015_v56, %v5014_v58  ;;  %v2738_v35 = vadd.f32 %v5013_v16, %v8199_v3 }
 0x7b6   : > { %v2741_v26 = vadd.f32 %v5016_v45, %v8200_v40 }
 0x7b8   : > { %v5017_v24 = vpop.f32.mrb[156].mxu0  ;;  %v2782_v46 = vpack.c.bf16 %v2741_v26, %v2738_v35 }
 0x7b9   : > { %v5018_v43 = vpop.f32.mrb[157].mxu0 }
 0x7ba   : > { %v5019_v53 = vadd.f32 %v5018_v43, %v5017_v24  ;;  %v5020_v57 = vpop.f32.mrb[158].mxu0  ;;  %5331 = vmatprep.mubr.bf16.mxu1 %v2782_v46 }
 0x7bb   : > { %v5021_v38 = vpop.f32.mrb[159].mxu0 }
 0x7bc   : > { %v5022_v6 = vadd.f32 %v5021_v38, %v5020_v57  ;;  %v2746_v17 = vadd.f32 %v5019_v53, %v8201_v36 }
 0x7be   : > { %v2749_v27 = vadd.f32 %v5022_v6, %v8202_v61 }
 0x7c0   : > { %v2783_v60 = vpack.c.bf16 %v2749_v27, %v2746_v17 }
 0x7c2   : > { %5332 = vmatmul.mubr.bf16.gmra.mrb[156].mxu1 %v2783_v60 }
 0x7e3   : > { %v5305_v29 = vpop.f32.mrb[128].mxu1 }
 0x7e4   : > { %v2882_v52 = vadd.f32 %v5305_v29, %v7655_v51  ;;  %v2873_v59 = vpop.f32.mrb[129].mxu1 }
 0x7e5   : > { %v2874_v22 = vadd.f32 %v7655_v51, %v2873_v59  ;;  %v5306_v63 = vpop.f32.mrb[130].mxu1 }
 0x7e6   : > { %v3034_v2 = vmul.f32 0.01, %v2882_v52  ;;  %v2885_v20 = vadd.f32 %v5306_v63, %v7655_v51  ;;  %v2876_v41 = vpop.f32.mrb[131].mxu1  ;;  %vm3002_vm0 = vcmp.ge.f32.partialorder %v2882_v52, 0.0 }
 0x7e7   : > { %v3032_v28 = vmul.f32 0.01, %v2874_v22  ;;  %v2877_v10 = vadd.f32 %v7655_v51, %v2876_v41  ;;  %vm3000_vm1 = vcmp.ge.f32.partialorder %v2874_v22, 0.0 }
 0x7e8   : > { %vm3003_vm2 = vcmp.ge.f32.partialorder %v2885_v20, 0.0  ;;  %v3035_v44 = vmul.f32 0.01, %v2885_v20  ;;  %v3066_v48 = vsel %vm3002_vm0, %v2882_v52, %v3034_v2 }
 0x7e9   : > { %vm3001_vm3 = vcmp.ge.f32.partialorder %v2877_v10, 0.0  ;;  %v3033_v34 = vmul.f32 0.01, %v2877_v10  ;;  %v3064_v25 = vsel %vm3000_vm1, %v2874_v22, %v3032_v28 }
 0x7ea   : > { %v3067_v50 = vsel %vm3003_vm2, %v2885_v20, %v3035_v44  ;;  %v5708_v44 = vld [vmem:[%s6529_s28 + $0x88] sm:$0xff]  }
 0x7eb   : > { %v3114_v13 = vpack.c.bf16 %v3067_v50, %v3066_v48  ;;  %v3065_v8 = vsel %vm3001_vm3, %v2877_v10, %v3033_v34  ;;  %v5707_v10 = vld [vmem:[%s6529_s28 + $0x80] sm:$0xff]  }
 0x7ec   : > { %v3113_v19 = vpack.c.bf16 %v3065_v8, %v3064_v25  ;;  %5383 = vmatprep.subr.bf16.mxu1 %v5707_v10  ;;  %v5709_v8 = vld [vmem:[%s6529_s28 + $0x90] sm:$0xff]  }
 0x7ed   : > { %5384 = vmatpush3.bf16.msra.mxu1 %v5707_v10 }
 0x7ee   : > { %5351 = vmatprep.mubr.bf16.mxu0 %v3113_v19  ;;  %5385 = vmatprep.subr.bf16.mxu1 %v5708_v44 }
 0x7ef   : > { %5352 = vmatmul.mubr.bf16.vlgmr.msra.gmra.mrb[160].mxu0 %v3114_v13 }
 0x7f1   : > { %5386 = vmatpush3.bf16.msra.mxu1 %v5708_v44 }
 0x7f2   : > { %5387 = vmatprep.subr.bf16.mxu1 %v5709_v8 }
 0x7f3   : > { %v5309_v23 = vpop.f32.mrb[132].mxu1 }
 0x7f4   : > { %v2898_v31 = vadd.f32 %v5309_v23, %v7655_v51  ;;  %v2889_v9 = vpop.f32.mrb[133].mxu1 }
 0x7f5   : > { %v2890_v49 = vadd.f32 %v7655_v51, %v2889_v9  ;;  %v5310_v47 = vpop.f32.mrb[134].mxu1  ;;  %5388 = vmatpush3.bf16.msra.mxu1 %v5709_v8 }
 0x7f6   : > { %v3038_v62 = vmul.f32 0.01, %v2898_v31  ;;  %v2901_v4 = vadd.f32 %v5310_v47, %v7655_v51  ;;  %v2892_v14 = vpop.f32.mrb[135].mxu1  ;;  %vm3006_vm4 = vcmp.ge.f32.partialorder %v2898_v31, 0.0 }
 0x7f7   : > { %v3036_v15 = vmul.f32 0.01, %v2890_v49  ;;  %v2893_v12 = vadd.f32 %v7655_v51, %v2892_v14  ;;  %vm3004_vm5 = vcmp.ge.f32.partialorder %v2890_v49, 0.0 }
 0x7f8   : > { %vm3007_vm6 = vcmp.ge.f32.partialorder %v2901_v4, 0.0  ;;  %v3039_v39 = vmul.f32 0.01, %v2901_v4  ;;  %v3070_v0 = vsel %vm3006_vm4, %v2898_v31, %v3038_v62 }
 0x7f9   : > { %vm3005_vm7 = vcmp.ge.f32.partialorder %v2893_v12, 0.0  ;;  %v3037_v7 = vmul.f32 0.01, %v2893_v12  ;;  %v3068_v5 = vsel %vm3004_vm5, %v2890_v49, %v3036_v15 }
 0x7fa   : > { %v3071_v30 = vsel %vm3007_vm6, %v2901_v4, %v3039_v39  ;;  %v5710_v4 = vld [vmem:[%s6529_s28 + $0x98] sm:$0xff]  }
 0x7fb   : > { %v3069_v55 = vsel %vm3005_vm7, %v2893_v12, %v3037_v7  ;;  %v3116_v33 = vpack.c.bf16 %v3071_v30, %v3070_v0  ;;  %5389 = vmatprep.subr.bf16.mxu1 %v5710_v4  ;;  %v5711_v30 = vld [vmem:[%s6529_s28 + $0xa0] sm:$0xff]  }
 0x7fc   : > { %v3115_v37 = vpack.c.bf16 %v3069_v55, %v3068_v5  ;;  %5390 = vmatpush3.bf16.msra.mxu1 %v5710_v4 }
 0x7fd   : > { %5391 = vmatprep.subr.bf16.mxu1 %v5711_v30 }
 0x7fe   : > { %5355 = vmatprep.mubr.bf16.mxu0 %v3115_v37 }
 0x7ff   : > { %5356 = vmatmul.mubr.bf16.gmra.mrb[164].mxu0 %v3116_v33 }
 0x800   : > { %5392 = vmatpush3.bf16.msra.mxu1 %v5711_v30 }
 0x803   : > { %v5313_v11 = vpop.f32.mrb[136].mxu1 }
 0x804   : > { %v2914_v18 = vadd.f32 %v5313_v11, %v7655_v51  ;;  %v2905_v21 = vpop.f32.mrb[137].mxu1 }
 0x805   : > { %v2906_v32 = vadd.f32 %v7655_v51, %v2905_v21  ;;  %v5314_v54 = vpop.f32.mrb[138].mxu1 }
 0x806   : > { %v3042_v42 = vmul.f32 0.01, %v2914_v18  ;;  %v2917_v1 = vadd.f32 %v5314_v54, %v7655_v51  ;;  %v2908_v16 = vpop.f32.mrb[139].mxu1  ;;  %vm3010_vm8 = vcmp.ge.f32.partialorder %v2914_v18, 0.0 }
 0x807   : > { %v3040_v58 = vmul.f32 0.01, %v2906_v32  ;;  %v2909_v56 = vadd.f32 %v7655_v51, %v2908_v16  ;;  %vm3008_vm9 = vcmp.ge.f32.partialorder %v2906_v32, 0.0 }
 0x808   : > { %vm3011_vm10 = vcmp.ge.f32.partialorder %v2917_v1, 0.0  ;;  %v3043_v45 = vmul.f32 0.01, %v2917_v1  ;;  %v3074_v35 = vsel %vm3010_vm8, %v2914_v18, %v3042_v42 }
 0x809   : > { %vm3009_vm11 = vcmp.ge.f32.partialorder %v2909_v56, 0.0  ;;  %v3041_v3 = vmul.f32 0.01, %v2909_v56  ;;  %v3072_v26 = vsel %vm3008_vm9, %v2906_v32, %v3040_v58 }
 0x80a   : > { %v3075_v40 = vsel %vm3011_vm10, %v2917_v1, %v3043_v45 }
 0x80b   : > { %v3073_v24 = vsel %vm3009_vm11, %v2909_v56, %v3041_v3  ;;  %v3118_v46 = vpack.c.bf16 %v3075_v40, %v3074_v35 }
 0x80c   : > { %v3117_v43 = vpack.c.bf16 %v3073_v24, %v3072_v26  ;;  %v5712_v26 = vld [vmem:[%s6529_s28 + $0xa8] sm:$0xff]   ;;  %v5713_v24 = vld [vmem:[%s6529_s28 + $0xb0] sm:$0xff]  }
 0x80d   : > { %5393 = vmatprep.subr.bf16.mxu1 %v5712_v26 }
 0x80e   : > { %5359 = vmatprep.mubr.bf16.mxu0 %v3117_v43  ;;  %5394 = vmatpush3.bf16.msra.mxu1 %v5712_v26 }
 0x80f   : > { %5360 = vmatmul.mubr.bf16.gmra.mrb[168].mxu0 %v3118_v46  ;;  %5395 = vmatprep.subr.bf16.mxu1 %v5713_v24  ;;  %v5714_v46 = vld [vmem:[%s6529_s28 + $0xb8] sm:$0xff]  }
 0x812   : > { %5396 = vmatpush3.bf16.msra.mxu1 %v5713_v24 }
 0x813   : > { %v5317_v53 = vpop.f32.mrb[140].mxu1  ;;  %5397 = vmatprep.subr.bf16.mxu1 %v5714_v46 }
 0x814   : > { %v2930_v57 = vadd.f32 %v5317_v53, %v7655_v51  ;;  %v2921_v38 = vpop.f32.mrb[141].mxu1 }
 0x815   : > { %v2922_v6 = vadd.f32 %v7655_v51, %v2921_v38  ;;  %v5318_v36 = vpop.f32.mrb[142].mxu1 }
 0x816   : > { %v3046_v17 = vmul.f32 0.01, %v2930_v57  ;;  %v2933_v61 = vadd.f32 %v5318_v36, %v7655_v51  ;;  %v2924_v27 = vpop.f32.mrb[143].mxu1  ;;  %vm3014_vm12 = vcmp.ge.f32.partialorder %v2930_v57, 0.0  ;;  %5398 = vmatpush3.bf16.msra.mxu1 %v5714_v46 }
 0x817   : > { %v3044_v60 = vmul.f32 0.01, %v2922_v6  ;;  %v2925_v29 = vadd.f32 %v7655_v51, %v2924_v27  ;;  %vm3012_vm13 = vcmp.ge.f32.partialorder %v2922_v6, 0.0 }
 0x818   : > { %vm3015_vm14 = vcmp.ge.f32.partialorder %v2933_v61, 0.0  ;;  %v3047_v52 = vmul.f32 0.01, %v2933_v61  ;;  %v3078_v22 = vsel %vm3014_vm12, %v2930_v57, %v3046_v17 }
 0x819   : > { %vm3013_vm15 = vcmp.ge.f32.partialorder %v2925_v29, 0.0  ;;  %v3045_v59 = vmul.f32 0.01, %v2925_v29  ;;  %v3076_v2 = vsel %vm3012_vm13, %v2922_v6, %v3044_v60 }
 0x81a   : > { %v3079_v63 = vsel %vm3015_vm14, %v2933_v61, %v3047_v52 }
 0x81b   : > { %v3077_v20 = vsel %vm3013_vm15, %v2925_v29, %v3045_v59  ;;  %v3120_v41 = vpack.c.bf16 %v3079_v63, %v3078_v22 }
 0x81c   : > { %v3119_v28 = vpack.c.bf16 %v3077_v20, %v3076_v2 }
 0x81e   : > { %5363 = vmatprep.mubr.bf16.mxu0 %v3119_v28 }
 0x81f   : > { %5364 = vmatmul.mubr.bf16.gmra.mrb[172].mxu0 %v3120_v41 }
 0x823   : > { %v5321_v34 = vpop.f32.mrb[144].mxu1 }
 0x824   : > { %v2946_v48 = vadd.f32 %v5321_v34, %v7655_v51  ;;  %v2937_v50 = vpop.f32.mrb[145].mxu1 }
 0x825   : > { %v2938_v13 = vadd.f32 %v7655_v51, %v2937_v50  ;;  %v5322_v25 = vpop.f32.mrb[146].mxu1 }
 0x826   : > { %v3050_v19 = vmul.f32 0.01, %v2946_v48  ;;  %v2949_v23 = vadd.f32 %v5322_v25, %v7655_v51  ;;  %v2940_v31 = vpop.f32.mrb[147].mxu1  ;;  %vm3018_vm0 = vcmp.ge.f32.partialorder %v2946_v48, 0.0 }
 0x827   : > { %v3048_v9 = vmul.f32 0.01, %v2938_v13  ;;  %v2941_v49 = vadd.f32 %v7655_v51, %v2940_v31  ;;  %vm3016_vm1 = vcmp.ge.f32.partialorder %v2938_v13, 0.0 }
 0x828   : > { %vm3019_vm2 = vcmp.ge.f32.partialorder %v2949_v23, 0.0  ;;  %v3051_v47 = vmul.f32 0.01, %v2949_v23  ;;  %v3082_v14 = vsel %vm3018_vm0, %v2946_v48, %v3050_v19 }
 0x829   : > { %vm3017_vm3 = vcmp.ge.f32.partialorder %v2941_v49, 0.0  ;;  %v3049_v62 = vmul.f32 0.01, %v2941_v49  ;;  %v3080_v12 = vsel %vm3016_vm1, %v2938_v13, %v3048_v9 }
 0x82a   : > { %v3083_v15 = vsel %vm3019_vm2, %v2949_v23, %v3051_v47 }
 0x82b   : > { %v3081_v39 = vsel %vm3017_vm3, %v2941_v49, %v3049_v62  ;;  %v3122_v7 = vpack.c.bf16 %v3083_v15, %v3082_v14  ;;  %v7698_v15 = vld [vmem:[%s7652_s14 + $0x1] ss:$0 sm:$0xff] }
 0x82c   : > { %v3121_v0 = vpack.c.bf16 %v3081_v39, %v3080_v12 }
 0x82e   : > { %5367 = vmatprep.mubr.bf16.mxu0 %v3121_v0 }
 0x82f   : > { %5368 = vmatmul.mubr.bf16.gmra.mrb[176].mxu0 %v3122_v7 }
 0x833   : > { %v5325_v5 = vpop.f32.mrb[148].mxu1 }
 0x834   : > { %v2962_v55 = vadd.f32 %v5325_v5, %v7655_v51  ;;  %v2953_v33 = vpop.f32.mrb[149].mxu1 }
 0x835   : > { %v2954_v37 = vadd.f32 %v7655_v51, %v2953_v33  ;;  %v5326_v11 = vpop.f32.mrb[150].mxu1 }
 0x836   : > { %v3054_v18 = vmul.f32 0.01, %v2962_v55  ;;  %v2965_v21 = vadd.f32 %v5326_v11, %v7655_v51  ;;  %v2956_v32 = vpop.f32.mrb[151].mxu1  ;;  %vm3022_vm4 = vcmp.ge.f32.partialorder %v2962_v55, 0.0 }
 0x837   : > { %v3052_v54 = vmul.f32 0.01, %v2954_v37  ;;  %v2957_v42 = vadd.f32 %v7655_v51, %v2956_v32  ;;  %vm3020_vm5 = vcmp.ge.f32.partialorder %v2954_v37, 0.0 }
 0x838   : > { %vm3023_vm6 = vcmp.ge.f32.partialorder %v2965_v21, 0.0  ;;  %v3055_v1 = vmul.f32 0.01, %v2965_v21  ;;  %v3086_v58 = vsel %vm3022_vm4, %v2962_v55, %v3054_v18 }
 0x839   : > { %vm3021_vm7 = vcmp.ge.f32.partialorder %v2957_v42, 0.0  ;;  %v3053_v16 = vmul.f32 0.01, %v2957_v42  ;;  %v3084_v45 = vsel %vm3020_vm5, %v2954_v37, %v3052_v54 }
 0x83a   : > { %v3087_v56 = vsel %vm3023_vm6, %v2965_v21, %v3055_v1 }
 0x83b   : > { %v3085_v3 = vsel %vm3021_vm7, %v2957_v42, %v3053_v16  ;;  %v3124_v35 = vpack.c.bf16 %v3087_v56, %v3086_v58 }
 0x83c   : > { %v3123_v40 = vpack.c.bf16 %v3085_v3, %v3084_v45 }
 0x83e   : > { %5371 = vmatprep.mubr.bf16.mxu0 %v3123_v40 }
 0x83f   : > { %5372 = vmatmul.mubr.bf16.gmra.mrb[180].mxu0 %v3124_v35 }
 0x885   : > { %v5329_v43 = vpop.f32.mrb[152].mxu1 }
 0x886   : > { %v2978_v53 = vadd.f32 %v5329_v43, %v7655_v51  ;;  %v2969_v57 = vpop.f32.mrb[153].mxu1 }
 0x887   : > { %v2970_v38 = vadd.f32 %v7655_v51, %v2969_v57  ;;  %v5330_v6 = vpop.f32.mrb[154].mxu1 }
 0x888   : > { %v3058_v36 = vmul.f32 0.01, %v2978_v53  ;;  %v2981_v17 = vadd.f32 %v5330_v6, %v7655_v51  ;;  %v2972_v61 = vpop.f32.mrb[155].mxu1  ;;  %vm3026_vm8 = vcmp.ge.f32.partialorder %v2978_v53, 0.0 }
 0x889   : > { %v3056_v27 = vmul.f32 0.01, %v2970_v38  ;;  %v2973_v60 = vadd.f32 %v7655_v51, %v2972_v61  ;;  %vm3024_vm9 = vcmp.ge.f32.partialorder %v2970_v38, 0.0 }
 0x88a   : > { %vm3027_vm10 = vcmp.ge.f32.partialorder %v2981_v17, 0.0  ;;  %v3059_v29 = vmul.f32 0.01, %v2981_v17  ;;  %v3090_v59 = vsel %vm3026_vm8, %v2978_v53, %v3058_v36 }
 0x88b   : > { %vm3025_vm11 = vcmp.ge.f32.partialorder %v2973_v60, 0.0  ;;  %v3057_v52 = vmul.f32 0.01, %v2973_v60  ;;  %v3088_v63 = vsel %vm3024_vm9, %v2970_v38, %v3056_v27 }
 0x88c   : > { %v3091_v22 = vsel %vm3027_vm10, %v2981_v17, %v3059_v29 }
 0x88d   : > { %v3089_v2 = vsel %vm3025_vm11, %v2973_v60, %v3057_v52  ;;  %v3126_v20 = vpack.c.bf16 %v3091_v22, %v3090_v59 }
 0x88e   : > { %v3125_v41 = vpack.c.bf16 %v3089_v2, %v3088_v63 }
 0x890   : > { %5375 = vmatprep.mubr.bf16.mxu0 %v3125_v41 }
 0x891   : > { %5376 = vmatmul.mubr.bf16.gmra.mrb[184].mxu0 %v3126_v20 }
 0x895   : > { %v5333_v28 = vpop.f32.mrb[156].mxu1 }
 0x896   : > { %v2994_v10 = vadd.f32 %v5333_v28, %v7655_v51  ;;  %v2985_v44 = vpop.f32.mrb[157].mxu1 }
 0x897   : > { %v2986_v34 = vadd.f32 %v7655_v51, %v2985_v44  ;;  %v5334_v48 = vpop.f32.mrb[158].mxu1 }
 0x898   : > { %v3062_v50 = vmul.f32 0.01, %v2994_v10  ;;  %v2997_v13 = vadd.f32 %v5334_v48, %v7655_v51  ;;  %v2988_v25 = vpop.f32.mrb[159].mxu1  ;;  %vm3030_vm12 = vcmp.ge.f32.partialorder %v2994_v10, 0.0 }
 0x899   : > { %v3060_v8 = vmul.f32 0.01, %v2986_v34  ;;  %v2989_v19 = vadd.f32 %v7655_v51, %v2988_v25  ;;  %vm3028_vm13 = vcmp.ge.f32.partialorder %v2986_v34, 0.0 }
 0x89a   : > { %vm3031_vm14 = vcmp.ge.f32.partialorder %v2997_v13, 0.0  ;;  %v3063_v23 = vmul.f32 0.01, %v2997_v13  ;;  %v3094_v9 = vsel %vm3030_vm12, %v2994_v10, %v3062_v50 }
 0x89b   : > { %vm3029_vm15 = vcmp.ge.f32.partialorder %v2989_v19, 0.0  ;;  %v3061_v31 = vmul.f32 0.01, %v2989_v19  ;;  %v3092_v47 = vsel %vm3028_vm13, %v2986_v34, %v3060_v8 }
 0x89c   : > { %v3095_v49 = vsel %vm3031_vm14, %v2997_v13, %v3063_v23 }
 0x89d   : > { %v3093_v62 = vsel %vm3029_vm15, %v2989_v19, %v3061_v31  ;;  %v3128_v4 = vpack.c.bf16 %v3095_v49, %v3094_v9 }
 0x89e   : > { %v3127_v14 = vpack.c.bf16 %v3093_v62, %v3092_v47 }
 0x8a0   : > { %5379 = vmatprep.mubr.bf16.mxu0 %v3127_v14 }
 0x8a1   : > { %5380 = vmatmul.mubr.bf16.gmra.mrb[188].mxu0 %v3128_v4 }
 0x8c2   : > { %v5353_v12 = vpop.f32.mrb[160].mxu0 }
 0x8c3   : > { %v3228_v39 = vadd.f32 %v5353_v12, %v7698_v15  ;;  %v3219_v7 = vpop.f32.mrb[161].mxu0 }
 0x8c4   : > { %v3220_v51 = vadd.f32 %v7698_v15, %v3219_v7  ;;  %v5354_v0 = vpop.f32.mrb[162].mxu0 }
 0x8c5   : > { %v3380_v30 = vmul.f32 0.01, %v3228_v39  ;;  %v3231_v5 = vadd.f32 %v5354_v0, %v7698_v15  ;;  %v3222_v55 = vpop.f32.mrb[163].mxu0  ;;  %vm3348_vm0 = vcmp.ge.f32.partialorder %v3228_v39, 0.0 }
 0x8c6   : > { %v3378_v33 = vmul.f32 0.01, %v3220_v51  ;;  %v3223_v37 = vadd.f32 %v7698_v15, %v3222_v55  ;;  %vm3346_vm1 = vcmp.ge.f32.partialorder %v3220_v51, 0.0 }
 0x8c7   : > { %vm3349_vm2 = vcmp.ge.f32.partialorder %v3231_v5, 0.0  ;;  %v3381_v11 = vmul.f32 0.01, %v3231_v5  ;;  %v3412_v21 = vsel %vm3348_vm0, %v3228_v39, %v3380_v30 }
 0x8c8   : > { %vm3347_vm3 = vcmp.ge.f32.partialorder %v3223_v37, 0.0  ;;  %v3379_v18 = vmul.f32 0.01, %v3223_v37  ;;  %v3410_v42 = vsel %vm3346_vm1, %v3220_v51, %v3378_v33 }
 0x8c9   : > { %v3413_v32 = vsel %vm3349_vm2, %v3231_v5, %v3381_v11  ;;  %v5716_v11 = vld [vmem:[%s6529_s28 + $0xc8] sm:$0xff]  }
 0x8ca   : > { %v3460_v54 = vpack.c.bf16 %v3413_v32, %v3412_v21  ;;  %v3411_v1 = vsel %vm3347_vm3, %v3223_v37, %v3379_v18  ;;  %v5715_v37 = vld [vmem:[%s6529_s28 + $0xc0] sm:$0xff]  }
 0x8cb   : > { %v3459_v16 = vpack.c.bf16 %v3411_v1, %v3410_v42  ;;  %5431 = vmatprep.subr.bf16.mxu0 %v5715_v37  ;;  %v5717_v1 = vld [vmem:[%s6529_s28 + $0xd0] sm:$0xff]  }
 0x8cc   : > { %5432 = vmatpush3.bf16.msra.mxu0 %v5715_v37 }
 0x8cd   : > { %5399 = vmatprep.mubr.bf16.mxu1 %v3459_v16  ;;  %5433 = vmatprep.subr.bf16.mxu0 %v5716_v11 }
 0x8ce   : > { %5400 = vmatmul.mubr.bf16.vlgmr.msra.gmra.mrb[160].mxu1 %v3460_v54 }
 0x8d0   : > { %5434 = vmatpush3.bf16.msra.mxu0 %v5716_v11 }
 0x8d1   : > { %5435 = vmatprep.subr.bf16.mxu0 %v5717_v1 }
 0x8d2   : > { %v5357_v58 = vpop.f32.mrb[164].mxu0 }
 0x8d3   : > { %v3244_v56 = vadd.f32 %v5357_v58, %v7698_v15  ;;  %v3235_v45 = vpop.f32.mrb[165].mxu0 }
 0x8d4   : > { %v3236_v3 = vadd.f32 %v7698_v15, %v3235_v45  ;;  %v5358_v35 = vpop.f32.mrb[166].mxu0  ;;  %5436 = vmatpush3.bf16.msra.mxu0 %v5717_v1 }
 0x8d5   : > { %v3384_v40 = vmul.f32 0.01, %v3244_v56  ;;  %v3247_v26 = vadd.f32 %v5358_v35, %v7698_v15  ;;  %v3238_v24 = vpop.f32.mrb[167].mxu0  ;;  %vm3352_vm4 = vcmp.ge.f32.partialorder %v3244_v56, 0.0 }
 0x8d6   : > { %v3382_v46 = vmul.f32 0.01, %v3236_v3  ;;  %v3239_v43 = vadd.f32 %v7698_v15, %v3238_v24  ;;  %vm3350_vm5 = vcmp.ge.f32.partialorder %v3236_v3, 0.0 }
 0x8d7   : > { %vm3353_vm6 = vcmp.ge.f32.partialorder %v3247_v26, 0.0  ;;  %v3385_v53 = vmul.f32 0.01, %v3247_v26  ;;  %v3416_v38 = vsel %vm3352_vm4, %v3244_v56, %v3384_v40 }
 0x8d8   : > { %vm3351_vm7 = vcmp.ge.f32.partialorder %v3239_v43, 0.0  ;;  %v3383_v57 = vmul.f32 0.01, %v3239_v43  ;;  %v3414_v36 = vsel %vm3350_vm5, %v3236_v3, %v3382_v46 }
 0x8d9   : > { %v3417_v6 = vsel %vm3353_vm6, %v3247_v26, %v3385_v53  ;;  %v5718_v26 = vld [vmem:[%s6529_s28 + $0xd8] sm:$0xff]  }
 0x8da   : > { %v3415_v17 = vsel %vm3351_vm7, %v3239_v43, %v3383_v57  ;;  %v3462_v61 = vpack.c.bf16 %v3417_v6, %v3416_v38  ;;  %5437 = vmatprep.subr.bf16.mxu0 %v5718_v26  ;;  %v5719_v6 = vld [vmem:[%s6529_s28 + $0xe0] sm:$0xff]  }
 0x8db   : > { %v3461_v27 = vpack.c.bf16 %v3415_v17, %v3414_v36  ;;  %5438 = vmatpush3.bf16.msra.mxu0 %v5718_v26 }
 0x8dc   : > { %5439 = vmatprep.subr.bf16.mxu0 %v5719_v6 }
 0x8dd   : > { %5403 = vmatprep.mubr.bf16.mxu1 %v3461_v27 }
 0x8de   : > { %5404 = vmatmul.mubr.bf16.gmra.mrb[164].mxu1 %v3462_v61 }
 0x8df   : > { %5440 = vmatpush3.bf16.msra.mxu0 %v5719_v6 }
 0x8e2   : > { %v5361_v60 = vpop.f32.mrb[168].mxu0 }
 0x8e3   : > { %v3260_v29 = vadd.f32 %v5361_v60, %v7698_v15  ;;  %v3251_v52 = vpop.f32.mrb[169].mxu0 }
 0x8e4   : > { %v3252_v59 = vadd.f32 %v7698_v15, %v3251_v52  ;;  %v5362_v22 = vpop.f32.mrb[170].mxu0 }
 0x8e5   : > { %v3388_v63 = vmul.f32 0.01, %v3260_v29  ;;  %v3263_v2 = vadd.f32 %v5362_v22, %v7698_v15  ;;  %v3254_v20 = vpop.f32.mrb[171].mxu0  ;;  %vm3356_vm8 = vcmp.ge.f32.partialorder %v3260_v29, 0.0 }
 0x8e6   : > { %v3386_v41 = vmul.f32 0.01, %v3252_v59  ;;  %v3255_v28 = vadd.f32 %v7698_v15, %v3254_v20  ;;  %vm3354_vm9 = vcmp.ge.f32.partialorder %v3252_v59, 0.0 }
 0x8e7   : > { %vm3357_vm10 = vcmp.ge.f32.partialorder %v3263_v2, 0.0  ;;  %v3389_v10 = vmul.f32 0.01, %v3263_v2  ;;  %v3420_v34 = vsel %vm3356_vm8, %v3260_v29, %v3388_v63 }
 0x8e8   : > { %vm3355_vm11 = vcmp.ge.f32.partialorder %v3255_v28, 0.0  ;;  %v3387_v44 = vmul.f32 0.01, %v3255_v28  ;;  %v3418_v50 = vsel %vm3354_vm9, %v3252_v59, %v3386_v41 }
 0x8e9   : > { %v3421_v48 = vsel %vm3357_vm10, %v3263_v2, %v3389_v10 }
 0x8ea   : > { %v3419_v13 = vsel %vm3355_vm11, %v3255_v28, %v3387_v44  ;;  %v3464_v25 = vpack.c.bf16 %v3421_v48, %v3420_v34 }
 0x8eb   : > { %v3463_v8 = vpack.c.bf16 %v3419_v13, %v3418_v50  ;;  %v5720_v50 = vld [vmem:[%s6529_s28 + $0xe8] sm:$0xff]   ;;  %v5721_v13 = vld [vmem:[%s6529_s28 + $0xf0] sm:$0xff]  }
 0x8ec   : > { %5441 = vmatprep.subr.bf16.mxu0 %v5720_v50 }
 0x8ed   : > { %5407 = vmatprep.mubr.bf16.mxu1 %v3463_v8  ;;  %5442 = vmatpush3.bf16.msra.mxu0 %v5720_v50 }
 0x8ee   : > { %5408 = vmatmul.mubr.bf16.gmra.mrb[168].mxu1 %v3464_v25  ;;  %5443 = vmatprep.subr.bf16.mxu0 %v5721_v13  ;;  %v5722_v25 = vld [vmem:[%s6529_s28 + $0xf8] sm:$0xff]  }
 0x8f1   : > { %5444 = vmatpush3.bf16.msra.mxu0 %v5721_v13 }
 0x8f2   : > { %v5365_v19 = vpop.f32.mrb[172].mxu0  ;;  %5445 = vmatprep.subr.bf16.mxu0 %v5722_v25 }
 0x8f3   : > { %v3276_v23 = vadd.f32 %v5365_v19, %v7698_v15  ;;  %v3267_v31 = vpop.f32.mrb[173].mxu0 }
 0x8f4   : > { %v3268_v9 = vadd.f32 %v7698_v15, %v3267_v31  ;;  %v5366_v49 = vpop.f32.mrb[174].mxu0 }
 0x8f5   : > { %v3392_v47 = vmul.f32 0.01, %v3276_v23  ;;  %v3279_v62 = vadd.f32 %v5366_v49, %v7698_v15  ;;  %v3270_v4 = vpop.f32.mrb[175].mxu0  ;;  %vm3360_vm12 = vcmp.ge.f32.partialorder %v3276_v23, 0.0  ;;  %5446 = vmatpush3.bf16.msra.mxu0 %v5722_v25 }
 0x8f6   : > { %v3390_v14 = vmul.f32 0.01, %v3268_v9  ;;  %v3271_v12 = vadd.f32 %v7698_v15, %v3270_v4  ;;  %vm3358_vm13 = vcmp.ge.f32.partialorder %v3268_v9, 0.0 }
 0x8f7   : > { %vm3361_vm14 = vcmp.ge.f32.partialorder %v3279_v62, 0.0  ;;  %v3393_v39 = vmul.f32 0.01, %v3279_v62  ;;  %v3424_v51 = vsel %vm3360_vm12, %v3276_v23, %v3392_v47 }
 0x8f8   : > { %vm3359_vm15 = vcmp.ge.f32.partialorder %v3271_v12, 0.0  ;;  %v3391_v7 = vmul.f32 0.01, %v3271_v12  ;;  %v3422_v30 = vsel %vm3358_vm13, %v3268_v9, %v3390_v14 }
 0x8f9   : > { %v3425_v0 = vsel %vm3361_vm14, %v3279_v62, %v3393_v39 }
 0x8fa   : > { %v3423_v5 = vsel %vm3359_vm15, %v3271_v12, %v3391_v7  ;;  %v3466_v55 = vpack.c.bf16 %v3425_v0, %v3424_v51 }
 0x8fb   : > { %v3465_v33 = vpack.c.bf16 %v3423_v5, %v3422_v30 }
 0x8fd   : > { %5411 = vmatprep.mubr.bf16.mxu1 %v3465_v33 }
 0x8fe   : > { %5412 = vmatmul.mubr.bf16.gmra.mrb[172].mxu1 %v3466_v55 }
 0x902   : > { %v5369_v18 = vpop.f32.mrb[176].mxu0 }
 0x903   : > { %v3292_v21 = vadd.f32 %v5369_v18, %v7698_v15  ;;  %v3283_v32 = vpop.f32.mrb[177].mxu0 }
 0x904   : > { %v3284_v54 = vadd.f32 %v7698_v15, %v3283_v32  ;;  %v5370_v42 = vpop.f32.mrb[178].mxu0 }
 0x905   : > { %v3396_v16 = vmul.f32 0.01, %v3292_v21  ;;  %v3295_v58 = vadd.f32 %v5370_v42, %v7698_v15  ;;  %v3286_v56 = vpop.f32.mrb[179].mxu0  ;;  %vm3364_vm0 = vcmp.ge.f32.partialorder %v3292_v21, 0.0 }
 0x906   : > { %v3394_v45 = vmul.f32 0.01, %v3284_v54  ;;  %v3287_v3 = vadd.f32 %v7698_v15, %v3286_v56  ;;  %vm3362_vm1 = vcmp.ge.f32.partialorder %v3284_v54, 0.0 }
 0x907   : > { %vm3365_vm2 = vcmp.ge.f32.partialorder %v3295_v58, 0.0  ;;  %v3397_v35 = vmul.f32 0.01, %v3295_v58  ;;  %v3428_v24 = vsel %vm3364_vm0, %v3292_v21, %v3396_v16 }
 0x908   : > { %vm3363_vm3 = vcmp.ge.f32.partialorder %v3287_v3, 0.0  ;;  %v3395_v40 = vmul.f32 0.01, %v3287_v3  ;;  %v3426_v43 = vsel %vm3362_vm1, %v3284_v54, %v3394_v45 }
 0x909   : > { %v3429_v46 = vsel %vm3365_vm2, %v3295_v58, %v3397_v35 }
 0x90a   : > { %v3427_v53 = vsel %vm3363_vm3, %v3287_v3, %v3395_v40  ;;  %v3468_v57 = vpack.c.bf16 %v3429_v46, %v3428_v24  ;;  %v7741_v46 = vld [vmem:[%s7652_s14 + $0x2] ss:$0 sm:$0xff] }
 0x90b   : > { %v3467_v38 = vpack.c.bf16 %v3427_v53, %v3426_v43 }
 0x90d   : > { %5415 = vmatprep.mubr.bf16.mxu1 %v3467_v38 }
 0x90e   : > { %5416 = vmatmul.mubr.bf16.gmra.mrb[176].mxu1 %v3468_v57 }
 0x912   : > { %v5373_v36 = vpop.f32.mrb[180].mxu0 }
 0x913   : > { %v3308_v17 = vadd.f32 %v5373_v36, %v7698_v15  ;;  %v3299_v61 = vpop.f32.mrb[181].mxu0 }
 0x914   : > { %v3300_v27 = vadd.f32 %v7698_v15, %v3299_v61  ;;  %v5374_v60 = vpop.f32.mrb[182].mxu0 }
 0x915   : > { %v3400_v29 = vmul.f32 0.01, %v3308_v17  ;;  %v3311_v52 = vadd.f32 %v5374_v60, %v7698_v15  ;;  %v3302_v59 = vpop.f32.mrb[183].mxu0  ;;  %vm3368_vm4 = vcmp.ge.f32.partialorder %v3308_v17, 0.0 }
 0x916   : > { %v3398_v22 = vmul.f32 0.01, %v3300_v27  ;;  %v3303_v63 = vadd.f32 %v7698_v15, %v3302_v59  ;;  %vm3366_vm5 = vcmp.ge.f32.partialorder %v3300_v27, 0.0 }
 0x917   : > { %vm3369_vm6 = vcmp.ge.f32.partialorder %v3311_v52, 0.0  ;;  %v3401_v2 = vmul.f32 0.01, %v3311_v52  ;;  %v3432_v41 = vsel %vm3368_vm4, %v3308_v17, %v3400_v29 }
 0x918   : > { %vm3367_vm7 = vcmp.ge.f32.partialorder %v3303_v63, 0.0  ;;  %v3399_v20 = vmul.f32 0.01, %v3303_v63  ;;  %v3430_v10 = vsel %vm3366_vm5, %v3300_v27, %v3398_v22 }
 0x919   : > { %v3433_v28 = vsel %vm3369_vm6, %v3311_v52, %v3401_v2 }
 0x91a   : > { %v3431_v44 = vsel %vm3367_vm7, %v3303_v63, %v3399_v20  ;;  %v3470_v34 = vpack.c.bf16 %v3433_v28, %v3432_v41 }
 0x91b   : > { %v3469_v48 = vpack.c.bf16 %v3431_v44, %v3430_v10 }
 0x91d   : > { %5419 = vmatprep.mubr.bf16.mxu1 %v3469_v48 }
 0x91e   : > { %5420 = vmatmul.mubr.bf16.gmra.mrb[180].mxu1 %v3470_v34 }
 0x964   : > { %v5377_v8 = vpop.f32.mrb[184].mxu0 }
 0x965   : > { %v3324_v19 = vadd.f32 %v5377_v8, %v7698_v15  ;;  %v3315_v23 = vpop.f32.mrb[185].mxu0 }
 0x966   : > { %v3316_v31 = vadd.f32 %v7698_v15, %v3315_v23  ;;  %v5378_v9 = vpop.f32.mrb[186].mxu0 }
 0x967   : > { %v3404_v49 = vmul.f32 0.01, %v3324_v19  ;;  %v3327_v47 = vadd.f32 %v5378_v9, %v7698_v15  ;;  %v3318_v62 = vpop.f32.mrb[187].mxu0  ;;  %vm3372_vm8 = vcmp.ge.f32.partialorder %v3324_v19, 0.0 }
 0x968   : > { %v3402_v4 = vmul.f32 0.01, %v3316_v31  ;;  %v3319_v14 = vadd.f32 %v7698_v15, %v3318_v62  ;;  %vm3370_vm9 = vcmp.ge.f32.partialorder %v3316_v31, 0.0 }
 0x969   : > { %vm3373_vm10 = vcmp.ge.f32.partialorder %v3327_v47, 0.0  ;;  %v3405_v12 = vmul.f32 0.01, %v3327_v47  ;;  %v3436_v7 = vsel %vm3372_vm8, %v3324_v19, %v3404_v49 }
 0x96a   : > { %vm3371_vm11 = vcmp.ge.f32.partialorder %v3319_v14, 0.0  ;;  %v3403_v39 = vmul.f32 0.01, %v3319_v14  ;;  %v3434_v0 = vsel %vm3370_vm9, %v3316_v31, %v3402_v4 }
 0x96b   : > { %v3437_v51 = vsel %vm3373_vm10, %v3327_v47, %v3405_v12 }
 0x96c   : > { %v3435_v30 = vsel %vm3371_vm11, %v3319_v14, %v3403_v39  ;;  %v3472_v5 = vpack.c.bf16 %v3437_v51, %v3436_v7 }
 0x96d   : > { %v3471_v55 = vpack.c.bf16 %v3435_v30, %v3434_v0 }
 0x96f   : > { %5423 = vmatprep.mubr.bf16.mxu1 %v3471_v55 }
 0x970   : > { %5424 = vmatmul.mubr.bf16.gmra.mrb[184].mxu1 %v3472_v5 }
 0x974   : > { %v5381_v33 = vpop.f32.mrb[188].mxu0 }
 0x975   : > { %v3340_v37 = vadd.f32 %v5381_v33, %v7698_v15  ;;  %v3331_v11 = vpop.f32.mrb[189].mxu0 }
 0x976   : > { %v3332_v18 = vadd.f32 %v7698_v15, %v3331_v11  ;;  %v5382_v21 = vpop.f32.mrb[190].mxu0 }
 0x977   : > { %v3408_v32 = vmul.f32 0.01, %v3340_v37  ;;  %v3343_v54 = vadd.f32 %v5382_v21, %v7698_v15  ;;  %v3334_v42 = vpop.f32.mrb[191].mxu0  ;;  %vm3376_vm12 = vcmp.ge.f32.partialorder %v3340_v37, 0.0 }
 0x978   : > { %v3406_v1 = vmul.f32 0.01, %v3332_v18  ;;  %v3335_v16 = vadd.f32 %v7698_v15, %v3334_v42  ;;  %vm3374_vm13 = vcmp.ge.f32.partialorder %v3332_v18, 0.0 }
 0x979   : > { %vm3377_vm14 = vcmp.ge.f32.partialorder %v3343_v54, 0.0  ;;  %v3409_v58 = vmul.f32 0.01, %v3343_v54  ;;  %v3440_v45 = vsel %vm3376_vm12, %v3340_v37, %v3408_v32 }
 0x97a   : > { %vm3375_vm15 = vcmp.ge.f32.partialorder %v3335_v16, 0.0  ;;  %v3407_v56 = vmul.f32 0.01, %v3335_v16  ;;  %v3438_v35 = vsel %vm3374_vm13, %v3332_v18, %v3406_v1 }
 0x97b   : > { %v3441_v3 = vsel %vm3377_vm14, %v3343_v54, %v3409_v58 }
 0x97c   : > { %v3439_v40 = vsel %vm3375_vm15, %v3335_v16, %v3407_v56  ;;  %v3474_v26 = vpack.c.bf16 %v3441_v3, %v3440_v45 }
 0x97d   : > { %v3473_v24 = vpack.c.bf16 %v3439_v40, %v3438_v35 }
 0x97f   : > { %5427 = vmatprep.mubr.bf16.mxu1 %v3473_v24 }
 0x980   : > { %5428 = vmatmul.mubr.bf16.gmra.mrb[188].mxu1 %v3474_v26 }
 0x9a1   : > { %v5401_v43 = vpop.f32.mrb[160].mxu1 }
 0x9a2   : > { %v3574_v53 = vadd.f32 %v5401_v43, %v7741_v46  ;;  %v3565_v57 = vpop.f32.mrb[161].mxu1 }
 0x9a3   : > { %v3566_v15 = vadd.f32 %v7741_v46, %v3565_v57  ;;  %v5402_v38 = vpop.f32.mrb[162].mxu1 }
 0x9a4   : > { %v3726_v6 = vmul.f32 0.01, %v3574_v53  ;;  %v3577_v36 = vadd.f32 %v5402_v38, %v7741_v46  ;;  %v3568_v17 = vpop.f32.mrb[163].mxu1  ;;  %vm3694_vm0 = vcmp.ge.f32.partialorder %v3574_v53, 0.0 }
 0x9a5   : > { %v3724_v61 = vmul.f32 0.01, %v3566_v15  ;;  %v3569_v27 = vadd.f32 %v7741_v46, %v3568_v17  ;;  %vm3692_vm1 = vcmp.ge.f32.partialorder %v3566_v15, 0.0 }
 0x9a6   : > { %vm3695_vm2 = vcmp.ge.f32.partialorder %v3577_v36, 0.0  ;;  %v3727_v60 = vmul.f32 0.01, %v3577_v36  ;;  %v3758_v52 = vsel %vm3694_vm0, %v3574_v53, %v3726_v6 }
 0x9a7   : > { %vm3693_vm3 = vcmp.ge.f32.partialorder %v3569_v27, 0.0  ;;  %v3725_v29 = vmul.f32 0.01, %v3569_v27  ;;  %v3756_v63 = vsel %vm3692_vm1, %v3566_v15, %v3724_v61 }
 0x9a8   : > { %v3759_v59 = vsel %vm3695_vm2, %v3577_v36, %v3727_v60  ;;  %v5724_v60 = vld [vmem:[%s6532_s26 + $0x8] sm:$0xff]  }
 0x9a9   : > { %v3806_v22 = vpack.c.bf16 %v3759_v59, %v3758_v52  ;;  %v3757_v2 = vsel %vm3693_vm3, %v3569_v27, %v3725_v29  ;;  %v5723_v27 = vld [vmem:[%s6532_s26] sm:$0xff]  }
 0x9aa   : > { %v3805_v20 = vpack.c.bf16 %v3757_v2, %v3756_v63  ;;  %5479 = vmatprep.subr.bf16.mxu1 %v5723_v27  ;;  %v5725_v2 = vld [vmem:[%s6532_s26 + $0x10] sm:$0xff]  }
 0x9ab   : > { %5480 = vmatpush3.bf16.msra.mxu1 %v5723_v27 }
 0x9ac   : > { %5447 = vmatprep.mubr.bf16.mxu0 %v3805_v20  ;;  %5481 = vmatprep.subr.bf16.mxu1 %v5724_v60 }
 0x9ad   : > { %5448 = vmatmul.mubr.bf16.vlgmr.msra.gmra.mrb[192].mxu0 %v3806_v22 }
 0x9af   : > { %5482 = vmatpush3.bf16.msra.mxu1 %v5724_v60 }
 0x9b0   : > { %5483 = vmatprep.subr.bf16.mxu1 %v5725_v2 }
 0x9b1   : > { %v5405_v41 = vpop.f32.mrb[164].mxu1 }
 0x9b2   : > { %v3590_v28 = vadd.f32 %v5405_v41, %v7741_v46  ;;  %v3581_v10 = vpop.f32.mrb[165].mxu1 }
 0x9b3   : > { %v3582_v44 = vadd.f32 %v7741_v46, %v3581_v10  ;;  %v5406_v34 = vpop.f32.mrb[166].mxu1  ;;  %5484 = vmatpush3.bf16.msra.mxu1 %v5725_v2 }
 0x9b4   : > { %v3730_v48 = vmul.f32 0.01, %v3590_v28  ;;  %v3593_v50 = vadd.f32 %v5406_v34, %v7741_v46  ;;  %v3584_v13 = vpop.f32.mrb[167].mxu1  ;;  %vm3698_vm4 = vcmp.ge.f32.partialorder %v3590_v28, 0.0 }
 0x9b5   : > { %v3728_v25 = vmul.f32 0.01, %v3582_v44  ;;  %v3585_v8 = vadd.f32 %v7741_v46, %v3584_v13  ;;  %vm3696_vm5 = vcmp.ge.f32.partialorder %v3582_v44, 0.0 }
 0x9b6   : > { %vm3699_vm6 = vcmp.ge.f32.partialorder %v3593_v50, 0.0  ;;  %v3731_v19 = vmul.f32 0.01, %v3593_v50  ;;  %v3762_v31 = vsel %vm3698_vm4, %v3590_v28, %v3730_v48 }
 0x9b7   : > { %vm3697_vm7 = vcmp.ge.f32.partialorder %v3585_v8, 0.0  ;;  %v3729_v23 = vmul.f32 0.01, %v3585_v8  ;;  %v3760_v49 = vsel %vm3696_vm5, %v3582_v44, %v3728_v25 }
 0x9b8   : > { %v3763_v9 = vsel %vm3699_vm6, %v3593_v50, %v3731_v19  ;;  %v5726_v50 = vld [vmem:[%s6532_s26 + $0x18] sm:$0xff]  }
 0x9b9   : > { %v3761_v47 = vsel %vm3697_vm7, %v3585_v8, %v3729_v23  ;;  %v3808_v62 = vpack.c.bf16 %v3763_v9, %v3762_v31  ;;  %5485 = vmatprep.subr.bf16.mxu1 %v5726_v50  ;;  %v5727_v9 = vld [vmem:[%s6532_s26 + $0x20] sm:$0xff]  }
 0x9ba   : > { %v3807_v4 = vpack.c.bf16 %v3761_v47, %v3760_v49  ;;  %5486 = vmatpush3.bf16.msra.mxu1 %v5726_v50 }
 0x9bb   : > { %5487 = vmatprep.subr.bf16.mxu1 %v5727_v9 }
 0x9bc   : > { %5451 = vmatprep.mubr.bf16.mxu0 %v3807_v4 }
 0x9bd   : > { %5452 = vmatmul.mubr.bf16.gmra.mrb[196].mxu0 %v3808_v62 }
 0x9be   : > { %5488 = vmatpush3.bf16.msra.mxu1 %v5727_v9 }
 0x9c1   : > { %v5409_v14 = vpop.f32.mrb[168].mxu1 }
 0x9c2   : > { %v3606_v12 = vadd.f32 %v5409_v14, %v7741_v46  ;;  %v3597_v39 = vpop.f32.mrb[169].mxu1 }
 0x9c3   : > { %v3598_v7 = vadd.f32 %v7741_v46, %v3597_v39  ;;  %v5410_v51 = vpop.f32.mrb[170].mxu1 }
 0x9c4   : > { %v3734_v0 = vmul.f32 0.01, %v3606_v12  ;;  %v3609_v30 = vadd.f32 %v5410_v51, %v7741_v46  ;;  %v3600_v5 = vpop.f32.mrb[171].mxu1  ;;  %vm3702_vm8 = vcmp.ge.f32.partialorder %v3606_v12, 0.0 }
 0x9c5   : > { %v3732_v55 = vmul.f32 0.01, %v3598_v7  ;;  %v3601_v33 = vadd.f32 %v7741_v46, %v3600_v5  ;;  %vm3700_vm9 = vcmp.ge.f32.partialorder %v3598_v7, 0.0 }
 0x9c6   : > { %vm3703_vm10 = vcmp.ge.f32.partialorder %v3609_v30, 0.0  ;;  %v3735_v37 = vmul.f32 0.01, %v3609_v30  ;;  %v3766_v18 = vsel %vm3702_vm8, %v3606_v12, %v3734_v0 }
 0x9c7   : > { %vm3701_vm11 = vcmp.ge.f32.partialorder %v3601_v33, 0.0  ;;  %v3733_v11 = vmul.f32 0.01, %v3601_v33  ;;  %v3764_v32 = vsel %vm3700_vm9, %v3598_v7, %v3732_v55 }
 0x9c8   : > { %v3767_v21 = vsel %vm3703_vm10, %v3609_v30, %v3735_v37 }
 0x9c9   : > { %v3765_v54 = vsel %vm3701_vm11, %v3601_v33, %v3733_v11  ;;  %v3810_v42 = vpack.c.bf16 %v3767_v21, %v3766_v18 }
 0x9ca   : > { %v3809_v1 = vpack.c.bf16 %v3765_v54, %v3764_v32  ;;  %v5728_v32 = vld [vmem:[%s6532_s26 + $0x28] sm:$0xff]   ;;  %v5729_v54 = vld [vmem:[%s6532_s26 + $0x30] sm:$0xff]  }
 0x9cb   : > { %5489 = vmatprep.subr.bf16.mxu1 %v5728_v32 }
 0x9cc   : > { %5455 = vmatprep.mubr.bf16.mxu0 %v3809_v1  ;;  %5490 = vmatpush3.bf16.msra.mxu1 %v5728_v32 }
 0x9cd   : > { %5456 = vmatmul.mubr.bf16.gmra.mrb[200].mxu0 %v3810_v42  ;;  %5491 = vmatprep.subr.bf16.mxu1 %v5729_v54  ;;  %v5730_v42 = vld [vmem:[%s6532_s26 + $0x38] sm:$0xff]   ;;  %s7893_s26 = scalar_lea.hbm %s8206_s1, %s4790_s16 }
 0x9d0   : > { %5492 = vmatpush3.bf16.msra.mxu1 %v5729_v54 }
 0x9d1   : > { %v5413_v16 = vpop.f32.mrb[172].mxu1  ;;  %5493 = vmatprep.subr.bf16.mxu1 %v5730_v42 }
 0x9d2   : > { %v3622_v58 = vadd.f32 %v5413_v16, %v7741_v46  ;;  %v3613_v56 = vpop.f32.mrb[173].mxu1 }
 0x9d3   : > { %v3614_v45 = vadd.f32 %v7741_v46, %v3613_v56  ;;  %v5414_v3 = vpop.f32.mrb[174].mxu1 }
 0x9d4   : > { %v3738_v35 = vmul.f32 0.01, %v3622_v58  ;;  %v3625_v40 = vadd.f32 %v5414_v3, %v7741_v46  ;;  %v3616_v26 = vpop.f32.mrb[175].mxu1  ;;  %vm3706_vm12 = vcmp.ge.f32.partialorder %v3622_v58, 0.0  ;;  %5494 = vmatpush3.bf16.msra.mxu1 %v5730_v42 }
 0x9d5   : > { %v3736_v24 = vmul.f32 0.01, %v3614_v45  ;;  %v3617_v43 = vadd.f32 %v7741_v46, %v3616_v26  ;;  %vm3704_vm13 = vcmp.ge.f32.partialorder %v3614_v45, 0.0 }
 0x9d6   : > { %vm3707_vm14 = vcmp.ge.f32.partialorder %v3625_v40, 0.0  ;;  %v3739_v53 = vmul.f32 0.01, %v3625_v40  ;;  %v3770_v15 = vsel %vm3706_vm12, %v3622_v58, %v3738_v35 }
 0x9d7   : > { %vm3705_vm15 = vcmp.ge.f32.partialorder %v3617_v43, 0.0  ;;  %v3737_v57 = vmul.f32 0.01, %v3617_v43  ;;  %v3768_v6 = vsel %vm3704_vm13, %v3614_v45, %v3736_v24 }
 0x9d8   : > { %v3771_v38 = vsel %vm3707_vm14, %v3625_v40, %v3739_v53 }
 0x9d9   : > { %v3769_v36 = vsel %vm3705_vm15, %v3617_v43, %v3737_v57  ;;  %v3812_v17 = vpack.c.bf16 %v3771_v38, %v3770_v15 }
 0x9da   : > { %v3811_v61 = vpack.c.bf16 %v3769_v36, %v3768_v6 }
 0x9dc   : > { %5459 = vmatprep.mubr.bf16.mxu0 %v3811_v61 }
 0x9dd   : > { %5460 = vmatmul.mubr.bf16.gmra.mrb[204].mxu0 %v3812_v17 }
 0x9e1   : > { %v5417_v29 = vpop.f32.mrb[176].mxu1 }
 0x9e2   : > { %v3638_v52 = vadd.f32 %v5417_v29, %v7741_v46  ;;  %v3629_v59 = vpop.f32.mrb[177].mxu1 }
 0x9e3   : > { %v3630_v22 = vadd.f32 %v7741_v46, %v3629_v59  ;;  %v5418_v63 = vpop.f32.mrb[178].mxu1 }
 0x9e4   : > { %v3742_v20 = vmul.f32 0.01, %v3638_v52  ;;  %v3641_v41 = vadd.f32 %v5418_v63, %v7741_v46  ;;  %v3632_v28 = vpop.f32.mrb[179].mxu1  ;;  %vm3710_vm0 = vcmp.ge.f32.partialorder %v3638_v52, 0.0 }
 0x9e5   : > { %v3740_v10 = vmul.f32 0.01, %v3630_v22  ;;  %v3633_v44 = vadd.f32 %v7741_v46, %v3632_v28  ;;  %vm3708_vm1 = vcmp.ge.f32.partialorder %v3630_v22, 0.0 }
 0x9e6   : > { %vm3711_vm2 = vcmp.ge.f32.partialorder %v3641_v41, 0.0  ;;  %v3743_v34 = vmul.f32 0.01, %v3641_v41  ;;  %v3774_v13 = vsel %vm3710_vm0, %v3638_v52, %v3742_v20 }
 0x9e7   : > { %vm3709_vm3 = vcmp.ge.f32.partialorder %v3633_v44, 0.0  ;;  %v3741_v48 = vmul.f32 0.01, %v3633_v44  ;;  %v3772_v8 = vsel %vm3708_vm1, %v3630_v22, %v3740_v10 }
 0x9e8   : > { %v3775_v25 = vsel %vm3711_vm2, %v3641_v41, %v3743_v34 }
 0x9e9   : > { %v3773_v19 = vsel %vm3709_vm3, %v3633_v44, %v3741_v48  ;;  %v3814_v23 = vpack.c.bf16 %v3775_v25, %v3774_v13  ;;  %v7784_v25 = vld [vmem:[%s7652_s14 + $0x3] ss:$0 sm:$0xff] }
 0x9ea   : > { %v3813_v31 = vpack.c.bf16 %v3773_v19, %v3772_v8 }
 0x9ec   : > { %5463 = vmatprep.mubr.bf16.mxu0 %v3813_v31 }
 0x9ed   : > { %5464 = vmatmul.mubr.bf16.gmra.mrb[208].mxu0 %v3814_v23 }
 0x9f1   : > { %v5421_v49 = vpop.f32.mrb[180].mxu1 }
 0x9f2   : > { %v3654_v47 = vadd.f32 %v5421_v49, %v7741_v46  ;;  %v3645_v62 = vpop.f32.mrb[181].mxu1 }
 0x9f3   : > { %v3646_v4 = vadd.f32 %v7741_v46, %v3645_v62  ;;  %v5422_v14 = vpop.f32.mrb[182].mxu1 }
 0x9f4   : > { %v3746_v12 = vmul.f32 0.01, %v3654_v47  ;;  %v3657_v39 = vadd.f32 %v5422_v14, %v7741_v46  ;;  %v3648_v7 = vpop.f32.mrb[183].mxu1  ;;  %vm3714_vm4 = vcmp.ge.f32.partialorder %v3654_v47, 0.0 }
 0x9f5   : > { %v3744_v51 = vmul.f32 0.01, %v3646_v4  ;;  %v3649_v0 = vadd.f32 %v7741_v46, %v3648_v7  ;;  %vm3712_vm5 = vcmp.ge.f32.partialorder %v3646_v4, 0.0 }
 0x9f6   : > { %vm3715_vm6 = vcmp.ge.f32.partialorder %v3657_v39, 0.0  ;;  %v3747_v30 = vmul.f32 0.01, %v3657_v39  ;;  %v3778_v55 = vsel %vm3714_vm4, %v3654_v47, %v3746_v12 }
 0x9f7   : > { %vm3713_vm7 = vcmp.ge.f32.partialorder %v3649_v0, 0.0  ;;  %v3745_v5 = vmul.f32 0.01, %v3649_v0  ;;  %v3776_v37 = vsel %vm3712_vm5, %v3646_v4, %v3744_v51 }
 0x9f8   : > { %v3779_v33 = vsel %vm3715_vm6, %v3657_v39, %v3747_v30 }
 0x9f9   : > { %v3777_v11 = vsel %vm3713_vm7, %v3649_v0, %v3745_v5  ;;  %v3816_v18 = vpack.c.bf16 %v3779_v33, %v3778_v55 }
 0x9fa   : > { %v3815_v21 = vpack.c.bf16 %v3777_v11, %v3776_v37 }
 0x9fc   : > { %5467 = vmatprep.mubr.bf16.mxu0 %v3815_v21 }
 0x9fd   : > { %5468 = vmatmul.mubr.bf16.gmra.mrb[212].mxu0 %v3816_v18 }
 0xa43   : > { %v5425_v1 = vpop.f32.mrb[184].mxu1 }
 0xa44   : > { %v3670_v16 = vadd.f32 %v5425_v1, %v7741_v46  ;;  %v3661_v58 = vpop.f32.mrb[185].mxu1 }
 0xa45   : > { %v3662_v56 = vadd.f32 %v7741_v46, %v3661_v58  ;;  %v5426_v45 = vpop.f32.mrb[186].mxu1 }
 0xa46   : > { %v3750_v3 = vmul.f32 0.01, %v3670_v16  ;;  %v3673_v35 = vadd.f32 %v5426_v45, %v7741_v46  ;;  %v3664_v40 = vpop.f32.mrb[187].mxu1  ;;  %vm3718_vm8 = vcmp.ge.f32.partialorder %v3670_v16, 0.0 }
 0xa47   : > { %v3748_v26 = vmul.f32 0.01, %v3662_v56  ;;  %v3665_v24 = vadd.f32 %v7741_v46, %v3664_v40  ;;  %vm3716_vm9 = vcmp.ge.f32.partialorder %v3662_v56, 0.0 }
 0xa48   : > { %vm3719_vm10 = vcmp.ge.f32.partialorder %v3673_v35, 0.0  ;;  %v3751_v43 = vmul.f32 0.01, %v3673_v35  ;;  %v3782_v57 = vsel %vm3718_vm8, %v3670_v16, %v3750_v3 }
 0xa49   : > { %vm3717_vm11 = vcmp.ge.f32.partialorder %v3665_v24, 0.0  ;;  %v3749_v53 = vmul.f32 0.01, %v3665_v24  ;;  %v3780_v38 = vsel %vm3716_vm9, %v3662_v56, %v3748_v26 }
 0xa4a   : > { %v3783_v15 = vsel %vm3719_vm10, %v3673_v35, %v3751_v43 }
 0xa4b   : > { %v3781_v6 = vsel %vm3717_vm11, %v3665_v24, %v3749_v53  ;;  %v3818_v36 = vpack.c.bf16 %v3783_v15, %v3782_v57 }
 0xa4c   : > { %v3817_v17 = vpack.c.bf16 %v3781_v6, %v3780_v38 }
 0xa4e   : > { %5471 = vmatprep.mubr.bf16.mxu0 %v3817_v17 }
 0xa4f   : > { %5472 = vmatmul.mubr.bf16.gmra.mrb[216].mxu0 %v3818_v36 }
 0xa53   : > { %v5429_v61 = vpop.f32.mrb[188].mxu1 }
 0xa54   : > { %v3686_v27 = vadd.f32 %v5429_v61, %v7741_v46  ;;  %v3677_v60 = vpop.f32.mrb[189].mxu1 }
 0xa55   : > { %v3678_v29 = vadd.f32 %v7741_v46, %v3677_v60  ;;  %v5430_v52 = vpop.f32.mrb[190].mxu1 }
 0xa56   : > { %v3754_v59 = vmul.f32 0.01, %v3686_v27  ;;  %v3689_v22 = vadd.f32 %v5430_v52, %v7741_v46  ;;  %v3680_v63 = vpop.f32.mrb[191].mxu1  ;;  %vm3722_vm12 = vcmp.ge.f32.partialorder %v3686_v27, 0.0 }
 0xa57   : > { %v3752_v2 = vmul.f32 0.01, %v3678_v29  ;;  %v3681_v20 = vadd.f32 %v7741_v46, %v3680_v63  ;;  %vm3720_vm13 = vcmp.ge.f32.partialorder %v3678_v29, 0.0 }
 0xa58   : > { %vm3723_vm14 = vcmp.ge.f32.partialorder %v3689_v22, 0.0  ;;  %v3755_v41 = vmul.f32 0.01, %v3689_v22  ;;  %v3786_v10 = vsel %vm3722_vm12, %v3686_v27, %v3754_v59 }
 0xa59   : > { %vm3721_vm15 = vcmp.ge.f32.partialorder %v3681_v20, 0.0  ;;  %v3753_v28 = vmul.f32 0.01, %v3681_v20  ;;  %v3784_v34 = vsel %vm3720_vm13, %v3678_v29, %v3752_v2 }
 0xa5a   : > { %v3787_v44 = vsel %vm3723_vm14, %v3689_v22, %v3755_v41 }
 0xa5b   : > { %v3785_v48 = vsel %vm3721_vm15, %v3681_v20, %v3753_v28  ;;  %v3820_v50 = vpack.c.bf16 %v3787_v44, %v3786_v10 }
 0xa5c   : > { %v3819_v13 = vpack.c.bf16 %v3785_v48, %v3784_v34 }
 0xa5e   : > { %5475 = vmatprep.mubr.bf16.mxu0 %v3819_v13 }
 0xa5f   : > { %5476 = vmatmul.mubr.bf16.gmra.mrb[220].mxu0 %v3820_v50 }
 0xa80   : > { %v5449_v8 = vpop.f32.mrb[192].mxu0 }
 0xa81   : > { %v3920_v19 = vadd.f32 %v5449_v8, %v7784_v25  ;;  %v3911_v23 = vpop.f32.mrb[193].mxu0 }
 0xa82   : > { %v3912_v46 = vadd.f32 %v7784_v25, %v3911_v23  ;;  %v5450_v31 = vpop.f32.mrb[194].mxu0 }
 0xa83   : > { %v4072_v9 = vmul.f32 0.01, %v3920_v19  ;;  %v3923_v49 = vadd.f32 %v5450_v31, %v7784_v25  ;;  %v3914_v47 = vpop.f32.mrb[195].mxu0  ;;  %vm4040_vm0 = vcmp.ge.f32.partialorder %v3920_v19, 0.0 }
 0xa84   : > { %v4070_v62 = vmul.f32 0.01, %v3912_v46  ;;  %v3915_v4 = vadd.f32 %v7784_v25, %v3914_v47  ;;  %vm4038_vm1 = vcmp.ge.f32.partialorder %v3912_v46, 0.0 }
 0xa85   : > { %vm4041_vm2 = vcmp.ge.f32.partialorder %v3923_v49, 0.0  ;;  %v4073_v14 = vmul.f32 0.01, %v3923_v49  ;;  %v4104_v39 = vsel %vm4040_vm0, %v3920_v19, %v4072_v9 }
 0xa86   : > { %vm4039_vm3 = vcmp.ge.f32.partialorder %v3915_v4, 0.0  ;;  %v4071_v12 = vmul.f32 0.01, %v3915_v4  ;;  %v4102_v0 = vsel %vm4038_vm1, %v3912_v46, %v4070_v62 }
 0xa87   : > { %v4105_v7 = vsel %vm4041_vm2, %v3923_v49, %v4073_v14 }
 0xa88   : > { %v4151_v51 = vpack.c.bf16 %v4105_v7, %v4104_v39  ;;  %v4103_v30 = vsel %vm4039_vm3, %v3915_v4, %v4071_v12 }
 0xa89   : > { %v4150_v5 = vpack.c.bf16 %v4103_v30, %v4102_v0 }
 0xa8b   : > { %5495 = vmatprep.mubr.bf16.mxu1 %v4150_v5 }
 0xa8c   : > { %5496 = vmatmul.mubr.bf16.vlgmr.msra.gmra.mrb[192].mxu1 %v4151_v51 }
 0xa90   : > { %v5453_v55 = vpop.f32.mrb[196].mxu0 }
 0xa91   : > { %v3936_v33 = vadd.f32 %v5453_v55, %v7784_v25  ;;  %v3927_v37 = vpop.f32.mrb[197].mxu0 }
 0xa92   : > { %v3928_v11 = vadd.f32 %v7784_v25, %v3927_v37  ;;  %v5454_v18 = vpop.f32.mrb[198].mxu0 }
 0xa93   : > { %v4076_v21 = vmul.f32 0.01, %v3936_v33  ;;  %v3939_v32 = vadd.f32 %v5454_v18, %v7784_v25  ;;  %v3930_v54 = vpop.f32.mrb[199].mxu0  ;;  %vm4044_vm4 = vcmp.ge.f32.partialorder %v3936_v33, 0.0 }
 0xa94   : > { %v4074_v42 = vmul.f32 0.01, %v3928_v11  ;;  %v3931_v1 = vadd.f32 %v7784_v25, %v3930_v54  ;;  %vm4042_vm5 = vcmp.ge.f32.partialorder %v3928_v11, 0.0 }
 0xa95   : > { %vm4045_vm6 = vcmp.ge.f32.partialorder %v3939_v32, 0.0  ;;  %v4077_v16 = vmul.f32 0.01, %v3939_v32  ;;  %v4108_v56 = vsel %vm4044_vm4, %v3936_v33, %v4076_v21 }
 0xa96   : > { %vm4043_vm7 = vcmp.ge.f32.partialorder %v3931_v1, 0.0  ;;  %v4075_v58 = vmul.f32 0.01, %v3931_v1  ;;  %v4106_v3 = vsel %vm4042_vm5, %v3928_v11, %v4074_v42 }
 0xa97   : > { %v4109_v45 = vsel %vm4045_vm6, %v3939_v32, %v4077_v16 }
 0xa98   : > { %v4107_v35 = vsel %vm4043_vm7, %v3931_v1, %v4075_v58  ;;  %v4153_v40 = vpack.c.bf16 %v4109_v45, %v4108_v56 }
 0xa99   : > { %v4152_v26 = vpack.c.bf16 %v4107_v35, %v4106_v3 }
 0xa9b   : > { %5499 = vmatprep.mubr.bf16.mxu1 %v4152_v26 }
 0xa9c   : > { %5500 = vmatmul.mubr.bf16.gmra.mrb[196].mxu1 %v4153_v40 }
 0xaa0   : > { %v5457_v24 = vpop.f32.mrb[200].mxu0 }
 0xaa1   : > { %v3952_v43 = vadd.f32 %v5457_v24, %v7784_v25  ;;  %v3943_v53 = vpop.f32.mrb[201].mxu0 }
 0xaa2   : > { %v3944_v57 = vadd.f32 %v7784_v25, %v3943_v53  ;;  %v5458_v15 = vpop.f32.mrb[202].mxu0 }
 0xaa3   : > { %v4080_v38 = vmul.f32 0.01, %v3952_v43  ;;  %v3955_v6 = vadd.f32 %v5458_v15, %v7784_v25  ;;  %v3946_v36 = vpop.f32.mrb[203].mxu0  ;;  %vm4048_vm8 = vcmp.ge.f32.partialorder %v3952_v43, 0.0 }
 0xaa4   : > { %v4078_v17 = vmul.f32 0.01, %v3944_v57  ;;  %v3947_v61 = vadd.f32 %v7784_v25, %v3946_v36  ;;  %vm4046_vm9 = vcmp.ge.f32.partialorder %v3944_v57, 0.0 }
 0xaa5   : > { %vm4049_vm10 = vcmp.ge.f32.partialorder %v3955_v6, 0.0  ;;  %v4081_v27 = vmul.f32 0.01, %v3955_v6  ;;  %v4112_v29 = vsel %vm4048_vm8, %v3952_v43, %v4080_v38 }
 0xaa6   : > { %vm4047_vm11 = vcmp.ge.f32.partialorder %v3947_v61, 0.0  ;;  %v4079_v60 = vmul.f32 0.01, %v3947_v61  ;;  %v4110_v59 = vsel %vm4046_vm9, %v3944_v57, %v4078_v17 }
 0xaa7   : > { %v4113_v52 = vsel %vm4049_vm10, %v3955_v6, %v4081_v27 }
 0xaa8   : > { %v4111_v22 = vsel %vm4047_vm11, %v3947_v61, %v4079_v60  ;;  %v4155_v63 = vpack.c.bf16 %v4113_v52, %v4112_v29 }
 0xaa9   : > { %v4154_v2 = vpack.c.bf16 %v4111_v22, %v4110_v59 }
 0xaab   : > { %5503 = vmatprep.mubr.bf16.mxu1 %v4154_v2 }
 0xaac   : > { %5504 = vmatmul.mubr.bf16.gmra.mrb[200].mxu1 %v4155_v63 }
 0xab0   : > { %v5461_v20 = vpop.f32.mrb[204].mxu0 }
 0xab1   : > { %v3968_v41 = vadd.f32 %v5461_v20, %v7784_v25  ;;  %v3959_v28 = vpop.f32.mrb[205].mxu0 }
 0xab2   : > { %v3960_v10 = vadd.f32 %v7784_v25, %v3959_v28  ;;  %v5462_v44 = vpop.f32.mrb[206].mxu0 }
 0xab3   : > { %v4084_v34 = vmul.f32 0.01, %v3968_v41  ;;  %v3971_v48 = vadd.f32 %v5462_v44, %v7784_v25  ;;  %v3962_v50 = vpop.f32.mrb[207].mxu0  ;;  %vm4052_vm12 = vcmp.ge.f32.partialorder %v3968_v41, 0.0 }
 0xab4   : > { %v4082_v13 = vmul.f32 0.01, %v3960_v10  ;;  %v3963_v8 = vadd.f32 %v7784_v25, %v3962_v50  ;;  %vm4050_vm13 = vcmp.ge.f32.partialorder %v3960_v10, 0.0 }
 0xab5   : > { %vm4053_vm14 = vcmp.ge.f32.partialorder %v3971_v48, 0.0  ;;  %v4085_v19 = vmul.f32 0.01, %v3971_v48  ;;  %v4116_v46 = vsel %vm4052_vm12, %v3968_v41, %v4084_v34 }
 0xab6   : > { %vm4051_vm15 = vcmp.ge.f32.partialorder %v3963_v8, 0.0  ;;  %v4083_v23 = vmul.f32 0.01, %v3963_v8  ;;  %v4114_v9 = vsel %vm4050_vm13, %v3960_v10, %v4082_v13 }
 0xab7   : > { %v4117_v31 = vsel %vm4053_vm14, %v3971_v48, %v4085_v19 }
 0xab8   : > { %v4115_v49 = vsel %vm4051_vm15, %v3963_v8, %v4083_v23  ;;  %v4157_v47 = vpack.c.bf16 %v4117_v31, %v4116_v46 }
 0xab9   : > { %v4156_v62 = vpack.c.bf16 %v4115_v49, %v4114_v9 }
 0xabb   : > { %5507 = vmatprep.mubr.bf16.mxu1 %v4156_v62 }
 0xabc   : > { %5508 = vmatmul.mubr.bf16.gmra.mrb[204].mxu1 %v4157_v47 }
 0xac0   : > { %v5465_v4 = vpop.f32.mrb[208].mxu0 }
 0xac1   : > { %v3984_v14 = vadd.f32 %v5465_v4, %v7784_v25  ;;  %v3975_v12 = vpop.f32.mrb[209].mxu0 }
 0xac2   : > { %v3976_v39 = vadd.f32 %v7784_v25, %v3975_v12  ;;  %v5466_v7 = vpop.f32.mrb[210].mxu0 }
 0xac3   : > { %v4088_v51 = vmul.f32 0.01, %v3984_v14  ;;  %v3987_v0 = vadd.f32 %v5466_v7, %v7784_v25  ;;  %v3978_v30 = vpop.f32.mrb[211].mxu0  ;;  %vm4056_vm0 = vcmp.ge.f32.partialorder %v3984_v14, 0.0 }
 0xac4   : > { %v4086_v5 = vmul.f32 0.01, %v3976_v39  ;;  %v3979_v55 = vadd.f32 %v7784_v25, %v3978_v30  ;;  %vm4054_vm1 = vcmp.ge.f32.partialorder %v3976_v39, 0.0 }
 0xac5   : > { %vm4057_vm2 = vcmp.ge.f32.partialorder %v3987_v0, 0.0  ;;  %v4089_v33 = vmul.f32 0.01, %v3987_v0  ;;  %v4120_v11 = vsel %vm4056_vm0, %v3984_v14, %v4088_v51 }
 0xac6   : > { %vm4055_vm3 = vcmp.ge.f32.partialorder %v3979_v55, 0.0  ;;  %v4087_v37 = vmul.f32 0.01, %v3979_v55  ;;  %v4118_v21 = vsel %vm4054_vm1, %v3976_v39, %v4086_v5 }
 0xac7   : > { %v4121_v18 = vsel %vm4057_vm2, %v3987_v0, %v4089_v33 }
 0xac8   : > { %v4119_v32 = vsel %vm4055_vm3, %v3979_v55, %v4087_v37  ;;  %v4159_v54 = vpack.c.bf16 %v4121_v18, %v4120_v11  ;;  %v7822_v55 = vld [vmem:[%s519_s22] ss:$0 sm:$0xff] }
 0xac9   : > { %v4158_v42 = vpack.c.bf16 %v4119_v32, %v4118_v21 }
 0xacb   : > { %5511 = vmatprep.mubr.bf16.mxu1 %v4158_v42 }
 0xacc   : > { %5512 = vmatmul.mubr.bf16.gmra.mrb[208].mxu1 %v4159_v54 }
 0xad0   : > { %v5469_v1 = vpop.f32.mrb[212].mxu0 }
 0xad1   : > { %v4000_v16 = vadd.f32 %v5469_v1, %v7784_v25  ;;  %v3991_v58 = vpop.f32.mrb[213].mxu0 }
 0xad2   : > { %v3992_v56 = vadd.f32 %v7784_v25, %v3991_v58  ;;  %v5470_v45 = vpop.f32.mrb[214].mxu0 }
 0xad3   : > { %v4092_v3 = vmul.f32 0.01, %v4000_v16  ;;  %v4003_v35 = vadd.f32 %v5470_v45, %v7784_v25  ;;  %v3994_v40 = vpop.f32.mrb[215].mxu0  ;;  %vm4060_vm4 = vcmp.ge.f32.partialorder %v4000_v16, 0.0 }
 0xad4   : > { %v4090_v26 = vmul.f32 0.01, %v3992_v56  ;;  %v3995_v24 = vadd.f32 %v7784_v25, %v3994_v40  ;;  %vm4058_vm5 = vcmp.ge.f32.partialorder %v3992_v56, 0.0 }
 0xad5   : > { %vm4061_vm6 = vcmp.ge.f32.partialorder %v4003_v35, 0.0  ;;  %v4093_v43 = vmul.f32 0.01, %v4003_v35  ;;  %v4124_v57 = vsel %vm4060_vm4, %v4000_v16, %v4092_v3 }
 0xad6   : > { %vm4059_vm7 = vcmp.ge.f32.partialorder %v3995_v24, 0.0  ;;  %v4091_v53 = vmul.f32 0.01, %v3995_v24  ;;  %v4122_v38 = vsel %vm4058_vm5, %v3992_v56, %v4090_v26 }
 0xad7   : > { %v4125_v15 = vsel %vm4061_vm6, %v4003_v35, %v4093_v43 }
 0xad8   : > { %v4123_v6 = vsel %vm4059_vm7, %v3995_v24, %v4091_v53  ;;  %v4161_v36 = vpack.c.bf16 %v4125_v15, %v4124_v57 }
 0xad9   : > { %v4160_v17 = vpack.c.bf16 %v4123_v6, %v4122_v38 }
 0xadb   : > { %5515 = vmatprep.mubr.bf16.mxu1 %v4160_v17 }
 0xadc   : > { %5516 = vmatmul.mubr.bf16.gmra.mrb[212].mxu1 %v4161_v36 }
 0xb22   : > { %v5473_v61 = vpop.f32.mrb[216].mxu0 }
 0xb23   : > { %v4016_v27 = vadd.f32 %v5473_v61, %v7784_v25  ;;  %v4007_v60 = vpop.f32.mrb[217].mxu0 }
 0xb24   : > { %v4008_v29 = vadd.f32 %v7784_v25, %v4007_v60  ;;  %v5474_v52 = vpop.f32.mrb[218].mxu0 }
 0xb25   : > { %v4096_v59 = vmul.f32 0.01, %v4016_v27  ;;  %v4019_v22 = vadd.f32 %v5474_v52, %v7784_v25  ;;  %v4010_v63 = vpop.f32.mrb[219].mxu0  ;;  %vm4064_vm8 = vcmp.ge.f32.partialorder %v4016_v27, 0.0 }
 0xb26   : > { %v4094_v2 = vmul.f32 0.01, %v4008_v29  ;;  %v4011_v20 = vadd.f32 %v7784_v25, %v4010_v63  ;;  %vm4062_vm9 = vcmp.ge.f32.partialorder %v4008_v29, 0.0 }
 0xb27   : > { %vm4065_vm10 = vcmp.ge.f32.partialorder %v4019_v22, 0.0  ;;  %v4097_v41 = vmul.f32 0.01, %v4019_v22  ;;  %v4128_v10 = vsel %vm4064_vm8, %v4016_v27, %v4096_v59 }
 0xb28   : > { %vm4063_vm11 = vcmp.ge.f32.partialorder %v4011_v20, 0.0  ;;  %v4095_v28 = vmul.f32 0.01, %v4011_v20  ;;  %v4126_v34 = vsel %vm4062_vm9, %v4008_v29, %v4094_v2 }
 0xb29   : > { %v4129_v44 = vsel %vm4065_vm10, %v4019_v22, %v4097_v41 }
 0xb2a   : > { %v4127_v48 = vsel %vm4063_vm11, %v4011_v20, %v4095_v28  ;;  %v4163_v50 = vpack.c.bf16 %v4129_v44, %v4128_v10 }
 0xb2b   : > { %v4162_v13 = vpack.c.bf16 %v4127_v48, %v4126_v34 }
 0xb2d   : > { %5519 = vmatprep.mubr.bf16.mxu1 %v4162_v13 }
 0xb2e   : > { %5520 = vmatmul.mubr.bf16.gmra.mrb[216].mxu1 %v4163_v50 }
 0xb32   : > { %v5477_v8 = vpop.f32.mrb[220].mxu0 }
 0xb33   : > { %v4032_v19 = vadd.f32 %v5477_v8, %v7784_v25  ;;  %v4023_v23 = vpop.f32.mrb[221].mxu0 }
 0xb34   : > { %v4024_v46 = vadd.f32 %v7784_v25, %v4023_v23  ;;  %v5478_v31 = vpop.f32.mrb[222].mxu0 }
 0xb35   : > { %v4100_v9 = vmul.f32 0.01, %v4032_v19  ;;  %v4035_v49 = vadd.f32 %v5478_v31, %v7784_v25  ;;  %v4026_v47 = vpop.f32.mrb[223].mxu0  ;;  %vm4068_vm12 = vcmp.ge.f32.partialorder %v4032_v19, 0.0 }
 0xb36   : > { %v4098_v62 = vmul.f32 0.01, %v4024_v46  ;;  %v4027_v4 = vadd.f32 %v7784_v25, %v4026_v47  ;;  %vm4066_vm13 = vcmp.ge.f32.partialorder %v4024_v46, 0.0 }
 0xb37   : > { %vm4069_vm14 = vcmp.ge.f32.partialorder %v4035_v49, 0.0  ;;  %v4101_v14 = vmul.f32 0.01, %v4035_v49  ;;  %v4132_v39 = vsel %vm4068_vm12, %v4032_v19, %v4100_v9 }
 0xb38   : > { %vm4067_vm15 = vcmp.ge.f32.partialorder %v4027_v4, 0.0  ;;  %v4099_v12 = vmul.f32 0.01, %v4027_v4  ;;  %v4130_v51 = vsel %vm4066_vm13, %v4024_v46, %v4098_v62 }
 0xb39   : > { %v4133_v7 = vsel %vm4069_vm14, %v4035_v49, %v4101_v14 }
 0xb3a   : > { %v4131_v0 = vsel %vm4067_vm15, %v4027_v4, %v4099_v12  ;;  %v4165_v30 = vpack.c.bf16 %v4133_v7, %v4132_v39 }
 0xb3b   : > { %v4164_v5 = vpack.c.bf16 %v4131_v0, %v4130_v51 }
 0xb3d   : > { %5523 = vmatprep.mubr.bf16.mxu1 %v4164_v5 }
 0xb3e   : > { %5524 = vmatmul.mubr.bf16.gmra.mrb[220].mxu1 %v4165_v30 }
 0xb5f   : > { %v5497_v25 = vpop.f32.mrb[192].mxu1 }
 0xb60   : > { %v4264_v33 = vadd.f32 %v5497_v25, %v7822_v55  ;;  %v4255_v37 = vpop.f32.mrb[193].mxu1 }
 0xb61   : > { %v4256_v11 = vadd.f32 %v7822_v55, %v4255_v37  ;;  %v5498_v18 = vpop.f32.mrb[194].mxu1 }
 0xb62   : > { %4384 = vst [vmem:[%s7828_s23 + $0x10] sm:$0xff] %v4264_v33  ;;  %v4267_v21 = vadd.f32 %v5498_v18, %v7822_v55  ;;  %v4258_v32 = vpop.f32.mrb[195].mxu1 }
 0xb63   : > { %4382 = vst [vmem:[%s7828_s23] sm:$0xff] %v4256_v11  ;;  %v4259_v54 = vadd.f32 %v7822_v55, %v4258_v32 }
 0xb64   : > { %4385 = vst [vmem:[%s7828_s23 + $0x18] sm:$0xff] %v4267_v21 }
 0xb65   : > { %4383 = vst [vmem:[%s7828_s23 + $0x8] sm:$0xff] %v4259_v54 }
 0xb6f   : > { %v5501_v42 = vpop.f32.mrb[196].mxu1 }
 0xb70   : > { %v4280_v1 = vadd.f32 %v5501_v42, %v7822_v55  ;;  %v4271_v16 = vpop.f32.mrb[197].mxu1 }
 0xb71   : > { %v4272_v58 = vadd.f32 %v7822_v55, %v4271_v16  ;;  %v5502_v56 = vpop.f32.mrb[198].mxu1 }
 0xb72   : > { %4388 = vst [vmem:[%s7828_s23 + $0x30] sm:$0xff] %v4280_v1  ;;  %v4283_v45 = vadd.f32 %v5502_v56, %v7822_v55  ;;  %v4274_v3 = vpop.f32.mrb[199].mxu1 }
 0xb73   : > { %4386 = vst [vmem:[%s7828_s23 + $0x20] sm:$0xff] %v4272_v58  ;;  %v4275_v35 = vadd.f32 %v7822_v55, %v4274_v3 }
 0xb74   : > { %4389 = vst [vmem:[%s7828_s23 + $0x38] sm:$0xff] %v4283_v45 }
 0xb75   : > { %4387 = vst [vmem:[%s7828_s23 + $0x28] sm:$0xff] %v4275_v35 }
 0xb7f   : > { %v5505_v40 = vpop.f32.mrb[200].mxu1 }
 0xb80   : > { %v4296_v26 = vadd.f32 %v5505_v40, %v7822_v55  ;;  %v4287_v24 = vpop.f32.mrb[201].mxu1 }
 0xb81   : > { %v4288_v43 = vadd.f32 %v7822_v55, %v4287_v24  ;;  %v5506_v53 = vpop.f32.mrb[202].mxu1 }
 0xb82   : > { %4392 = vst [vmem:[%s7828_s23 + $0x50] sm:$0xff] %v4296_v26  ;;  %v4299_v57 = vadd.f32 %v5506_v53, %v7822_v55  ;;  %v4290_v15 = vpop.f32.mrb[203].mxu1 }
 0xb83   : > { %4390 = vst [vmem:[%s7828_s23 + $0x40] sm:$0xff] %v4288_v43  ;;  %v4291_v38 = vadd.f32 %v7822_v55, %v4290_v15 }
 0xb84   : > { %4393 = vst [vmem:[%s7828_s23 + $0x58] sm:$0xff] %v4299_v57 }
 0xb85   : > { %4391 = vst [vmem:[%s7828_s23 + $0x48] sm:$0xff] %v4291_v38 }
 0xb8f   : > { %v5509_v6 = vpop.f32.mrb[204].mxu1 }
 0xb90   : > { %v4312_v36 = vadd.f32 %v5509_v6, %v7822_v55  ;;  %v4303_v17 = vpop.f32.mrb[205].mxu1 }
 0xb91   : > { %v4304_v61 = vadd.f32 %v7822_v55, %v4303_v17  ;;  %v5510_v27 = vpop.f32.mrb[206].mxu1 }
 0xb92   : > { %4396 = vst [vmem:[%s7828_s23 + $0x70] sm:$0xff] %v4312_v36  ;;  %v4315_v60 = vadd.f32 %v5510_v27, %v7822_v55  ;;  %v4306_v29 = vpop.f32.mrb[207].mxu1 }
 0xb93   : > { %4394 = vst [vmem:[%s7828_s23 + $0x60] sm:$0xff] %v4304_v61  ;;  %v4307_v52 = vadd.f32 %v7822_v55, %v4306_v29 }
 0xb94   : > { %4397 = vst [vmem:[%s7828_s23 + $0x78] sm:$0xff] %v4315_v60 }
 0xb95   : > { %4395 = vst [vmem:[%s7828_s23 + $0x68] sm:$0xff] %v4307_v52 }
 0xb9f   : > { %v5513_v59 = vpop.f32.mrb[208].mxu1 }
 0xba0   : > { %v4328_v22 = vadd.f32 %v5513_v59, %v7822_v55  ;;  %v4319_v63 = vpop.f32.mrb[209].mxu1 }
 0xba1   : > { %v4320_v2 = vadd.f32 %v7822_v55, %v4319_v63  ;;  %v5514_v20 = vpop.f32.mrb[210].mxu1 }
 0xba2   : > { %4400 = vst [vmem:[%s7828_s23 + $0x90] sm:$0xff] %v4328_v22  ;;  %v4331_v41 = vadd.f32 %v5514_v20, %v7822_v55  ;;  %v4322_v28 = vpop.f32.mrb[211].mxu1 }
 0xba3   : > { %4398 = vst [vmem:[%s7828_s23 + $0x80] sm:$0xff] %v4320_v2  ;;  %v4323_v10 = vadd.f32 %v7822_v55, %v4322_v28 }
 0xba4   : > { %4401 = vst [vmem:[%s7828_s23 + $0x98] sm:$0xff] %v4331_v41 }
 0xba5   : > { %4399 = vst [vmem:[%s7828_s23 + $0x88] sm:$0xff] %v4323_v10 }
 0xbaf   : > { %v5517_v44 = vpop.f32.mrb[212].mxu1 }
 0xbb0   : > { %v4344_v34 = vadd.f32 %v5517_v44, %v7822_v55  ;;  %v4335_v48 = vpop.f32.mrb[213].mxu1 }
 0xbb1   : > { %v4336_v50 = vadd.f32 %v7822_v55, %v4335_v48  ;;  %v5518_v13 = vpop.f32.mrb[214].mxu1 }
 0xbb2   : > { %4404 = vst [vmem:[%s7828_s23 + $0xb0] sm:$0xff] %v4344_v34  ;;  %v4347_v8 = vadd.f32 %v5518_v13, %v7822_v55  ;;  %v4338_v19 = vpop.f32.mrb[215].mxu1 }
 0xbb3   : > { %4402 = vst [vmem:[%s7828_s23 + $0xa0] sm:$0xff] %v4336_v50  ;;  %v4339_v23 = vadd.f32 %v7822_v55, %v4338_v19 }
 0xbb4   : > { %4405 = vst [vmem:[%s7828_s23 + $0xb8] sm:$0xff] %v4347_v8 }
 0xbb5   : > { %4403 = vst [vmem:[%s7828_s23 + $0xa8] sm:$0xff] %v4339_v23 }
 0xc01   : > { %v5521_v46 = vpop.f32.mrb[216].mxu1 }
 0xc02   : > { %v4360_v31 = vadd.f32 %v5521_v46, %v7822_v55  ;;  %v4351_v9 = vpop.f32.mrb[217].mxu1 }
 0xc03   : > { %v4352_v49 = vadd.f32 %v7822_v55, %v4351_v9  ;;  %v5522_v47 = vpop.f32.mrb[218].mxu1 }
 0xc04   : > { %4408 = vst [vmem:[%s7828_s23 + $0xd0] sm:$0xff] %v4360_v31  ;;  %v4363_v62 = vadd.f32 %v5522_v47, %v7822_v55  ;;  %v4354_v4 = vpop.f32.mrb[219].mxu1 }
 0xc05   : > { %4406 = vst [vmem:[%s7828_s23 + $0xc0] sm:$0xff] %v4352_v49  ;;  %v4355_v14 = vadd.f32 %v7822_v55, %v4354_v4 }
 0xc06   : > { %4409 = vst [vmem:[%s7828_s23 + $0xd8] sm:$0xff] %v4363_v62 }
 0xc07   : > { %4407 = vst [vmem:[%s7828_s23 + $0xc8] sm:$0xff] %v4355_v14 }
 0xc11   : > { %v5525_v12 = vpop.f32.mrb[220].mxu1 }
 0xc12   : > { %v4376_v39 = vadd.f32 %v5525_v12, %v7822_v55  ;;  %v4367_v7 = vpop.f32.mrb[221].mxu1 }
 0xc13   : > { %v4368_v51 = vadd.f32 %v7822_v55, %v4367_v7  ;;  %v5526_v0 = vpop.f32.mrb[222].mxu1 }
 0xc14   : > { %4412 = vst [vmem:[%s7828_s23 + $0xf0] sm:$0xff] %v4376_v39  ;;  %v4379_v30 = vadd.f32 %v5526_v0, %v7822_v55  ;;  %v4370_v5 = vpop.f32.mrb[223].mxu1 }
 0xc15   : > { %4410 = vst [vmem:[%s7828_s23 + $0xe0] sm:$0xff] %v4368_v51  ;;  %v4371_v25 = vadd.f32 %v7822_v55, %v4370_v5 }
 0xc16   : > { %4413 = vst [vmem:[%s7828_s23 + $0xf8] sm:$0xff] %v4379_v30 }
 0xc17   : > { %4411 = vst [vmem:[%s7828_s23 + $0xe8] sm:$0xff] %v4371_v25 }
 0xc18   : > { %6110 = shalt.err (!%p6107_p7)
}
 0xc19   : > { %s6111_s19 = scalar_lea.hbm %s7893_s26, 4096  ;;  %s6115_s18 = scalar_lea.hbm %s8206_s1, 8192 }
 0xc1a   : > { %p6112_p1 = scmp.ne.s32.totalorder %s7893_s26, %s6111_s19  ;;  %p6116_p3 = scmp.lt.u32.totalorder %s7893_s26, %s8206_s1 }
 0xc1b   : > { %p6117_p0 = scmp.lt.u32.totalorder %s6115_s18, %s6111_s19  ;;  %p6119_p13 = scmp.lt.u32.totalorder %s6111_s19, %s7893_s26 }
 0xc1c   : > { %p6113_p12 = pnand %p6112_p1, %p8207_p11 }
 0xc1d   : > { %p6118_p8 = por %p6117_p0, %p6116_p3 }
 0xc1e   : > { %p6114_p2 = pneg %p6113_p12 }
 0xc1f   : > { %p6120_p6 = por %p6119_p13, %p6118_p8 }
 0xc21   : > { %p6121_p9 = pnand %p6120_p6, %p6114_p2 }
 0xc23   : > { %6124 = shalt.err (!%p6121_p9)
}
 0xc24   : > { %s6191_s17 = smov 128   ;;  %s6192_s25 = smov 8  }
 0xc25   : > { %5549 = dma.vmem_to_hbm [thread:$0]  (%p8207_p11), %s7895_s3, 4096, %s7893_s26, %s4415_s13, %s6191_s17, %s6191_s17, %s6192_s25  }
 0xc26 PF: > { %s8208_s24 = sld [smem:[#allocation19_spill]]  ;;  %s8209_s22 = sld [smem:[#allocation24_spill]] }
 0xc27   : > { %p8211_p4 = scmp.ge.s32.totalorder %s6175_s12, 2 }
 0xc2c   : > { %s4443_s23 = sand.u32 1, %s8208_s24   ;;  %p8210_p10 = scmp.ne.s32.totalorder %s8209_s22, 0 }
 0xc2d   : > { %s4444_s16 = scalar_lea.sflag [#allocation4], %s4443_s23 }
 0xc2e   : > { %p5572_p5 = pnand %p8211_p4, %p8210_p10 }
 0xc30   : > { %6158 = dma.done.wait (!%p5572_p5), %s4444_s16, 4096  }
 0xc31   : > { %6160 = vsyncadd (!%p5572_p5), %s4444_s16, 4294963200  ;;  %s8212_s12 = sld [smem:[#allocation21_spill]]  ;;  %s8213_s28 = sld [smem:[#allocation20_spill]] }
 0xc32   : > { %s8214_s11 = sld [smem:[#allocation22_spill]]  ;;  %s8215_s30 = smov %s6167_s10 }
 0xc37   : > { %p27_p7 = scmp.ge.s32.totalorder %s8212_s12, 4   ;;  %s8216_s10 = smov %s8213_s28 }
 0xc39   :  { %29 = sbr.rel (!%p27_p7) target bundleno = 15 (0xf), region = 155 }
 0xc40   :  { %4449 = vsyncpa [#allocation3], 1 }
 0xc41   :  { %4451 = vsyncpa [#allocation3 + $0x1], 1 }
 0xc42   :  { %4452 = vsyncpa [#allocation6], 1 }
 0xc43   :  { %4453 = vsyncpa [#allocation9], 1 }
 0xc44   :  { %4455 = vsyncpa [#allocation9 + $0x1], 1 }
 0xc45   :  { %4456 = vsyncpa [#allocation12], 1 }
 0xc46   :  { %4458 = vsyncpa [#allocation12 + $0x1], 1 }
 0xc47   :  { %4459 = vsyncpa [#allocation4], 1 }
 0xc48   :  { %4461 = vsyncpa [#allocation4 + $0x1], 1 }

</bundles_post_ra>
